<compile_context>
chip_gen: v5e
topology: v5e:2x2
jax: 0.10.0
libtpu: 0.0.40
codegen_flags: <defaults>
</compile_context>

<pallas_src>
import math

import numpy as np

import jax
import jax.numpy as jnp
from jax import lax
from jax.experimental import pallas as pl
from jax.experimental.pallas import tpu as pltpu

EPS = 1e-5


# --------------------------------------------------------------------------
# Interpolation helpers (align_corners=True bilinear).
# --------------------------------------------------------------------------
def make_interp_matrix(n_in, n_out):
    """Row-stochastic matrix for 1-D bilinear resize, align_corners=True."""
    i_out = jnp.arange(n_out, dtype=jnp.float32)
    denom = float(max(n_out - 1, 1))          # guard n_out == 1
    src = i_out * (n_in - 1) / denom
    i0 = jnp.clip(jnp.floor(src).astype(jnp.int32), 0, n_in - 1)
    i1 = jnp.clip(i0 + 1, 0, n_in - 1)
    w1 = src - i0.astype(jnp.float32)
    w0 = 1.0 - w1
    R = jnp.zeros((n_out, n_in), jnp.float32)
    R = R.at[jnp.arange(n_out), i0].add(w0)
    R = R.at[jnp.arange(n_out), i1].add(w1)
    return R


def interp_taps(n_in, n_out):
    """Static (i0, i1, w0, w1) taps for 1-D bilinear resize, align_corners=True."""
    denom = max(n_out - 1, 1)
    taps = []
    for i in range(n_out):
        src = i * (n_in - 1) / denom
        i0 = min(max(int(math.floor(src)), 0), n_in - 1)
        i1 = min(i0 + 1, n_in - 1)
        w1 = float(src - i0)
        taps.append((i0, i1, 1.0 - w1, w1))
    return taps


def fold_bn(conv_bias, gamma, beta, mean, var):
    scale = gamma / jnp.sqrt(var + EPS)
    bias = (conv_bias - mean) * scale + beta
    return scale, bias


# --------------------------------------------------------------------------
# Pallas forward.
# --------------------------------------------------------------------------
def upsampler_forward(x, params):
    N, Cin, H, W = x.shape
    H2, W2 = 2 * H, 2 * W
    Cmid = params["w1"].shape[0]
    Cout = params["w2"].shape[0]
    C_r, Cm_r, Co_r = N * Cin, N * Cmid, N * Cout
    L = H2 * W2                               # flat image size (lane axis)
    G = 128 * ((W2 + 1 + 127) // 128)         # zero guard (>= W2 + 1), 128-aligned
    B = 2 * G + L                             # flat padded-buffer width

    # ---- upsample as per-group small matmuls --------------------------------
    # Pack r_rep output rows per 128-lane group (aligned stores).  Each group
    # only needs the contiguous range of input rows that its 2-tap height
    # blend touches, so the per-group operator is small (O(W*W2) entries).
    r_rep = 128 // W2 if (W2 <= 128 and 128 % W2 == 0) else 1
    while r_rep > 1 and H2 % r_rep != 0:
        r_rep //= 2
    Wg = r_rep * W2                           # lanes written per group
    n_groups = H2 // r_rep

    h_taps = interp_taps(H, H2)               # static python
    w_taps = interp_taps(W, W2)

    groups = []                                # (lo, hi) contributing input rows
    for g in range(n_groups):
        rows = h_taps[g * r_rep:(g + 1) * r_rep]
        lo = min(min(t[0], t[1]) for t in rows)
        hi = max(max(t[0], t[1]) for t in rows)
        groups.append((lo, hi))
    Kg = max(hi - lo + 1 for lo, hi in groups) * W   # padded contraction size

    ops_np = np.zeros((n_groups, Kg, Wg), np.float32)
    for g, (lo, hi) in enumerate(groups):
        for j in range(r_rep):
            ia, ib, wa, wb = h_taps[g * r_rep + j]
            for (h, wh) in ((ia, wa), (ib, wb)):
                if wh == 0.0:
                    continue
                for w2 in range(W2):
                    i0, i1, u0, u1 = w_taps[w2]
                    ops_np[g, (h - lo) * W + i0, j * W2 + w2] += wh * u0
                    ops_np[g, (h - lo) * W + i1, j * W2 + w2] += wh * u1
    up_ops = jnp.asarray(ops_np.reshape(n_groups * Kg, Wg), jnp.float32)

    # Input flattened to (N*Cin, H*W) with a zero tail so every group can read
    # a fixed-size Kg-lane slice; kept in f32 (exact interpolation weights).
    P = ((H * W + Kg + 127) // 128) * 128
    x_flat = x.reshape(C_r, H * W).astype(jnp.float32)
    x_pad = jnp.pad(x_flat, ((0, 0), (0, P - H * W)))

    # ---- conv weights: BN folded, block-diagonal over batch, bf16 ------------
    s1, bias1 = fold_bn(params["b1"], params["g1"], params["be1"],
                        params["rm1"], params["rv1"])
    s2, bias2 = fold_bn(params["b2"], params["g2"], params["be2"],
                        params["rm2"], params["rv2"])
    w1_eff = params["w1"] * s1[:, None, None, None]
    w2_eff = params["w2"] * s2[:, None, None, None]
    w1_t = jnp.transpose(w1_eff, (2, 3, 0, 1)).reshape(9, Cmid, Cin)
    w2_t = jnp.transpose(w2_eff, (2, 3, 0, 1)).reshape(9, Cout, Cmid)
    eyeN = jnp.eye(N, dtype=jnp.float32)
    # Block-diagonal over batch: row = n*Cout_ch + co,
    #                            col = tap*(N*Cin_ch) + n*Cin_ch + ci.
    W1m = (jnp.einsum("toc,nm->notmc", w1_t, eyeN)
           .reshape(Cm_r, 9 * C_r).astype(jnp.bfloat16))
    W2m = (jnp.einsum("toc,nm->notmc", w2_t, eyeN)
           .reshape(Co_r, 9 * Cm_r).astype(jnp.bfloat16))
    b1r = jnp.tile(bias1, N).reshape(Cm_r, 1).astype(jnp.float32)
    b2r = jnp.tile(bias2, N).reshape(Co_r, 1).astype(jnp.float32)

    # Column masks absorbing the horizontal wrap-around of the flat layout
    # (tap kx=0 is invalid at output column 0, tap kx=2 at column W2-1).
    col = jnp.arange(L, dtype=jnp.int32) % W2
    masks = jnp.stack([(col != 0), (col != W2 - 1)]).astype(jnp.bfloat16)   # (2, L)

    # ---- kernel ----------------------------------------------------------------
    def kernel(x_ref, ops_ref, w1_ref, b1_ref, w2_ref, b2_ref, msk_ref, o_ref,
               u_ref, stk1_ref, mid_ref, stk2_ref):
        f32, bf16 = jnp.float32, jnp.bfloat16

        # Zero the guard lanes of the flat padded buffers (interiors are
        # fully overwritten below).
        u_ref[:, :G] = jnp.zeros((C_r, G), bf16)
        u_ref[:, G + L:] = jnp.zeros((C_r, B - G - L), bf16)
        mid_ref[:, :G] = jnp.zeros((Cm_r, G), bf16)
        mid_ref[:, G + L:] = jnp.zeros((Cm_r, B - G - L), bf16)

        # (1) bilinear 2x upsample: one small MXU matmul per 128-lane output
        #     group, landing directly in the flat layout with aligned stores.
        for g, (lo, _) in enumerate(groups):
            lhs = x_ref[:, lo * W: lo * W + Kg]              # (C_r, Kg)  f32
            op = ops_ref[g * Kg:(g + 1) * Kg, :]             # (Kg, Wg)   f32
            ug = jnp.dot(lhs, op, preferred_element_type=f32)
            u_ref[:, G + g * Wg: G + (g + 1) * Wg] = ug.astype(bf16)

        ml = msk_ref[0:1, :]
        mr = msk_ref[1:2, :]

        def build_stacked(src_ref, dst_ref, rows):
            # dst[t*rows + c, l] = src[c, G + l + (ky-1)*W2 + (kx-1)], with the
            # wrap-around lanes zeroed -> one K = 9*rows matmul per conv.
            for t in range(9):
                ky, kx = t // 3, t % 3
                off = G + (ky - 1) * W2 + (kx - 1)
                v = src_ref[:, off:off + L]
                if kx == 0:
                    v = v * ml
                elif kx == 2:
                    v = v * mr
                dst_ref[t * rows:(t + 1) * rows, :] = v

        # (2) conv1 (3x3, pad=1) + folded BN + ReLU: single K = 9*C_r matmul.
        build_stacked(u_ref, stk1_ref, C_r)
        acc1 = jnp.dot(w1_ref[...], stk1_ref[...], preferred_element_type=f32)
        mid = jnp.maximum(acc1 + b1_ref[...], 0.0)
        mid_ref[:, G:G + L] = mid.astype(bf16)

        # (3) conv2 (3x3, pad=1) + folded BN + ReLU: single K = 9*Cm_r matmul.
        build_stacked(mid_ref, stk2_ref, Cm_r)
        acc2 = jnp.dot(w2_ref[...], stk2_ref[...], preferred_element_type=f32)
        o_ref[...] = jnp.maximum(acc2 + b2_ref[...], 0.0)

    y = pl.pallas_call(
        kernel,
        out_shape=jax.ShapeDtypeStruct((Co_r, L), jnp.float32),
        grid_spec=pltpu.PrefetchScalarGridSpec(
            num_scalar_prefetch=0,
            grid=(1,),                        # whole batch in one grid step
            in_specs=[
                pl.BlockSpec((C_r, P), lambda i: (0, 0)),
                pl.BlockSpec((n_groups * Kg, Wg), lambda i: (0, 0)),
                pl.BlockSpec((Cm_r, 9 * C_r), lambda i: (0, 0)),
                pl.BlockSpec((Cm_r, 1), lambda i: (0, 0)),
                pl.BlockSpec((Co_r, 9 * Cm_r), lambda i: (0, 0)),
                pl.BlockSpec((Co_r, 1), lambda i: (0, 0)),
                pl.BlockSpec((2, L), lambda i: (0, 0)),
            ],
            out_specs=pl.BlockSpec((Co_r, L), lambda i: (0, 0)),
            scratch_shapes=[
                pltpu.VMEM((C_r, B), jnp.bfloat16),        # flat padded upsample
                pltpu.VMEM((9 * C_r, L), jnp.bfloat16),    # conv1 stacked lhs
                pltpu.VMEM((Cm_r, B), jnp.bfloat16),       # flat padded mid image
                pltpu.VMEM((9 * Cm_r, L), jnp.bfloat16),   # conv2 stacked lhs
            ],
        ),
        compiler_params=pltpu.CompilerParams(
            dimension_semantics=("parallel",),
            vmem_limit_bytes=32 * 1024 * 1024,
        ),
    )(x_pad, up_ops, W1m, b1r, W2m, b2r, masks)

    # row index = n*Cout + co, lane index = i*W2 + j  ->  NCHW, no stripping.
    return y.reshape(N, Cout, H2, W2)


# --------------------------------------------------------------------------
# Pure-JAX reference (independent of the kernel's layout tricks).
# --------------------------------------------------------------------------
def upsampler_reference(x, params):
    N, Cin, H, W = x.shape
    H2, W2 = 2 * H, 2 * W
    Rh = make_interp_matrix(H, H2)
    Rw = make_interp_matrix(W, W2)
    u = jnp.einsum("ah,nchw->ncaw", Rh, x)
    u = jnp.einsum("bw,ncaw->ncab", Rw, u)

    def conv_bn_relu(z, w, bconv, gamma, beta, mean, var):
        y = lax.conv_general_dilated(
            z, w, window_strides=(1, 1), padding=((1, 1), (1, 1)),
            dimension_numbers=("NCHW", "OIHW", "NCHW"))
        y = y + bconv[None, :, None, None]
        y = (gamma[None, :, None, None] * (y - mean[None, :, None, None])
             / jnp.sqrt(var[None, :, None, None] + EPS)
             + beta[None, :, None, None])
        return jnp.maximum(y, 0.0)

    y = conv_bn_relu(u, params["w1"], params["b1"], params["g1"],
                     params["be1"], params["rm1"], params["rv1"])
    y = conv_bn_relu(y, params["w2"], params["b2"], params["g2"],
                     params["be2"], params["rm2"], params["rv2"])
    return y


# --------------------------------------------------------------------------
if __name__ == "__main__":
    key = jax.random.PRNGKey(0)
    in_dim, mid_dim, out_dim = 8, 16, 4   # mid_dim unused by UpSampler.forward
    N, H, W = 2, 16, 16
    cmid = in_dim // 2                    # DoubleConv(in, out, in // 2)

    ks = jax.random.split(key, 13)
    params = dict(
        # conv1: Conv2d(in_dim, in_dim//2, 3, padding=1) + BatchNorm2d
        w1=jax.random.normal(ks[0], (cmid, in_dim, 3, 3), jnp.float32)
           / jnp.sqrt(9.0 * in_dim),
        b1=0.1 * jax.random.normal(ks[1], (cmid,), jnp.float32),
        g1=1.0 + 0.1 * jax.random.normal(ks[2], (cmid,), jnp.float32),
        be1=0.1 * jax.random.normal(ks[3], (cmid,), jnp.float32),
        rm1=0.1 * jax.random.normal(ks[4], (cmid,), jnp.float32),
        rv1=1.0 + 0.5 * jax.random.uniform(ks[5], (cmid,), jnp.float32),
        # conv2: Conv2d(in_dim//2, out_dim, 3, padding=1) + BatchNorm2d
        w2=jax.random.normal(ks[6], (out_dim, cmid, 3, 3), jnp.float32)
           / jnp.sqrt(9.0 * cmid),
        b2=0.1 * jax.random.normal(ks[7], (out_dim,), jnp.float32),
        g2=1.0 + 0.1 * jax.random.normal(ks[8], (out_dim,), jnp.float32),
        be2=0.1 * jax.random.normal(ks[9], (out_dim,), jnp.float32),
        rm2=0.1 * jax.random.normal(ks[10], (out_dim,), jnp.float32),
        rv2=1.0 + 0.5 * jax.random.uniform(ks[11], (out_dim,), jnp.float32),
    )

    x = jax.random.normal(ks[12], (N, in_dim, H, W), jnp.float32)

    y = upsampler_forward(x, params)
    y = jax.block_until_ready(y)

    y_ref = upsampler_reference(x, params)
    assert y.shape == (N, out_dim, 2 * H, 2 * W), y.shape
    max_err = float(jnp.max(jnp.abs(y - y_ref)))
    mean_err = float(jnp.mean(jnp.abs(y - y_ref)))
    # bf16 MXU operands for the convs -> looser tolerance than an all-f32 run;
    # upsample operands, accumulation and the BN/ReLU epilogue stay in f32.
    assert max_err < 5e-2, f"max abs err {max_err}"
    assert mean_err < 1e-2, f"mean abs err {mean_err}"

    print("KERNEL_OK")
</pallas_src>

<mosaic_0001>
module attributes {stable_mosaic.version = 11 : i64} {
  func.func @kernel(%arg0: i32, %arg1: memref<16x384xf32, #tpu.memory_space<vmem>>, %arg2: memref<512x128xf32, #tpu.memory_space<vmem>>, %arg3: memref<8x144xbf16, #tpu.memory_space<vmem>>, %arg4: memref<8x1xf32, #tpu.memory_space<vmem>>, %arg5: memref<8x72xbf16, #tpu.memory_space<vmem>>, %arg6: memref<8x1xf32, #tpu.memory_space<vmem>>, %arg7: memref<2x1024xbf16, #tpu.memory_space<vmem>>, %arg8: memref<8x1024xf32, #tpu.memory_space<vmem>>, %arg9: memref<16x1280xbf16, #tpu.memory_space<vmem>>, %arg10: memref<144x1024xbf16, #tpu.memory_space<vmem>>, %arg11: memref<8x1280xbf16, #tpu.memory_space<vmem>>, %arg12: memref<72x1024xbf16, #tpu.memory_space<vmem>>) attributes {dimension_semantics = [#tpu.dimension_semantics<parallel>], iteration_bounds = array<i64: 1>, scalar_prefetch = 0 : i64, scratch_operands = 4 : i64, tpu.core_type = #tpu.core_type<tc>, window_params = [{pipeline_mode = #tpu.pipeline_mode<synchronous>, transform_indices = @transform_0, window_bounds = array<i64: 16, 384>}, {pipeline_mode = #tpu.pipeline_mode<synchronous>, transform_indices = @transform_1, window_bounds = array<i64: 512, 128>}, {pipeline_mode = #tpu.pipeline_mode<synchronous>, transform_indices = @transform_2, window_bounds = array<i64: 8, 144>}, {pipeline_mode = #tpu.pipeline_mode<synchronous>, transform_indices = @transform_3, window_bounds = array<i64: 8, 1>}, {pipeline_mode = #tpu.pipeline_mode<synchronous>, transform_indices = @transform_4, window_bounds = array<i64: 8, 72>}, {pipeline_mode = #tpu.pipeline_mode<synchronous>, transform_indices = @transform_5, window_bounds = array<i64: 8, 1>}, {pipeline_mode = #tpu.pipeline_mode<synchronous>, transform_indices = @transform_6, window_bounds = array<i64: 2, 1024>}, {pipeline_mode = #tpu.pipeline_mode<synchronous>, transform_indices = @transform_7, window_bounds = array<i64: 8, 1024>}]} {
    %cst = arith.constant 0.000000e+00 : bf16
    %0 = vector.broadcast %cst : bf16 to vector<16x128xbf16>
    %c0 = arith.constant 0 : index
    %c0_0 = arith.constant 0 : index
    %1 = vector.load %arg9[%c0, %c0_0] : memref<16x1280xbf16, #tpu.memory_space<vmem>>, vector<16x128xbf16>
    tpu.vector_store %arg9[%c0, %c0_0], %0 {strides = array<i32>} : memref<16x1280xbf16, #tpu.memory_space<vmem>>, vector<16x128xbf16>,
    %cst_1 = arith.constant 0.000000e+00 : bf16
    %2 = vector.broadcast %cst_1 : bf16 to vector<16x128xbf16>
    %c0_2 = arith.constant 0 : index
    %c1152 = arith.constant 1152 : index
    %3 = vector.load %arg9[%c0_2, %c1152] : memref<16x1280xbf16, #tpu.memory_space<vmem>>, vector<16x128xbf16>
    tpu.vector_store %arg9[%c0_2, %c1152], %2 {strides = array<i32>} : memref<16x1280xbf16, #tpu.memory_space<vmem>>, vector<16x128xbf16>,
    %cst_3 = arith.constant 0.000000e+00 : bf16
    %4 = vector.broadcast %cst_3 : bf16 to vector<8x128xbf16>
    %c0_4 = arith.constant 0 : index
    %c0_5 = arith.constant 0 : index
    %5 = vector.load %arg11[%c0_4, %c0_5] : memref<8x1280xbf16, #tpu.memory_space<vmem>>, vector<8x128xbf16>
    tpu.vector_store %arg11[%c0_4, %c0_5], %4 {strides = array<i32>} : memref<8x1280xbf16, #tpu.memory_space<vmem>>, vector<8x128xbf16>,
    %cst_6 = arith.constant 0.000000e+00 : bf16
    %6 = vector.broadcast %cst_6 : bf16 to vector<8x128xbf16>
    %c0_7 = arith.constant 0 : index
    %c1152_8 = arith.constant 1152 : index
    %7 = vector.load %arg11[%c0_7, %c1152_8] : memref<8x1280xbf16, #tpu.memory_space<vmem>>, vector<8x128xbf16>
    tpu.vector_store %arg11[%c0_7, %c1152_8], %6 {strides = array<i32>} : memref<8x1280xbf16, #tpu.memory_space<vmem>>, vector<8x128xbf16>,
    %c0_9 = arith.constant 0 : index
    %c0_10 = arith.constant 0 : index
    %8 = vector.load %arg1[%c0_9, %c0_10] : memref<16x384xf32, #tpu.memory_space<vmem>>, vector<16x64xf32>
    %c0_11 = arith.constant 0 : index
    %c0_12 = arith.constant 0 : index
    %9 = vector.load %arg2[%c0_11, %c0_12] : memref<512x128xf32, #tpu.memory_space<vmem>>, vector<64x128xf32>
    %cst_13 = arith.constant dense<0.000000e+00> : vector<16x128xf32>
    %10 = tpu.matmul %8, %9, %cst_13 {dimension_numbers = #tpu.dot_dimension_numbers<[1], [0], [0], [1], [0, 0, 1, 1], [], []>} : vector<16x64xf32>, vector<64x128xf32>, vector<16x128xf32> -> vector<16x128xf32>
    %11 = arith.truncf %10 : vector<16x128xf32> to vector<16x128xbf16>
    %c0_14 = arith.constant 0 : index
    %c128 = arith.constant 128 : index
    %12 = vector.load %arg9[%c0_14, %c128] : memref<16x1280xbf16, #tpu.memory_space<vmem>>, vector<16x128xbf16>
    tpu.vector_store %arg9[%c0_14, %c128], %11 {strides = array<i32>} : memref<16x1280xbf16, #tpu.memory_space<vmem>>, vector<16x128xbf16>,
    %c0_15 = arith.constant 0 : index
    %c16 = arith.constant 16 : index
    %13 = vector.load %arg1[%c0_15, %c16] : memref<16x384xf32, #tpu.memory_space<vmem>>, vector<16x64xf32>
    %c64 = arith.constant 64 : index
    %c0_16 = arith.constant 0 : index
    %14 = vector.load %arg2[%c64, %c0_16] : memref<512x128xf32, #tpu.memory_space<vmem>>, vector<64x128xf32>
    %cst_17 = arith.constant dense<0.000000e+00> : vector<16x128xf32>
    %15 = tpu.matmul %13, %14, %cst_17 {dimension_numbers = #tpu.dot_dimension_numbers<[1], [0], [0], [1], [0, 0, 1, 1], [], []>} : vector<16x64xf32>, vector<64x128xf32>, vector<16x128xf32> -> vector<16x128xf32>
    %16 = arith.truncf %15 : vector<16x128xf32> to vector<16x128xbf16>
    %c0_18 = arith.constant 0 : index
    %c256 = arith.constant 256 : index
    %17 = vector.load %arg9[%c0_18, %c256] : memref<16x1280xbf16, #tpu.memory_space<vmem>>, vector<16x128xbf16>
    tpu.vector_store %arg9[%c0_18, %c256], %16 {strides = array<i32>} : memref<16x1280xbf16, #tpu.memory_space<vmem>>, vector<16x128xbf16>,
    %c0_19 = arith.constant 0 : index
    %c48 = arith.constant 48 : index
    %18 = vector.load %arg1[%c0_19, %c48] : memref<16x384xf32, #tpu.memory_space<vmem>>, vector<16x64xf32>
    %c128_20 = arith.constant 128 : index
    %c0_21 = arith.constant 0 : index
    %19 = vector.load %arg2[%c128_20, %c0_21] : memref<512x128xf32, #tpu.memory_space<vmem>>, vector<64x128xf32>
    %cst_22 = arith.constant dense<0.000000e+00> : vector<16x128xf32>
    %20 = tpu.matmul %18, %19, %cst_22 {dimension_numbers = #tpu.dot_dimension_numbers<[1], [0], [0], [1], [0, 0, 1, 1], [], []>} : vector<16x64xf32>, vector<64x128xf32>, vector<16x128xf32> -> vector<16x128xf32>
    %21 = arith.truncf %20 : vector<16x128xf32> to vector<16x128xbf16>
    %c0_23 = arith.constant 0 : index
    %c384 = arith.constant 384 : index
    %22 = vector.load %arg9[%c0_23, %c384] : memref<16x1280xbf16, #tpu.memory_space<vmem>>, vector<16x128xbf16>
    tpu.vector_store %arg9[%c0_23, %c384], %21 {strides = array<i32>} : memref<16x1280xbf16, #tpu.memory_space<vmem>>, vector<16x128xbf16>,
    %c0_24 = arith.constant 0 : index
    %c80 = arith.constant 80 : index
    %23 = vector.load %arg1[%c0_24, %c80] : memref<16x384xf32, #tpu.memory_space<vmem>>, vector<16x64xf32>
    %c192 = arith.constant 192 : index
    %c0_25 = arith.constant 0 : index
    %24 = vector.load %arg2[%c192, %c0_25] : memref<512x128xf32, #tpu.memory_space<vmem>>, vector<64x128xf32>
    %cst_26 = arith.constant dense<0.000000e+00> : vector<16x128xf32>
    %25 = tpu.matmul %23, %24, %cst_26 {dimension_numbers = #tpu.dot_dimension_numbers<[1], [0], [0], [1], [0, 0, 1, 1], [], []>} : vector<16x64xf32>, vector<64x128xf32>, vector<16x128xf32> -> vector<16x128xf32>
    %26 = arith.truncf %25 : vector<16x128xf32> to vector<16x128xbf16>
    %c0_27 = arith.constant 0 : index
    %c512 = arith.constant 512 : index
    %27 = vector.load %arg9[%c0_27, %c512] : memref<16x1280xbf16, #tpu.memory_space<vmem>>, vector<16x128xbf16>
    tpu.vector_store %arg9[%c0_27, %c512], %26 {strides = array<i32>} : memref<16x1280xbf16, #tpu.memory_space<vmem>>, vector<16x128xbf16>,
    %c0_28 = arith.constant 0 : index
    %c112 = arith.constant 112 : index
    %28 = vector.load %arg1[%c0_28, %c112] : memref<16x384xf32, #tpu.memory_space<vmem>>, vector<16x64xf32>
    %c256_29 = arith.constant 256 : index
    %c0_30 = arith.constant 0 : index
    %29 = vector.load %arg2[%c256_29, %c0_30] : memref<512x128xf32, #tpu.memory_space<vmem>>, vector<64x128xf32>
    %cst_31 = arith.constant dense<0.000000e+00> : vector<16x128xf32>
    %30 = tpu.matmul %28, %29, %cst_31 {dimension_numbers = #tpu.dot_dimension_numbers<[1], [0], [0], [1], [0, 0, 1, 1], [], []>} : vector<16x64xf32>, vector<64x128xf32>, vector<16x128xf32> -> vector<16x128xf32>
    %31 = arith.truncf %30 : vector<16x128xf32> to vector<16x128xbf16>
    %c0_32 = arith.constant 0 : index
    %c640 = arith.constant 640 : index
    %32 = vector.load %arg9[%c0_32, %c640] : memref<16x1280xbf16, #tpu.memory_space<vmem>>, vector<16x128xbf16>
    tpu.vector_store %arg9[%c0_32, %c640], %31 {strides = array<i32>} : memref<16x1280xbf16, #tpu.memory_space<vmem>>, vector<16x128xbf16>,
    %c0_33 = arith.constant 0 : index
    %c144 = arith.constant 144 : index
    %33 = vector.load %arg1[%c0_33, %c144] : memref<16x384xf32, #tpu.memory_space<vmem>>, vector<16x64xf32>
    %c320 = arith.constant 320 : index
    %c0_34 = arith.constant 0 : index
    %34 = vector.load %arg2[%c320, %c0_34] : memref<512x128xf32, #tpu.memory_space<vmem>>, vector<64x128xf32>
    %cst_35 = arith.constant dense<0.000000e+00> : vector<16x128xf32>
    %35 = tpu.matmul %33, %34, %cst_35 {dimension_numbers = #tpu.dot_dimension_numbers<[1], [0], [0], [1], [0, 0, 1, 1], [], []>} : vector<16x64xf32>, vector<64x128xf32>, vector<16x128xf32> -> vector<16x128xf32>
    %36 = arith.truncf %35 : vector<16x128xf32> to vector<16x128xbf16>
    %c0_36 = arith.constant 0 : index
    %c768 = arith.constant 768 : index
    %37 = vector.load %arg9[%c0_36, %c768] : memref<16x1280xbf16, #tpu.memory_space<vmem>>, vector<16x128xbf16>
    tpu.vector_store %arg9[%c0_36, %c768], %36 {strides = array<i32>} : memref<16x1280xbf16, #tpu.memory_space<vmem>>, vector<16x128xbf16>,
    %c0_37 = arith.constant 0 : index
    %c176 = arith.constant 176 : index
    %38 = vector.load %arg1[%c0_37, %c176] : memref<16x384xf32, #tpu.memory_space<vmem>>, vector<16x64xf32>
    %c384_38 = arith.constant 384 : index
    %c0_39 = arith.constant 0 : index
    %39 = vector.load %arg2[%c384_38, %c0_39] : memref<512x128xf32, #tpu.memory_space<vmem>>, vector<64x128xf32>
    %cst_40 = arith.constant dense<0.000000e+00> : vector<16x128xf32>
    %40 = tpu.matmul %38, %39, %cst_40 {dimension_numbers = #tpu.dot_dimension_numbers<[1], [0], [0], [1], [0, 0, 1, 1], [], []>} : vector<16x64xf32>, vector<64x128xf32>, vector<16x128xf32> -> vector<16x128xf32>
    %41 = arith.truncf %40 : vector<16x128xf32> to vector<16x128xbf16>
    %c0_41 = arith.constant 0 : index
    %c896 = arith.constant 896 : index
    %42 = vector.load %arg9[%c0_41, %c896] : memref<16x1280xbf16, #tpu.memory_space<vmem>>, vector<16x128xbf16>
    tpu.vector_store %arg9[%c0_41, %c896], %41 {strides = array<i32>} : memref<16x1280xbf16, #tpu.memory_space<vmem>>, vector<16x128xbf16>,
    %c0_42 = arith.constant 0 : index
    %c208 = arith.constant 208 : index
    %43 = vector.load %arg1[%c0_42, %c208] : memref<16x384xf32, #tpu.memory_space<vmem>>, vector<16x64xf32>
    %c448 = arith.constant 448 : index
    %c0_43 = arith.constant 0 : index
    %44 = vector.load %arg2[%c448, %c0_43] : memref<512x128xf32, #tpu.memory_space<vmem>>, vector<64x128xf32>
    %cst_44 = arith.constant dense<0.000000e+00> : vector<16x128xf32>
    %45 = tpu.matmul %43, %44, %cst_44 {dimension_numbers = #tpu.dot_dimension_numbers<[1], [0], [0], [1], [0, 0, 1, 1], [], []>} : vector<16x64xf32>, vector<64x128xf32>, vector<16x128xf32> -> vector<16x128xf32>
    %46 = arith.truncf %45 : vector<16x128xf32> to vector<16x128xbf16>
    %c0_45 = arith.constant 0 : index
    %c1024 = arith.constant 1024 : index
    %47 = vector.load %arg9[%c0_45, %c1024] : memref<16x1280xbf16, #tpu.memory_space<vmem>>, vector<16x128xbf16>
    tpu.vector_store %arg9[%c0_45, %c1024], %46 {strides = array<i32>} : memref<16x1280xbf16, #tpu.memory_space<vmem>>, vector<16x128xbf16>,
    %c0_46 = arith.constant 0 : index
    %c0_47 = arith.constant 0 : index
    %48 = vector.load %arg7[%c0_46, %c0_47] : memref<2x1024xbf16, #tpu.memory_space<vmem>>, vector<1x1024xbf16>
    %c1 = arith.constant 1 : index
    %c0_48 = arith.constant 0 : index
    %49 = vector.load %arg7[%c1, %c0_48] : memref<2x1024xbf16, #tpu.memory_space<vmem>>, vector<1x1024xbf16>
    %c0_49 = arith.constant 0 : index
    %c95 = arith.constant 95 : index
    %50 = vector.load %arg9[%c0_49, %c95] : memref<16x1280xbf16, #tpu.memory_space<vmem>>, vector<16x1024xbf16>
    %51 = vector.broadcast %48 : vector<1x1024xbf16> to vector<16x1024xbf16>
    %52 = arith.mulf %50, %51 : vector<16x1024xbf16>
    %c0_50 = arith.constant 0 : index
    %c0_51 = arith.constant 0 : index
    %53 = vector.load %arg10[%c0_50, %c0_51] : memref<144x1024xbf16, #tpu.memory_space<vmem>>, vector<16x1024xbf16>
    tpu.vector_store %arg10[%c0_50, %c0_51], %52 {strides = array<i32>} : memref<144x1024xbf16, #tpu.memory_space<vmem>>, vector<16x1024xbf16>,
    %c0_52 = arith.constant 0 : index
    %c96 = arith.constant 96 : index
    %54 = vector.load %arg9[%c0_52, %c96] : memref<16x1280xbf16, #tpu.memory_space<vmem>>, vector<16x1024xbf16>
    %c16_53 = arith.constant 16 : index
    %c0_54 = arith.constant 0 : index
    %55 = vector.load %arg10[%c16_53, %c0_54] : memref<144x1024xbf16, #tpu.memory_space<vmem>>, vector<16x1024xbf16>
    tpu.vector_store %arg10[%c16_53, %c0_54], %54 {strides = array<i32>} : memref<144x1024xbf16, #tpu.memory_space<vmem>>, vector<16x1024xbf16>,
    %c0_55 = arith.constant 0 : index
    %c97 = arith.constant 97 : index
    %56 = vector.load %arg9[%c0_55, %c97] : memref<16x1280xbf16, #tpu.memory_space<vmem>>, vector<16x1024xbf16>
    %57 = vector.broadcast %49 : vector<1x1024xbf16> to vector<16x1024xbf16>
    %58 = arith.mulf %56, %57 : vector<16x1024xbf16>
    %c32 = arith.constant 32 : index
    %c0_56 = arith.constant 0 : index
    %59 = vector.load %arg10[%c32, %c0_56] : memref<144x1024xbf16, #tpu.memory_space<vmem>>, vector<16x1024xbf16>
    tpu.vector_store %arg10[%c32, %c0_56], %58 {strides = array<i32>} : memref<144x1024xbf16, #tpu.memory_space<vmem>>, vector<16x1024xbf16>,
    %c0_57 = arith.constant 0 : index
    %c127 = arith.constant 127 : index
    %60 = vector.load %arg9[%c0_57, %c127] : memref<16x1280xbf16, #tpu.memory_space<vmem>>, vector<16x1024xbf16>
    %61 = vector.broadcast %48 : vector<1x1024xbf16> to vector<16x1024xbf16>
    %62 = arith.mulf %60, %61 : vector<16x1024xbf16>
    %c48_58 = arith.constant 48 : index
    %c0_59 = arith.constant 0 : index
    %63 = vector.load %arg10[%c48_58, %c0_59] : memref<144x1024xbf16, #tpu.memory_space<vmem>>, vector<16x1024xbf16>
    tpu.vector_store %arg10[%c48_58, %c0_59], %62 {strides = array<i32>} : memref<144x1024xbf16, #tpu.memory_space<vmem>>, vector<16x1024xbf16>,
    %c0_60 = arith.constant 0 : index
    %c128_61 = arith.constant 128 : index
    %64 = vector.load %arg9[%c0_60, %c128_61] : memref<16x1280xbf16, #tpu.memory_space<vmem>>, vector<16x1024xbf16>
    %c64_62 = arith.constant 64 : index
    %c0_63 = arith.constant 0 : index
    %65 = vector.load %arg10[%c64_62, %c0_63] : memref<144x1024xbf16, #tpu.memory_space<vmem>>, vector<16x1024xbf16>
    tpu.vector_store %arg10[%c64_62, %c0_63], %64 {strides = array<i32>} : memref<144x1024xbf16, #tpu.memory_space<vmem>>, vector<16x1024xbf16>,
    %c0_64 = arith.constant 0 : index
    %c129 = arith.constant 129 : index
    %66 = vector.load %arg9[%c0_64, %c129] : memref<16x1280xbf16, #tpu.memory_space<vmem>>, vector<16x1024xbf16>
    %67 = vector.broadcast %49 : vector<1x1024xbf16> to vector<16x1024xbf16>
    %68 = arith.mulf %66, %67 : vector<16x1024xbf16>
    %c80_65 = arith.constant 80 : index
    %c0_66 = arith.constant 0 : index
    %69 = vector.load %arg10[%c80_65, %c0_66] : memref<144x1024xbf16, #tpu.memory_space<vmem>>, vector<16x1024xbf16>
    tpu.vector_store %arg10[%c80_65, %c0_66], %68 {strides = array<i32>} : memref<144x1024xbf16, #tpu.memory_space<vmem>>, vector<16x1024xbf16>,
    %c0_67 = arith.constant 0 : index
    %c159 = arith.constant 159 : index
    %70 = vector.load %arg9[%c0_67, %c159] : memref<16x1280xbf16, #tpu.memory_space<vmem>>, vector<16x1024xbf16>
    %71 = vector.broadcast %48 : vector<1x1024xbf16> to vector<16x1024xbf16>
    %72 = arith.mulf %70, %71 : vector<16x1024xbf16>
    %c96_68 = arith.constant 96 : index
    %c0_69 = arith.constant 0 : index
    %73 = vector.load %arg10[%c96_68, %c0_69] : memref<144x1024xbf16, #tpu.memory_space<vmem>>, vector<16x1024xbf16>
    tpu.vector_store %arg10[%c96_68, %c0_69], %72 {strides = array<i32>} : memref<144x1024xbf16, #tpu.memory_space<vmem>>, vector<16x1024xbf16>,
    %c0_70 = arith.constant 0 : index
    %c160 = arith.constant 160 : index
    %74 = vector.load %arg9[%c0_70, %c160] : memref<16x1280xbf16, #tpu.memory_space<vmem>>, vector<16x1024xbf16>
    %c112_71 = arith.constant 112 : index
    %c0_72 = arith.constant 0 : index
    %75 = vector.load %arg10[%c112_71, %c0_72] : memref<144x1024xbf16, #tpu.memory_space<vmem>>, vector<16x1024xbf16>
    tpu.vector_store %arg10[%c112_71, %c0_72], %74 {strides = array<i32>} : memref<144x1024xbf16, #tpu.memory_space<vmem>>, vector<16x1024xbf16>,
    %c0_73 = arith.constant 0 : index
    %c161 = arith.constant 161 : index
    %76 = vector.load %arg9[%c0_73, %c161] : memref<16x1280xbf16, #tpu.memory_space<vmem>>, vector<16x1024xbf16>
    %77 = vector.broadcast %49 : vector<1x1024xbf16> to vector<16x1024xbf16>
    %78 = arith.mulf %76, %77 : vector<16x1024xbf16>
    %c128_74 = arith.constant 128 : index
    %c0_75 = arith.constant 0 : index
    %79 = vector.load %arg10[%c128_74, %c0_75] : memref<144x1024xbf16, #tpu.memory_space<vmem>>, vector<16x1024xbf16>
    tpu.vector_store %arg10[%c128_74, %c0_75], %78 {strides = array<i32>} : memref<144x1024xbf16, #tpu.memory_space<vmem>>, vector<16x1024xbf16>,
    %c0_76 = arith.constant 0 : index
    %c0_77 = arith.constant 0 : index
    %80 = vector.load %arg3[%c0_76, %c0_77] : memref<8x144xbf16, #tpu.memory_space<vmem>>, vector<8x144xbf16>
    %c0_78 = arith.constant 0 : index
    %c0_79 = arith.constant 0 : index
    %81 = vector.load %arg10[%c0_78, %c0_79] : memref<144x1024xbf16, #tpu.memory_space<vmem>>, vector<144x1024xbf16>
    %cst_80 = arith.constant dense<0.000000e+00> : vector<8x1024xf32>
    %82 = tpu.matmul %80, %81, %cst_80 {dimension_numbers = #tpu.dot_dimension_numbers<[1], [0], [0], [1], [0, 0, 1, 1], [], []>} : vector<8x144xbf16>, vector<144x1024xbf16>, vector<8x1024xf32> -> vector<8x1024xf32>
    %c0_81 = arith.constant 0 : index
    %c0_82 = arith.constant 0 : index
    %83 = vector.load %arg4[%c0_81, %c0_82] : memref<8x1xf32, #tpu.memory_space<vmem>>, vector<8x1xf32>
    %84 = vector.broadcast %83 : vector<8x1xf32> to vector<8x1024xf32>
    %85 = arith.addf %82, %84 : vector<8x1024xf32>
    %cst_83 = arith.constant 0.000000e+00 : f32
    %86 = vector.broadcast %cst_83 : f32 to vector<8x1024xf32>
    %87 = arith.maximumf %85, %86 : vector<8x1024xf32>
    %88 = arith.truncf %87 : vector<8x1024xf32> to vector<8x1024xbf16>
    %c0_84 = arith.constant 0 : index
    %c128_85 = arith.constant 128 : index
    %89 = vector.load %arg11[%c0_84, %c128_85] : memref<8x1280xbf16, #tpu.memory_space<vmem>>, vector<8x1024xbf16>
    tpu.vector_store %arg11[%c0_84, %c128_85], %88 {strides = array<i32>} : memref<8x1280xbf16, #tpu.memory_space<vmem>>, vector<8x1024xbf16>,
    %c0_86 = arith.constant 0 : index
    %c95_87 = arith.constant 95 : index
    %90 = vector.load %arg11[%c0_86, %c95_87] : memref<8x1280xbf16, #tpu.memory_space<vmem>>, vector<8x1024xbf16>
    %91 = vector.broadcast %48 : vector<1x1024xbf16> to vector<8x1024xbf16>
    %92 = arith.mulf %90, %91 : vector<8x1024xbf16>
    %c0_88 = arith.constant 0 : index
    %c0_89 = arith.constant 0 : index
    %93 = vector.load %arg12[%c0_88, %c0_89] : memref<72x1024xbf16, #tpu.memory_space<vmem>>, vector<8x1024xbf16>
    tpu.vector_store %arg12[%c0_88, %c0_89], %92 {strides = array<i32>} : memref<72x1024xbf16, #tpu.memory_space<vmem>>, vector<8x1024xbf16>,
    %c0_90 = arith.constant 0 : index
    %c96_91 = arith.constant 96 : index
    %94 = vector.load %arg11[%c0_90, %c96_91] : memref<8x1280xbf16, #tpu.memory_space<vmem>>, vector<8x1024xbf16>
    %c8 = arith.constant 8 : index
    %c0_92 = arith.constant 0 : index
    %95 = vector.load %arg12[%c8, %c0_92] : memref<72x1024xbf16, #tpu.memory_space<vmem>>, vector<8x1024xbf16>
    tpu.vector_store %arg12[%c8, %c0_92], %94 {strides = array<i32>} : memref<72x1024xbf16, #tpu.memory_space<vmem>>, vector<8x1024xbf16>,
    %c0_93 = arith.constant 0 : index
    %c97_94 = arith.constant 97 : index
    %96 = vector.load %arg11[%c0_93, %c97_94] : memref<8x1280xbf16, #tpu.memory_space<vmem>>, vector<8x1024xbf16>
    %97 = vector.broadcast %49 : vector<1x1024xbf16> to vector<8x1024xbf16>
    %98 = arith.mulf %96, %97 : vector<8x1024xbf16>
    %c16_95 = arith.constant 16 : index
    %c0_96 = arith.constant 0 : index
    %99 = vector.load %arg12[%c16_95, %c0_96] : memref<72x1024xbf16, #tpu.memory_space<vmem>>, vector<8x1024xbf16>
    tpu.vector_store %arg12[%c16_95, %c0_96], %98 {strides = array<i32>} : memref<72x1024xbf16, #tpu.memory_space<vmem>>, vector<8x1024xbf16>,
    %c0_97 = arith.constant 0 : index
    %c127_98 = arith.constant 127 : index
    %100 = vector.load %arg11[%c0_97, %c127_98] : memref<8x1280xbf16, #tpu.memory_space<vmem>>, vector<8x1024xbf16>
    %101 = vector.broadcast %48 : vector<1x1024xbf16> to vector<8x1024xbf16>
    %102 = arith.mulf %100, %101 : vector<8x1024xbf16>
    %c24 = arith.constant 24 : index
    %c0_99 = arith.constant 0 : index
    %103 = vector.load %arg12[%c24, %c0_99] : memref<72x1024xbf16, #tpu.memory_space<vmem>>, vector<8x1024xbf16>
    tpu.vector_store %arg12[%c24, %c0_99], %102 {strides = array<i32>} : memref<72x1024xbf16, #tpu.memory_space<vmem>>, vector<8x1024xbf16>,
    %c0_100 = arith.constant 0 : index
    %c128_101 = arith.constant 128 : index
    %104 = vector.load %arg11[%c0_100, %c128_101] : memref<8x1280xbf16, #tpu.memory_space<vmem>>, vector<8x1024xbf16>
    %c32_102 = arith.constant 32 : index
    %c0_103 = arith.constant 0 : index
    %105 = vector.load %arg12[%c32_102, %c0_103] : memref<72x1024xbf16, #tpu.memory_space<vmem>>, vector<8x1024xbf16>
    tpu.vector_store %arg12[%c32_102, %c0_103], %104 {strides = array<i32>} : memref<72x1024xbf16, #tpu.memory_space<vmem>>, vector<8x1024xbf16>,
    %c0_104 = arith.constant 0 : index
    %c129_105 = arith.constant 129 : index
    %106 = vector.load %arg11[%c0_104, %c129_105] : memref<8x1280xbf16, #tpu.memory_space<vmem>>, vector<8x1024xbf16>
    %107 = vector.broadcast %49 : vector<1x1024xbf16> to vector<8x1024xbf16>
    %108 = arith.mulf %106, %107 : vector<8x1024xbf16>
    %c40 = arith.constant 40 : index
    %c0_106 = arith.constant 0 : index
    %109 = vector.load %arg12[%c40, %c0_106] : memref<72x1024xbf16, #tpu.memory_space<vmem>>, vector<8x1024xbf16>
    tpu.vector_store %arg12[%c40, %c0_106], %108 {strides = array<i32>} : memref<72x1024xbf16, #tpu.memory_space<vmem>>, vector<8x1024xbf16>,
    %c0_107 = arith.constant 0 : index
    %c159_108 = arith.constant 159 : index
    %110 = vector.load %arg11[%c0_107, %c159_108] : memref<8x1280xbf16, #tpu.memory_space<vmem>>, vector<8x1024xbf16>
    %111 = vector.broadcast %48 : vector<1x1024xbf16> to vector<8x1024xbf16>
    %112 = arith.mulf %110, %111 : vector<8x1024xbf16>
    %c48_109 = arith.constant 48 : index
    %c0_110 = arith.constant 0 : index
    %113 = vector.load %arg12[%c48_109, %c0_110] : memref<72x1024xbf16, #tpu.memory_space<vmem>>, vector<8x1024xbf16>
    tpu.vector_store %arg12[%c48_109, %c0_110], %112 {strides = array<i32>} : memref<72x1024xbf16, #tpu.memory_space<vmem>>, vector<8x1024xbf16>,
    %c0_111 = arith.constant 0 : index
    %c160_112 = arith.constant 160 : index
    %114 = vector.load %arg11[%c0_111, %c160_112] : memref<8x1280xbf16, #tpu.memory_space<vmem>>, vector<8x1024xbf16>
    %c56 = arith.constant 56 : index
    %c0_113 = arith.constant 0 : index
    %115 = vector.load %arg12[%c56, %c0_113] : memref<72x1024xbf16, #tpu.memory_space<vmem>>, vector<8x1024xbf16>
    tpu.vector_store %arg12[%c56, %c0_113], %114 {strides = array<i32>} : memref<72x1024xbf16, #tpu.memory_space<vmem>>, vector<8x1024xbf16>,
    %c0_114 = arith.constant 0 : index
    %c161_115 = arith.constant 161 : index
    %116 = vector.load %arg11[%c0_114, %c161_115] : memref<8x1280xbf16, #tpu.memory_space<vmem>>, vector<8x1024xbf16>
    %117 = vector.broadcast %49 : vector<1x1024xbf16> to vector<8x1024xbf16>
    %118 = arith.mulf %116, %117 : vector<8x1024xbf16>
    %c64_116 = arith.constant 64 : index
    %c0_117 = arith.constant 0 : index
    %119 = vector.load %arg12[%c64_116, %c0_117] : memref<72x1024xbf16, #tpu.memory_space<vmem>>, vector<8x1024xbf16>
    tpu.vector_store %arg12[%c64_116, %c0_117], %118 {strides = array<i32>} : memref<72x1024xbf16, #tpu.memory_space<vmem>>, vector<8x1024xbf16>,
    %c0_118 = arith.constant 0 : index
    %c0_119 = arith.constant 0 : index
    %120 = vector.load %arg5[%c0_118, %c0_119] : memref<8x72xbf16, #tpu.memory_space<vmem>>, vector<8x72xbf16>
    %c0_120 = arith.constant 0 : index
    %c0_121 = arith.constant 0 : index
    %121 = vector.load %arg12[%c0_120, %c0_121] : memref<72x1024xbf16, #tpu.memory_space<vmem>>, vector<72x1024xbf16>
    %cst_122 = arith.constant dense<0.000000e+00> : vector<8x1024xf32>
    %122 = tpu.matmul %120, %121, %cst_122 {dimension_numbers = #tpu.dot_dimension_numbers<[1], [0], [0], [1], [0, 0, 1, 1], [], []>} : vector<8x72xbf16>, vector<72x1024xbf16>, vector<8x1024xf32> -> vector<8x1024xf32>
    %c0_123 = arith.constant 0 : index
    %c0_124 = arith.constant 0 : index
    %123 = vector.load %arg6[%c0_123, %c0_124] : memref<8x1xf32, #tpu.memory_space<vmem>>, vector<8x1xf32>
    %124 = vector.broadcast %123 : vector<8x1xf32> to vector<8x1024xf32>
    %125 = arith.addf %122, %124 : vector<8x1024xf32>
    %cst_125 = arith.constant 0.000000e+00 : f32
    %126 = vector.broadcast %cst_125 : f32 to vector<8x1024xf32>
    %127 = arith.maximumf %125, %126 : vector<8x1024xf32>
    %c0_126 = arith.constant 0 : index
    %c0_127 = arith.constant 0 : index
    %128 = vector.load %arg8[%c0_126, %c0_127] : memref<8x1024xf32, #tpu.memory_space<vmem>>, vector<8x1024xf32>
    tpu.vector_store %arg8[%c0_126, %c0_127], %127 {strides = array<i32>} : memref<8x1024xf32, #tpu.memory_space<vmem>>, vector<8x1024xf32>,
    return
  }
  func.func @transform_0(%arg0: i32) -> (i32, i32) {
    %c0_i32 = arith.constant 0 : i32
    %c0_i32_0 = arith.constant 0 : i32
    %c0_i32_1 = arith.constant 0 : i32
    return %c0_i32, %c0_i32_0 : i32, i32
  }
  func.func @transform_1(%arg0: i32) -> (i32, i32) {
    %c0_i32 = arith.constant 0 : i32
    %c0_i32_0 = arith.constant 0 : i32
    %c0_i32_1 = arith.constant 0 : i32
    return %c0_i32, %c0_i32_0 : i32, i32
  }
  func.func @transform_2(%arg0: i32) -> (i32, i32) {
    %c0_i32 = arith.constant 0 : i32
    %c0_i32_0 = arith.constant 0 : i32
    %c0_i32_1 = arith.constant 0 : i32
    return %c0_i32, %c0_i32_0 : i32, i32
  }
  func.func @transform_3(%arg0: i32) -> (i32, i32) {
    %c0_i32 = arith.constant 0 : i32
    %c0_i32_0 = arith.constant 0 : i32
    %c0_i32_1 = arith.constant 0 : i32
    return %c0_i32, %c0_i32_0 : i32, i32
  }
  func.func @transform_4(%arg0: i32) -> (i32, i32) {
    %c0_i32 = arith.constant 0 : i32
    %c0_i32_0 = arith.constant 0 : i32
    %c0_i32_1 = arith.constant 0 : i32
    return %c0_i32, %c0_i32_0 : i32, i32
  }
  func.func @transform_5(%arg0: i32) -> (i32, i32) {
    %c0_i32 = arith.constant 0 : i32
    %c0_i32_0 = arith.constant 0 : i32
    %c0_i32_1 = arith.constant 0 : i32
    return %c0_i32, %c0_i32_0 : i32, i32
  }
  func.func @transform_6(%arg0: i32) -> (i32, i32) {
    %c0_i32 = arith.constant 0 : i32
    %c0_i32_0 = arith.constant 0 : i32
    %c0_i32_1 = arith.constant 0 : i32
    return %c0_i32, %c0_i32_0 : i32, i32
  }
  func.func @transform_7(%arg0: i32) -> (i32, i32) {
    %c0_i32 = arith.constant 0 : i32
    %c0_i32_0 = arith.constant 0 : i32
    %c0_i32_1 = arith.constant 0 : i32
    return %c0_i32, %c0_i32_0 : i32, i32
  }
}

</mosaic_0001>

<bundles_post_ra>
// kernel: tpu_custom_call.1
= control target key start
LH: loop header
LB: loop body
LE: loop exit
PB: predicated region body
PF: predicated region fallthrough
CT: control target
= control target key end

     0   :  { %12 = vsyncpa [#allocation7], 0  ;;  %s6385_s0 = inlined_call_operand.hbm [shape: f32[16,384], index: 0, kind: input, shape index: {}]   ;;  %s6386_s1 = inlined_call_operand.hbm [shape: f32[512,128], index: 1, kind: input, shape index: {}]   ;;  %s6387_s2 = inlined_call_operand.vmem [shape: bf16[8,144], index: 2, kind: input, shape index: {}]   ;;  %s6388_s3 = inlined_call_operand.vmem [shape: f32[8,1], index: 3, kind: input, shape index: {}]   ;;  %s6389_s4 = inlined_call_operand.hbm [shape: bf16[8,72], index: 4, kind: input, shape index: {}]   ;;  %s6390_s5 = inlined_call_operand.vmem [shape: f32[8,1], index: 5, kind: input, shape index: {}]   ;;  %s6391_s6 = inlined_call_operand.vmem [shape: bf16[2,1024], index: 6, kind: input, shape index: {}]   ;;  %s6392_s7 = inlined_call_operand.hbm [shape: f32[8,1024], index: 7, kind: output, shape index: {}]  }
   0x1   :  { %13 = vsyncpa [#allocation10], 0  ;;  %s32_s26 = sshll.u32 %s6386_s1, 4  ;;  %s33_s26 = int_to_ptr.hbm [resolvable:$true] %s32_s26 }
   0x2   :  { %14 = vsyncpa [#allocation8], 0  ;;  %s4498_s27 = smov [#allocation9]   ;;  %s19_s8 = sshll.u32 %s6385_s0, 4  ;;  %s20_s8 = int_to_ptr.hbm [resolvable:$true] %s19_s8 }
   0x3   :  { %s34_s28 = sshll.u32 %s4498_s27, 4  ;;  %s4499_s9 = smov 128   ;;  %s35_s28 = int_to_ptr.vmem [resolvable:$true] %s34_s28 }
   0x4   :  { %s4500_s10 = smov 8   ;;  %s4501_s11 = smov [#allocation6]  }
   0x5   :  { %40 = dma.hbm_to_vmem [thread:$0]  %s33_s26, 8192, %s35_s28, [#allocation10], %s4499_s9, %s4499_s9, %s4500_s10  }
   0x6   :  { %s21_s12 = sshll.u32 %s4501_s11, 4  ;;  %s4502_s13 = smov 384   ;;  %s22_s12 = int_to_ptr.vmem [resolvable:$true] %s21_s12 }
   0x7   :  { %s4503_s14 = smov 24   ;;  %s50_s16 = sshll.u32 %s6389_s4, 4  ;;  %s51_s16 = int_to_ptr.hbm [resolvable:$true] %s50_s16 }
   0x8   :  { %27 = dma.hbm_to_vmem [thread:$0]  %s20_s8, 768, %s22_s12, [#allocation7], %s4502_s13, %s4502_s13, %s4503_s14  }
   0x9   :  { %s4504_s17 = smov [#allocation11]  }
   0xa   :  { %s52_s18 = sshll.u32 %s4504_s17, 4  ;;  %s53_s18 = int_to_ptr.vmem [resolvable:$true] %s52_s18 }
   0xb   :  { %55 = dma.hbm_to_vmem [thread:$0]  %s51_s16, 64, %s53_s18, [#allocation10]  }
   0xc   :  { %4492 = dma.done.wait [#allocation7], 768  }
   0xd   :  { %4493 = vsyncadd [#allocation7], 4294966528 }
   0xe   :  { %4494 = dma.done.wait [#allocation10], 8256  }
   0xf   :  { %4495 = vsyncadd [#allocation10], 4294959040  ;;  %v170_v0 = vld [vmem:[#allocation6] sm:$0xff]  ;;  %s4505_s0 = smov 80   ;;  %s4506_s19 = smov 112   ;;  %v171_v1 = vld [vmem:[#allocation6 + $0x18] sm:$0xff] }
  0x10   :  { %182 = vrot.lane.b32.xlu1 %v170_v0, %s4505_s0  ;;  %135 = vrot.lane.b32.xlu0 %v170_v0, %s4506_s19  ;;  %s4507_s20 = smov 48   ;;  %v4571_v2 = vld [vmem:[#allocation6 + $0x8] sm:$0xff]  ;;  %v4577_v4 = vld [vmem:[#allocation6 + $0x20] sm:$0xff]  ;;  %v86_v6 = vld [vmem:[#allocation9 + $0x28] sm:$0xff]  ;;  %s4508_s4 = smov 16   ;;  %vm89_vm0 = vcmask 523264  }
  0x11   :  { %233 = vrot.lane.b32.xlu2 %v170_v0, %s4507_s20  ;;  %v88_v3 = vld [vmem:[#allocation9 + $0x38] sm:$0xff]  ;;  %v87_v5 = vld [vmem:[#allocation9 + $0x30] sm:$0xff]  ;;  %v85_v7 = vld [vmem:[#allocation9 + $0x20] sm:$0xff]  ;;  %s4510_s23 = smov 97   ;;  %s4511_s24 = smov 31   ;;  %vm241_vm1 = vcmask 392192  }
  0x12   :  { %104 = vmatpush.msra.mxu0 %v88_v3  ;;  %v84_v8 = vld [vmem:[#allocation9 + $0x18] sm:$0xff]  ;;  %v4585_v9 = vld [vmem:[%s6391_s6] sm:$0xff]  ;;  %v82_v11 = vld [vmem:[#allocation9 + $0x8] sm:$0xff]  ;;  %s4509_s6 = smov 95   ;;  %s4512_s25 = smov 1   ;;  %vm299_vm2 = vcmask 130048  }
  0x13   :  { %496 = vst [vmem:[#allocation1] ss:$9 sm:$0xff] %v4585_v9  ;;  %v83_v10 = vld [vmem:[#allocation9 + $0x10] sm:$0xff]  ;;  %v81_v12 = vld [vmem:[#allocation9] sm:$0xff]  ;;  %v132_v21 = vld [vmem:[#allocation9 + $0x78] sm:$0xff]  ;;  %s4513_s26 = smov 127  }
  0x14   :  { %105 = vmatpush.msra.mxu0 %v87_v5  ;;  %v179_v22 = vld [vmem:[#allocation9 + $0xb8] sm:$0xff]  ;;  %151 = vmatpush.msra.mxu1 %v132_v21  ;;  %v131_v26 = vld [vmem:[#allocation9 + $0x70] sm:$0xff]  ;;  %v130_v29 = vld [vmem:[#allocation9 + $0x68] sm:$0xff]  ;;  %s4514_s27 = smov 33   ;;  %vm579_vm3 = vcmask 777216   ;;  %s4516_s28 = smov 32  }
  0x15   :  { %v228_v23 = vld [vmem:[#allocation9 + $0xf8] sm:$0xff]  ;;  %v178_v27 = vld [vmem:[#allocation9 + $0xb0] sm:$0xff]  ;;  %198 = vmatpush.msra.mxu2 %v179_v22  ;;  %v177_v30 = vld [vmem:[#allocation9 + $0xa8] sm:$0xff]  ;;  %vm882_vm4 = vcmask 793600   ;;  %vm1044_vm5 = vcmask 1039360   ;;  %vm1130_vm6 = vcmask 7168  }
  0x16   :  { %106 = vmatpush.msra.mxu0 %v86_v6  ;;  %256 = vmatpush.msra.mxu3 %v228_v23  ;;  %v227_v28 = vld [vmem:[#allocation9 + $0xf0] sm:$0xff]  ;;  %v226_v31 = vld [vmem:[#allocation9 + $0xe8] sm:$0xff]  ;;  %v428_v34 = vld [vmem:[#allocation6 + $0x10] sm:$0xff]  ;;  %s4517_s29 = smov 96   ;;  %vm666_vm7 = vcmask 269312   ;;  %vm968_vm8 = vcmask 252928  }
  0x17   :  { %152 = vmatpush.msra.mxu1 %v131_v26  ;;  %199 = vmatpush.msra.mxu2 %v178_v27  ;;  %v430_v51 = vld [vmem:[#allocation6 + $0x28] sm:$0xff]  ;;  %v225_v6 = vld [vmem:[#allocation9 + $0xe0] sm:$0xff]  ;;  %v223_v27 = vld [vmem:[#allocation9 + $0xd0] sm:$0xff]  ;;  %vm664_vm9 = vcmask 1043456   ;;  %vm749_vm10 = vcmask 261120   ;;  %vm1553_vm11 = vcmask 785408  }
  0x18   :  { %184 = vrot.lane.b32.xlu1 %v171_v1, %s4505_s0  ;;  %137 = vrot.lane.b32.xlu0 %v171_v1, %s4506_s19  ;;  %v224_v23 = vld [vmem:[#allocation9 + $0xd8] sm:$0xff]  ;;  %vm3414_vm12 = vcmask 588800   ;;  %s3570_s14 = sshll.u32 %s6392_s7, 4  ;;  %s3571_s14 = int_to_ptr.hbm [resolvable:$true] %s3570_s14 }
  0x19   :  { %235 = vrot.lane.b32.xlu2 %v4571_v2, %s4507_s20  ;;  %107 = vmatpush.msra.mxu0 %v85_v7 }
  0x1a   :  { %v497_v13 = vld [vmem:[#allocation1] sm:$0xff]  ;;  %v498_v14 = vld [vmem:[#allocation1 + $0x9] sm:$0xff]  ;;  %v499_v17 = vld [vmem:[#allocation1 + $0x12] sm:$0xff]  ;;  %257 = vmatpush.msra.mxu3 %v227_v28  ;;  %153 = vmatpush.msra.mxu1 %v130_v29 }
  0x1b   :  { %108 = vmatpush.msra.mxu0 %v84_v8  ;;  %v501_v15 = vld [vmem:[#allocation1 + $0x24] sm:$0xff]  ;;  %v502_v16 = vld [vmem:[#allocation1 + $0x2d] sm:$0xff]  ;;  %v500_v18 = vld [vmem:[#allocation1 + $0x1b] sm:$0xff]  ;;  %v505_v24 = vpack.i.b16 %v497_v13, %v497_v13  ;;  %v508_v25 = vpack.i.b16 %v498_v14, %v498_v14  ;;  %200 = vmatpush.msra.mxu2 %v177_v30  ;;  %v511_v37 = vpack.i.b16 %v499_v17, %v499_v17 }
  0x1c   :  { %v503_v19 = vld [vmem:[#allocation1 + $0x36] sm:$0xff]  ;;  %v504_v20 = vld [vmem:[#allocation1 + $0x3f] sm:$0xff]  ;;  %v517_v35 = vpack.i.b16 %v501_v15, %v501_v15  ;;  %v520_v36 = vpack.i.b16 %v502_v16, %v502_v16  ;;  %258 = vmatpush.msra.mxu3 %v226_v31  ;;  %v514_v38 = vpack.i.b16 %v500_v18, %v500_v18  ;;  %v128_v18 = vld [vmem:[#allocation9 + $0x58] sm:$0xff] }
  0x1d   :  { %109 = vmatpush.msra.mxu0 %v83_v10  ;;  %791 = vst [vmem:[#allocation1] ss:$9 sm:$0xff] %v4585_v9  ;;  %v507_v32 = vperm.slane %v505_v24, 0  ;;  %v510_v33 = vperm.slane %v508_v25, 0  ;;  %v523_v41 = vpack.i.b16 %v503_v19, %v503_v19  ;;  %v526_v42 = vpack.i.b16 %v504_v20, %v504_v20  ;;  %v176_v13 = vld [vmem:[#allocation9 + $0xa0] sm:$0xff]  ;;  %v175_v19 = vld [vmem:[#allocation9 + $0x98] sm:$0xff] }
  0x1e   :  { %v519_v45 = vperm.slane %v517_v35, 0  ;;  %v522_v46 = vperm.slane %v520_v36, 0  ;;  %v513_v47 = vperm.slane %v511_v37, 0  ;;  %v516_v48 = vperm.slane %v514_v38, 0  ;;  %259 = vmatpush.msra.mxu3 %v225_v6  ;;  %v129_v14 = vld [vmem:[#allocation9 + $0x60] sm:$0xff]  ;;  %201 = vmatpush.msra.mxu2 %v176_v13  ;;  %v127_v24 = vld [vmem:[#allocation9 + $0x50] sm:$0xff] }
  0x1f   :  { %110 = vmatpush.msra.mxu0 %v82_v11  ;;  %v547_v39 = vunpack.c.l.bf16 %v507_v32  ;;  %v548_v40 = vunpack.c.l.bf16 %v510_v33  ;;  %v525_v53 = vperm.slane %v523_v41, 0  ;;  %v528_v54 = vperm.slane %v526_v42, 0  ;;  %154 = vmatpush.msra.mxu1 %v129_v14  ;;  %v174_v25 = vld [vmem:[#allocation9 + $0x90] sm:$0xff]  ;;  %v126_v31 = vld [vmem:[#allocation9 + $0x48] sm:$0xff]  ;;  %v389_v6 = vld [vmem:[#allocation9 + $0x1b8] sm:$0xff] }
  0x20   :  { %239 = vrot.lane.b32.xlu1 %v4577_v4, %s4507_s20  ;;  %237 = vrot.lane.b32.xlu0 %v171_v1, %s4507_s20  ;;  %v551_v55 = vunpack.c.l.bf16 %v519_v45  ;;  %v552_v56 = vunpack.c.l.bf16 %v522_v46  ;;  %v549_v57 = vunpack.c.l.bf16 %v513_v47  ;;  %v550_v58 = vunpack.c.l.bf16 %v516_v48  ;;  %v173_v32 = vld [vmem:[#allocation9 + $0x88] sm:$0xff]  ;;  %v172_v46 = vld [vmem:[#allocation9 + $0x80] sm:$0xff]  ;;  %v342_v14 = vld [vmem:[#allocation9 + $0x178] sm:$0xff] }
  0x21   :  { %291 = vrot.lane.b32.xlu2 %v170_v0, %s4508_s4  ;;  %111 = vmatpush.msra.mxu0 %v81_v12  ;;  %v4604_v52 = vpack.i.bf16 %v548_v40, %v547_v39  ;;  %v553_v61 = vunpack.c.l.bf16 %v525_v53  ;;  %v554_v62 = vunpack.c.l.bf16 %v528_v54  ;;  %v221_v39 = vld [vmem:[#allocation9 + $0xc0] sm:$0xff] }
  0x22   :  { %3581 = vmatmul.msk.f32.vlgmr.msra.gmra.mxu0 %vm89_vm0, %v170_v0  ;;  %v4611_v63 = vpack.i.bf16 %v552_v56, %v551_v55  ;;  %v4613_v0 = vpack.i.bf16 %v550_v58, %v549_v57  ;;  %155 = vmatpush.msra.mxu1 %v128_v18  ;;  %v341_v18 = vld [vmem:[#allocation9 + $0x170] sm:$0xff] }
  0x23   :  { %v4615_v3 = vpack.i.bf16 %v554_v62, %v553_v61  ;;  %202 = vmatpush.msra.mxu2 %v175_v19  ;;  %260 = vmatpush.msra.mxu3 %v224_v23  ;;  %v385_v19 = vld [vmem:[#allocation9 + $0x198] sm:$0xff]  ;;  %v339_v23 = vld [vmem:[#allocation9 + $0x160] sm:$0xff] }
  0x24   :  { %v796_v43 = vld [vmem:[#allocation1 + $0x24] sm:$0xff]  ;;  %v797_v44 = vld [vmem:[#allocation1 + $0x2d] sm:$0xff]  ;;  %v795_v16 = vld [vmem:[#allocation1 + $0x1b] sm:$0xff]  ;;  %156 = vmatpush.msra.mxu1 %v127_v24 }
  0x25   :  { %v816_v49 = vshrl.u32 %v796_v43, 16  ;;  %v820_v50 = vshrl.u32 %v797_v44, 16  ;;  %v792_v7 = vld [vmem:[#allocation1] sm:$0xff]  ;;  %v793_v8 = vld [vmem:[#allocation1 + $0x9] sm:$0xff]  ;;  %v794_v15 = vld [vmem:[#allocation1 + $0x12] sm:$0xff]  ;;  %v812_v22 = vshrl.u32 %v795_v16, 16  ;;  %203 = vmatpush.msra.mxu2 %v174_v25  ;;  %261 = vmatpush.msra.mxu3 %v223_v27 }
  0x26   :  { %v800_v11 = vshrl.u32 %v792_v7, 16  ;;  %v804_v12 = vshrl.u32 %v793_v8, 16  ;;  %v808_v17 = vshrl.u32 %v794_v15, 16  ;;  %157 = vmatpush.msra.mxu1 %v126_v31  ;;  %v798_v40 = vld [vmem:[#allocation1 + $0x36] sm:$0xff]  ;;  %v799_v41 = vld [vmem:[#allocation1 + $0x3f] sm:$0xff] }
  0x27   :  { %v817_v59 = vpack.i.b16 %v816_v49, %v816_v49  ;;  %v821_v60 = vpack.i.b16 %v820_v50, %v820_v50  ;;  %v813_v30 = vpack.i.b16 %v812_v22, %v812_v22  ;;  %204 = vmatpush.msra.mxu2 %v173_v32  ;;  %v824_v44 = vshrl.u32 %v798_v40, 16  ;;  %2424 = vst [vmem:[#allocation1] ss:$9 sm:$0xff] %v4585_v9  ;;  %v285_v7 = vld [vmem:[#allocation9 + $0x130] sm:$0xff]  ;;  %v284_v8 = vld [vmem:[#allocation9 + $0x128] sm:$0xff]  ;;  %v386_v15 = vld [vmem:[#allocation9 + $0x1a0] sm:$0xff] }
  0x28   :  { %295 = vrot.lane.b32.xlu1 %v171_v1, %s4508_s4  ;;  %293 = vrot.lane.b32.xlu0 %v4571_v2, %s4508_s4  ;;  %v801_v20 = vpack.i.b16 %v800_v11, %v800_v11  ;;  %v805_v21 = vpack.i.b16 %v804_v12, %v804_v12  ;;  %v809_v26 = vpack.i.b16 %v808_v17, %v808_v17  ;;  %v828_v45 = vshrl.u32 %v799_v41, 16  ;;  %v387_v11 = vld [vmem:[#allocation9 + $0x1a8] sm:$0xff]  ;;  %v283_v12 = vld [vmem:[#allocation9 + $0x120] sm:$0xff]  ;;  %v282_v17 = vld [vmem:[#allocation9 + $0x118] sm:$0xff] }
  0x29   :  { %297 = vrot.lane.b32.xlu2 %v4577_v4, %s4508_s4  ;;  %v815_v37 = vperm.slane %v813_v30, 0  ;;  %205 = vmatpush.msra.mxu2 %v172_v46  ;;  %v825_v48 = vpack.i.b16 %v824_v44, %v824_v44  ;;  %v383_v22 = vld [vmem:[#allocation9 + $0x188] sm:$0xff]  ;;  %v279_v24 = vld [vmem:[#allocation9 + $0x100] sm:$0xff]  ;;  %v437_v30 = vld [vmem:[#allocation9 + $0x1f0] sm:$0xff] }
  0x2a   :  { %3582 = vmatmul.msk.f32.gmra.mxu0 %vm89_vm0, %v171_v1  ;;  %v819_v1 = vperm.slane %v817_v59, 0  ;;  %v803_v28 = vperm.slane %v801_v20, 0  ;;  %v807_v29 = vperm.slane %v805_v21, 0  ;;  %v811_v33 = vperm.slane %v809_v26, 0  ;;  %v340_v20 = vld [vmem:[#allocation9 + $0x168] sm:$0xff]  ;;  %v384_v21 = vld [vmem:[#allocation9 + $0x190] sm:$0xff] }
  0x2b   :  { %v853_v43 = vunpack.c.l.bf16 %v815_v37  ;;  %v829_v49 = vpack.i.b16 %v828_v45, %v828_v45  ;;  %v827_v50 = vperm.slane %v825_v48, 0  ;;  %408 = vmatpush.msrb.mxu2 %v389_v6  ;;  %v338_v26 = vld [vmem:[#allocation9 + $0x158] sm:$0xff]  ;;  %v382_v27 = vld [vmem:[#allocation9 + $0x180] sm:$0xff]  ;;  %v336_v31 = vld [vmem:[#allocation9 + $0x148] sm:$0xff] }
  0x2c   :  { %v850_v35 = vunpack.c.l.bf16 %v803_v28  ;;  %v851_v36 = vunpack.c.l.bf16 %v807_v29  ;;  %v852_v38 = vunpack.c.l.bf16 %v811_v33  ;;  %v438_v28 = vld [vmem:[#allocation9 + $0x1f8] sm:$0xff]  ;;  %v337_v29 = vld [vmem:[#allocation9 + $0x150] sm:$0xff]  ;;  %v436_v32 = vld [vmem:[#allocation9 + $0x1e8] sm:$0xff] }
  0x2d   :  { %v856_v53 = vunpack.c.l.bf16 %v827_v50  ;;  %v335_v33 = vld [vmem:[#allocation9 + $0x140] sm:$0xff]  ;;  %v432_v40 = vld [vmem:[#allocation9 + $0x1c8] sm:$0xff] }
  0x2e   :  { %v4627_v42 = vpack.i.bf16 %v851_v36, %v850_v35  ;;  %v4632_v47 = vpack.i.bf16 %v853_v43, %v852_v38  ;;  %v4638_v55 = vld [vmem:[#allocation1] sm:$0xff]  ;;  %v4640_v56 = vld [vmem:[#allocation1 + $0x9] sm:$0xff]  ;;  %v4642_v57 = vld [vmem:[#allocation1 + $0x12] sm:$0xff] }
  0x2f   :  { %6405 = vst [vmem:[#allocation16_spill] sm:$0xff] %v4642_v57  ;;  %v4646_v59 = vld [vmem:[#allocation1 + $0x1b] sm:$0xff]  ;;  %v4650_v61 = vld [vmem:[#allocation1 + $0x2d] sm:$0xff] }
  0x30   :  { %347 = vrot.lane.b32.xlu1 %v4577_v4, %s4506_s19  ;;  %345 = vrot.lane.b32.xlu0 %v4571_v2, %s4506_s19  ;;  %6406 = vst [vmem:[#allocation17_spill] sm:$0xff] %v4646_v59  ;;  %v4652_v62 = vld [vmem:[#allocation1 + $0x36] sm:$0xff]  ;;  %v434_v38 = vld [vmem:[#allocation9 + $0x1d8] sm:$0xff] }
  0x31   :  { %392 = vrot.lane.b32.xlu2 %v4571_v2, %s4505_s0  ;;  %v435_v36 = vld [vmem:[#allocation9 + $0x1e0] sm:$0xff] }
  0x32   :  { %v431_v44 = vld [vmem:[#allocation9 + $0x1c0] sm:$0xff] }
  0x38   :  { %443 = vrot.lane.b32.xlu1 %v4571_v2, %s4507_s20  ;;  %394 = vrot.lane.b32.xlu0 %v4577_v4, %s4505_s0  ;;  %v823_v2 = vperm.slane %v821_v60, 0  ;;  %v4648_v60 = vld [vmem:[#allocation1 + $0x24] sm:$0xff] }
  0x39   :  { %445 = vrot.lane.b32.xlu2 %v428_v34, %s4507_s20  ;;  %v222_v34 = vld [vmem:[#allocation9 + $0xc8] sm:$0xff] }
  0x3a   :  { %v855_v5 = vunpack.c.l.bf16 %v823_v2  ;;  %262 = vmatpush.msra.mxu3 %v222_v34  ;;  %v125_v2 = vld [vmem:[#allocation9 + $0x40] sm:$0xff] }
  0x3b   :  { %158 = vmatpush.msra.mxu1 %v125_v2 }
  0x3c   :  { %263 = vmatpush.msra.mxu3 %v221_v39  ;;  %v433_v39 = vld [vmem:[#allocation9 + $0x1d0] sm:$0xff] }
  0x3d   :  { %361 = vmatpush.msrb.mxu1 %v342_v14 }
  0x3e   :  { %465 = vmatpush.msrb.mxu3 %v438_v28 }
  0x3f   :  { %362 = vmatpush.msrb.mxu1 %v341_v18 }
  0x40   :  { %449 = vrot.lane.b32.xlu1 %v430_v51, %s4507_s20  ;;  %447 = vrot.lane.b32.xlu0 %v4577_v4, %s4507_s20  ;;  %v854_v4 = vunpack.c.l.bf16 %v819_v1  ;;  %v831_v51 = vperm.slane %v829_v49, 0  ;;  %v4654_v1 = vld [vmem:[#allocation1 + $0x3f] sm:$0xff] }
  0x41   :  { %4155 = vrot.lane.b32.xlu2 %v4604_v52, %s4509_s6  ;;  %6407 = vst [vmem:[#allocation18_spill] sm:$0xff] %v4654_v1  ;;  %363 = vmatpush.msrb.mxu1 %v340_v20 }
  0x42   :  { %v4623_v10 = vpack.i.bf16 %v855_v5, %v854_v4  ;;  %v857_v54 = vunpack.c.l.bf16 %v831_v51  ;;  %2610 = vst [vmem:[#allocation1] ss:$9 sm:$0xff] %v4585_v9  ;;  %v286_v5 = vld [vmem:[#allocation9 + $0x138] sm:$0xff]  ;;  %v388_v9 = vld [vmem:[#allocation9 + $0x1b0] sm:$0xff]  ;;  %466 = vmatpush.msrb.mxu3 %v437_v30 }
  0x43   :  { %314 = vmatpush.msrb.mxu0 %v286_v5  ;;  %409 = vmatpush.msrb.mxu2 %v388_v9 }
  0x44   :  { %v4644_v58 = vpack.i.bf16 %v857_v54, %v856_v53  ;;  %364 = vmatpush.msrb.mxu1 %v339_v23  ;;  %467 = vmatpush.msrb.mxu3 %v436_v32  ;;  %v4515_v53 = vmov 0  }
  0x45   :  { %315 = vmatpush.msrb.mxu0 %v285_v7  ;;  %410 = vmatpush.msrb.mxu2 %v387_v11  ;;  %74 = vst [vmem:[#allocation2 + $0x28] sm:$0xf] %v4515_v53 }
  0x46   :  { %365 = vmatpush.msrb.mxu1 %v338_v26  ;;  %468 = vmatpush.msrb.mxu3 %v435_v36  ;;  %73 = vst [vmem:[#allocation2] sm:$0xf] %v4515_v53 }
  0x47   :  { %316 = vmatpush.msrb.mxu0 %v284_v8  ;;  %411 = vmatpush.msrb.mxu2 %v386_v15  ;;  %75 = vst [vmem:[#allocation2 + $0x24] sm:$0xf] %v4515_v53 }
  0x48   :  { %4165 = vrot.lane.b32.xlu1 %v4611_v63, %s4509_s6  ;;  %4160 = vrot.lane.b32.xlu0 %v4613_v0, %s4509_s6  ;;  %76 = vst [vmem:[#allocation2 + $0x4c] sm:$0xf] %v4515_v53 }
  0x49   :  { %4170 = vrot.lane.b32.xlu2 %v4615_v3, %s4509_s6  ;;  %317 = vmatpush.msrb.mxu0 %v283_v12  ;;  %77 = vst [vmem:[#allocation4] sm:$0xf] %v4515_v53 }
  0x4a   :  { %412 = vmatpush.msrb.mxu2 %v385_v19  ;;  %366 = vmatpush.msrb.mxu1 %v337_v29  ;;  %78 = vst [vmem:[#allocation4 + $0x24] sm:$0xf] %v4515_v53 }
  0x4b   :  { %318 = vmatpush.msrb.mxu0 %v282_v17  ;;  %469 = vmatpush.msrb.mxu3 %v434_v38 }
  0x4c   :  { %413 = vmatpush.msrb.mxu2 %v384_v21  ;;  %367 = vmatpush.msrb.mxu1 %v336_v31 }
  0x4d   :  { %470 = vmatpush.msrb.mxu3 %v433_v39  ;;  %4274 = vset.pattern.permute.xlu1 %v4515_v53 }
  0x4e   :  { %414 = vmatpush.msrb.mxu2 %v383_v22  ;;  %368 = vmatpush.msrb.mxu1 %v335_v33 }
  0x4f   :  { %471 = vmatpush.msrb.mxu3 %v432_v40  ;;  %4395 = vset.pattern.permute.xlu0 %v4515_v53 }
  0x50   :  { %4185 = vrot.lane.b32.xlu1 %v4623_v10, %s4510_s23  ;;  %4180 = vrot.lane.b32.xlu0 %v4632_v47, %s4510_s23 }
  0x51   :  { %4175 = vrot.lane.b32.xlu2 %v4627_v42, %s4510_s23  ;;  %415 = vmatpush.msrb.mxu2 %v382_v27 }
  0x52   :  { %472 = vmatpush.msrb.mxu3 %v431_v44 }
  0x58   :  { %4195 = vrot.lane.b32.xlu1 %v4604_v52, %s4511_s24  ;;  %4205 = vrot.lane.b32.xlu0 %v4627_v42, %s4512_s25 }
  0x59   :  { %4190 = vrot.lane.b32.xlu2 %v4644_v58, %s4510_s23 }
  0x60   :  { %4210 = vrot.lane.b32.xlu1 %v4632_v47, %s4512_s25  ;;  %4220 = vrot.lane.b32.xlu0 %v4613_v0, %s4513_s26 }
  0x61   :  { %4200 = vrot.lane.b32.xlu2 %v4613_v0, %s4511_s24  ;;  %v280_v0 = vld [vmem:[#allocation9 + $0x108] sm:$0xff] }
  0x68   :  { %4225 = vrot.lane.b32.xlu1 %v4611_v63, %s4511_s24  ;;  %4235 = vrot.lane.b32.xlu0 %v4632_v47, %s4514_s27 }
  0x69   :  { %4215 = vrot.lane.b32.xlu2 %v4604_v52, %s4513_s26  ;;  %v281_v52 = vld [vmem:[#allocation9 + $0x110] sm:$0xff] }
  0x6a   :  { %319 = vmatpush.msrb.mxu0 %v281_v52 }
  0x6b   :  { %v234_v4 = vpop.permute.xlu2 %233 }
  0x6c   :  { %320 = vmatpush.msrb.mxu0 %v280_v0 }
  0x6e   :  { %321 = vmatpush.msrb.mxu0 %v279_v24 }
  0x70   :  { %4250 = vrot.lane.b32.xlu0 %v4611_v63, %s4513_s26  ;;  %4240 = vrot.lane.b32.xlu1 %v4623_v10, %s4512_s25 }
  0x71   :  { %4230 = vrot.lane.b32.xlu2 %v4627_v42, %s4514_s27 }
  0x73   :  { %v236_v13 = vpop.permute.xlu2 %235 }
  0x74   :  { %v242_v16 = vsel %vm241_vm1, %v234_v4, %v236_v13 }
  0x75   :  { %3587 = vmatmul.msk.f32.vlgmr.msra.gmra.mxu3 %vm89_vm0, %v242_v16 }
  0x78   :  { %4260 = vrot.lane.b32.xlu0 %v4623_v10, %s4514_s27  ;;  %4255 = vrot.lane.b32.xlu1 %v4644_v58, %s4512_s25 }
  0x79   :  { %4245 = vrot.lane.b32.xlu2 %v4615_v3, %s4511_s24 }
  0x7b   :  { %v292_v25 = vpop.permute.xlu2 %291 }
  0x80   :  { %4270 = vrot.lane.b32.xlu0 %v4644_v58, %s4514_s27  ;;  %4265 = vrot.lane.b32.xlu1 %v4615_v3, %s4513_s26 }
  0x82   :  { %v183_v34 = vpop.permute.xlu1 %182  ;;  %v136_v35 = vpop.permute.xlu0 %135 }
  0x83   :  { %3583 = vmatmul.msk.f32.vlgmr.msra.gmra.mxu1 %vm89_vm0, %v136_v35  ;;  %3585 = vmatmul.msk.f32.vlgmr.msra.gmra.mxu2 %vm89_vm0, %v183_v34  ;;  %v298_v37 = vpop.permute.xlu2 %297 }
  0x8a   :  { %v185_v41 = vpop.permute.xlu1 %184  ;;  %v138_v43 = vpop.permute.xlu0 %137 }
  0x8b   :  { %3584 = vmatmul.msk.f32.gmra.mxu1 %vm89_vm0, %v138_v43  ;;  %3586 = vmatmul.msk.f32.gmra.mxu2 %vm89_vm0, %v185_v41  ;;  %v393_v45 = vpop.permute.xlu2 %392 }
  0x92   :  { %v240_v46 = vpop.permute.xlu1 %239  ;;  %v238_v47 = vpop.permute.xlu0 %237 }
  0x93   :  { %v243_v48 = vsel %vm241_vm1, %v238_v47, %v240_v46  ;;  %3593 = vmatmul.msk.f32.vlgmr.msrb.gmra.mxu2 %vm89_vm0, %v393_v45  ;;  %v446_v49 = vpop.permute.xlu2 %445 }
  0x94   :  { %3588 = vmatmul.msk.f32.gmra.mxu3 %vm89_vm0, %v243_v48 }
  0x9a   :  { %v296_v63 = vpop.permute.xlu1 %295  ;;  %v294_v42 = vpop.permute.xlu0 %293 }
  0x9b   :  { %v300_v50 = vsel %vm299_vm2, %v292_v25, %v294_v42  ;;  %v4696_v51 = vpop.permute.xlu2 %4155  ;;  %v301_v10 = vsel %vm299_vm2, %v296_v63, %v298_v37 }
  0x9c   :  { %3589 = vmatmul.msk.f32.vlgmr.msrb.gmra.mxu0 %vm89_vm0, %v300_v50  ;;  %v4158_v3 = vunpack.i.h.bf16 %v4696_v51  ;;  %v4157_v8 = vunpack.i.l.bf16 %v4696_v51 }
  0x9e   :  { %v580_v19 = vsel %vm579_vm3, %v4157_v8, %v4158_v3 }
  0x9f   :  { %v113_v5 = vpop.f32.mrf.mxu0 }
  0xa0   :  { %v119_v7 = vpack.c.bf16 %v113_v5, %v113_v5 }
  0xa2   :  { %v348_v54 = vpop.permute.xlu1 %347  ;;  %v346_v2 = vpop.permute.xlu0 %345  ;;  %121 = vst [vmem:[#allocation2 + $0x4] sm:$0xf] %v119_v7 }
  0xa3   :  { %3591 = vmatmul.msk.f32.vlgmr.msrb.gmra.mxu1 %vm89_vm0, %v346_v2  ;;  %v4705_v4 = vpop.permute.xlu2 %4170 }
  0xa4   :  { %3590 = vmatmul.msk.f32.gmra.mxu0 %vm89_vm0, %v301_v10 }
  0xa7   :  { %v116_v12 = vpop.f32.mrf.mxu0 }
  0xa8   :  { %v120_v15 = vpack.c.bf16 %v116_v12, %v116_v12 }
  0xa9   :  { %v485_v52 = vld [vmem:[#allocation2] sm:$0xff] }
  0xaa   :  { %v444_v6 = vpop.permute.xlu1 %443  ;;  %v395_v58 = vpop.permute.xlu0 %394  ;;  %122 = vst [vmem:[#allocation2 + $0x2c] sm:$0xf] %v120_v15  ;;  %v529_v20 = vunpack.c.l.bf16 %v485_v52  ;;  %v530_v21 = vunpack.c.h.bf16 %v485_v52  ;;  %718 = vrot.lane.b32.xlu1 %v485_v52, %s4516_s28 }
  0xab   :  { %v451_v9 = vsel %vm241_vm1, %v444_v6, %v446_v49  ;;  %3592 = vmatmul.msk.f32.gmra.mxu1 %vm89_vm0, %v348_v54  ;;  %3594 = vmatmul.msk.f32.gmra.mxu2 %vm89_vm0, %v395_v58  ;;  %v4713_v11 = vpop.permute.xlu2 %4175 }
  0xac   :  { %3595 = vmatmul.msk.f32.vlgmr.msrb.gmra.mxu3 %vm89_vm0, %v451_v9  ;;  %v4178_v17 = vunpack.i.h.bf16 %v4713_v11  ;;  %v4177_v18 = vunpack.i.l.bf16 %v4713_v11  ;;  %v596_v0 = vmul.f32 %v4157_v8, %v529_v20  ;;  %v597_v22 = vmul.f32 %v580_v19, %v530_v21 }
  0xae   :  { %v883_v23 = vsel %vm882_vm4, %v4177_v18, %v4178_v17  ;;  %v614_v25 = vpack.c.bf16 %v597_v22, %v596_v0  ;;  %v899_v26 = vmul.f32 %v4177_v18, %v529_v20 }
  0xaf   :  { %v900_v27 = vmul.f32 %v883_v23, %v530_v21 }
  0xb0   :  { %634 = vrot.lane.b32.xlu0 %v614_v25, %s4514_s27 }
  0xb1   :  { %v490_v28 = vld [vmem:[#allocation2 + $0x28] sm:$0xff]  ;;  %v917_v33 = vpack.c.bf16 %v900_v27, %v899_v26 }
  0xb2   :  { %v450_v13 = vpop.permute.xlu1 %449  ;;  %v448_v14 = vpop.permute.xlu0 %447  ;;  %v538_v29 = vunpack.c.l.bf16 %v490_v28  ;;  %v539_v30 = vunpack.c.h.bf16 %v490_v28 }
  0xb3   :  { %v452_v16 = vsel %vm241_vm1, %v448_v14, %v450_v13  ;;  %v4726_v24 = vpop.permute.xlu2 %4190 }
  0xb4   :  { %3596 = vmatmul.msk.f32.gmra.mxu3 %vm89_vm0, %v452_v16  ;;  %v605_v31 = vmul.f32 %v4157_v8, %v538_v29  ;;  %v606_v32 = vmul.f32 %v580_v19, %v539_v30  ;;  %v908_v36 = vmul.f32 %v4177_v18, %v538_v29  ;;  %v909_v37 = vmul.f32 %v883_v23, %v539_v30 }
  0xb6   :  { %v619_v34 = vpack.c.bf16 %v606_v32, %v605_v31  ;;  %v922_v38 = vpack.c.bf16 %v909_v37, %v908_v36 }
  0xb8   :  { %644 = vrot.lane.b32.xlu2 %v619_v34, %s4514_s27  ;;  %937 = vrot.lane.b32.xlu0 %v917_v33, %s4511_s24 }
  0xba   :  { %v4744_v63 = vpop.permute.xlu0 %4160  ;;  %v4746_v50 = vpop.permute.xlu1 %4165 }
  0xbb   :  { %v4729_v35 = vpop.permute.xlu2 %4200  ;;  %v4163_v32 = vunpack.i.h.bf16 %v4744_v63  ;;  %v4162_v33 = vunpack.i.l.bf16 %v4744_v63  ;;  %v4167_v11 = vunpack.i.l.bf16 %v4746_v50 }
  0xc0   :  { %947 = vrot.lane.b32.xlu2 %v922_v38, %s4511_s24  ;;  %728 = vrot.lane.b32.xlu0 %v490_v28, %s4516_s28 }
  0xc2   :  { %v4748_v10 = vpop.permute.xlu0 %4180  ;;  %v4750_v5 = vpop.permute.xlu1 %4185 }
  0xc3   :  { %v4733_v39 = vpop.permute.xlu2 %4215 }
  0xc4   :  { %v4218_v40 = vunpack.i.h.bf16 %v4733_v39  ;;  %v4217_v41 = vunpack.i.l.bf16 %v4733_v39 }
  0xc6   :  { %v1045_v43 = vsel %vm1044_vm5, %v4217_v41, %v4218_v40  ;;  %v1061_v44 = vmul.f32 %v4217_v41, %v529_v20  ;;  %v1070_v47 = vmul.f32 %v4217_v41, %v538_v29 }
  0xc7   :  { %v1062_v45 = vmul.f32 %v1045_v43, %v530_v21  ;;  %v1071_v48 = vmul.f32 %v1045_v43, %v539_v30 }
  0xc9   :  { %v1079_v46 = vpack.c.bf16 %v1062_v45, %v1061_v44  ;;  %v1084_v49 = vpack.c.bf16 %v1071_v48, %v1070_v47  ;;  %v4812_v47 = vsel %vm579_vm3, %v4158_v3, %v4162_v33  ;;  %v4817_v48 = vsel %vm579_vm3, %v4162_v33, %v4163_v32 }
  0xca   :  { %v4752_v6 = vpop.permute.xlu0 %4205  ;;  %v4771_v21 = vpop.permute.xlu1 %4195  ;;  %v4183_v3 = vunpack.i.h.bf16 %v4748_v10 }
  0xcb   :  { %1099 = vrot.lane.b32.xlu1 %v1079_v46, %s4512_s25  ;;  %1109 = vrot.lane.b32.xlu0 %v1084_v49, %s4512_s25  ;;  %v4208_v58 = vunpack.i.h.bf16 %v4752_v6  ;;  %v4756_v7 = vunpack.i.l.bf16 %v4752_v6  ;;  %v4758_v14 = vpop.permute.xlu2 %4230  ;;  %v4776_v23 = vunpack.i.l.bf16 %v4771_v21  ;;  %v4198_v28 = vunpack.i.h.bf16 %v4771_v21 }
  0xcc   :  { %v4233_v52 = vunpack.i.h.bf16 %v4758_v14  ;;  %v4769_v20 = vunpack.i.l.bf16 %v4758_v14  ;;  %v4881_v6 = vsel %vm579_vm3, %v4163_v32, %v4167_v11  ;;  %v4187_v32 = vunpack.i.l.bf16 %v4750_v5 }
  0xcd   :  { %v4764_v16 = vsel %vm1130_vm6, %v4756_v7, %v4208_v58  ;;  %v4795_v34 = vsel %vm968_vm8, %v4776_v23, %v4198_v28 }
  0xce   :  { %v4785_v31 = vsel %vm666_vm7, %v4769_v20, %v4233_v52  ;;  %v4920_v14 = vsel %vm882_vm4, %v4183_v3, %v4187_v32 }
  0xd2   :  { %v4805_v44 = vpop.permute.xlu0 %4220 }
  0xd3   :  { %v6398_v49 = vunpack.i.h.bf16 %v4805_v44  ;;  %v4222_v51 = vunpack.i.l.bf16 %v4805_v44 }
  0xf8   :  { %v265_v42 = vpop.f32.mrf.mxu3 }
  0xf9   :  { %v271_v53 = vpack.c.bf16 %v265_v42, %v265_v42 }
  0xfb   :  { %273 = vst [vmem:[#allocation2 + $0x10] sm:$0xf] %v271_v53 }
 0x100   :  { %v160_v54 = vpop.f32.mrf.mxu1 }
 0x101   :  { %v166_v2 = vpack.c.bf16 %v160_v54, %v160_v54 }
 0x103   :  { %168 = vst [vmem:[#allocation2 + $0x8] sm:$0xf] %v166_v2 }
 0x106   :  { %v207_v9 = vpop.f32.mrf.mxu2 }
 0x107   :  { %v213_v8 = vpack.c.bf16 %v207_v9, %v207_v9 }
 0x108   :  { %v163_v12 = vpop.f32.mrf.mxu1 }
 0x109   :  { %215 = vst [vmem:[#allocation2 + $0xc] sm:$0xf] %v213_v8  ;;  %v167_v13 = vpack.c.bf16 %v163_v12, %v163_v12 }
 0x10a   :  { %v1162_v15 = vld [vmem:[#allocation2 + $0x4] sm:$0xff] }
 0x10b   :  { %1170 = vst [vmem:[#allocation3 + $0x100] sm:$0xff] %v1162_v15  ;;  %1522 = vrot.lane.b32.xlu2 %v1162_v15, %s4517_s29  ;;  %v1188_v18 = vunpack.c.l.bf16 %v1162_v15  ;;  %v1189_v19 = vunpack.c.h.bf16 %v1162_v15 }
 0x10c   :  { %169 = vst [vmem:[#allocation2 + $0x30] sm:$0xf] %v167_v13  ;;  %v4182_v13 = vunpack.i.l.bf16 %v4748_v10 }
 0x10d   :  { %v1239_v0 = vmul.f32 %v4756_v7, %v1188_v18  ;;  %v1240_v22 = vmul.f32 %v4764_v16, %v1189_v19  ;;  %v1646_v41 = vmul.f32 %v4769_v20, %v1188_v18  ;;  %v1647_v43 = vmul.f32 %v4785_v31, %v1189_v19 }
 0x10e   :  { %v210_v25 = vpop.f32.mrf.mxu2  ;;  %v1401_v45 = vmul.f32 %v4776_v23, %v1188_v18  ;;  %v1402_v46 = vmul.f32 %v4795_v34, %v1189_v19  ;;  %v4848_v33 = vsel %vm882_vm4, %v4182_v13, %v4183_v3 }
 0x10f   :  { %v214_v26 = vpack.c.bf16 %v210_v25, %v210_v25  ;;  %v1257_v27 = vpack.c.bf16 %v1240_v22, %v1239_v0  ;;  %v1664_v9 = vpack.c.bf16 %v1647_v43, %v1646_v41  ;;  %v4829_v22 = vsel %vm1044_vm5, %v4222_v51, %v6398_v49  ;;  %v4850_v41 = vpop.permute.xlu1 %4210 }
 0x110   :  { %v4779_v29 = vld [vmem:[#allocation2 + $0xc] sm:$0xff]  ;;  %v1419_v18 = vpack.c.bf16 %v1402_v46, %v1401_v45  ;;  %v4836_v25 = vsel %vm1044_vm5, %v4218_v40, %v4222_v51  ;;  %v6393_v43 = vunpack.i.h.bf16 %v4850_v41  ;;  %v4212_v45 = vunpack.i.l.bf16 %v4850_v41 }
 0x111   :  { %v699_v30 = vld [vmem:[#allocation2 + $0x8] sm:$0xff]  ;;  %1171 = vst [vmem:[#allocation3 + $0x108] sm:$0xff] %v4779_v29  ;;  %1277 = vrot.lane.b32.xlu0 %v1257_v27, %s4513_s26 }
 0x112   :  { %216 = vst [vmem:[#allocation2 + $0x34] sm:$0xf] %v214_v26  ;;  %v531_v36 = vunpack.c.l.bf16 %v699_v30  ;;  %v532_v37 = vunpack.c.h.bf16 %v699_v30 }
 0x113   :  { %v4797_v38 = vld [vmem:[#allocation2 + $0x2c] sm:$0xff]  ;;  %720 = vrot.lane.b32.xlu2 %v699_v30, %s4516_s28  ;;  %v4843_v30 = vsel %vm882_vm4, %v4178_v17, %v4182_v13  ;;  %v4872_v13 = vsel %vm1130_vm6, %v4212_v45, %v6393_v43 }
 0x114   :  { %1174 = vst [vmem:[#allocation3 + $0x120] sm:$0xff] %v4797_v38  ;;  %1532 = vrot.lane.b32.xlu1 %v4797_v38, %s4517_s29  ;;  %v598_v42 = vmul.f32 %v4812_v47, %v531_v36  ;;  %v599_v53 = vmul.f32 %v4817_v48, %v532_v37  ;;  %v1063_v26 = vmul.f32 %v4836_v25, %v531_v36 }
 0x115   :  { %v1064_v27 = vmul.f32 %v4829_v22, %v532_v37  ;;  %v901_v39 = vmul.f32 %v4843_v30, %v531_v36  ;;  %v902_v40 = vmul.f32 %v4848_v33, %v532_v37  ;;  %v1190_v36 = vunpack.c.l.bf16 %v4779_v29 }
 0x116   :  { %v417_v54 = vpop.f32.mrf.mxu2  ;;  %v615_v0 = vpack.c.bf16 %v599_v53, %v598_v42  ;;  %v1191_v37 = vunpack.c.h.bf16 %v4779_v29 }
 0x117   :  { %v268_v2 = vpop.f32.mrf.mxu3  ;;  %v423_v8 = vpack.c.bf16 %v417_v54, %v417_v54  ;;  %v1080_v54 = vpack.c.bf16 %v1064_v27, %v1063_v26 }
 0x118   :  { %v272_v12 = vpack.c.bf16 %v268_v2, %v268_v2 }
 0x119   :  { %v323_v15 = vpop.f32.mrf.mxu0  ;;  %1684 = vrot.lane.b32.xlu0 %v1664_v9, %s4509_s6  ;;  %425 = vst [vmem:[#allocation2 + $0x1c] sm:$0xf] %v423_v8  ;;  %v918_v9 = vpack.c.bf16 %v902_v40, %v901_v39  ;;  %v6396_v8 = vunpack.i.h.bf16 %v4746_v50  ;;  %v1242_v39 = vmul.f32 %v4872_v13, %v1191_v37  ;;  %v491_v43 = vld [vmem:[#allocation2 + $0x30] sm:$0xff] }
 0x11a   :  { %274 = vst [vmem:[#allocation2 + $0x38] sm:$0xf] %v272_v12  ;;  %v329_v19 = vpack.c.bf16 %v323_v15, %v323_v15  ;;  %v4867_v12 = vsel %vm1130_vm6, %v4208_v58, %v4212_v45  ;;  %v4874_v15 = vpop.permute.xlu0 %4235 }
 0x11b   :  { %1439 = vrot.lane.b32.xlu2 %v1419_v18, %s4510_s23  ;;  %v4886_v58 = vsel %vm579_vm3, %v4167_v11, %v6396_v8  ;;  %v1241_v27 = vmul.f32 %v4867_v12, %v1190_v36  ;;  %v6397_v40 = vunpack.i.h.bf16 %v4874_v15  ;;  %v4237_v63 = vunpack.i.l.bf16 %v4874_v15 }
 0x11c   :  { %331 = vst [vmem:[#allocation2 + $0x14] sm:$0xf] %v329_v19  ;;  %636 = vrot.lane.b32.xlu1 %v615_v0, %s4514_s27  ;;  %v4202_v11 = vunpack.i.l.bf16 %v4729_v35  ;;  %v1198_v8 = vunpack.c.h.bf16 %v4797_v38 }
 0x120   :  { %v370_v46 = vpop.f32.mrf.mxu1 }
 0x121   :  { %v4857_v17 = vld [vmem:[#allocation2 + $0x34] sm:$0xff]  ;;  %v376_v42 = vpack.c.bf16 %v370_v46, %v370_v46  ;;  %v326_v53 = vpop.f32.mrf.mxu0 }
 0x122   :  { %1175 = vst [vmem:[#allocation3 + $0x128] sm:$0xff] %v4857_v17  ;;  %v330_v2 = vpack.c.bf16 %v326_v53, %v326_v53 }
 0x123   :  { %378 = vst [vmem:[#allocation2 + $0x18] sm:$0xf] %v376_v42  ;;  %1101 = vrot.lane.b32.xlu2 %v1080_v54, %s4512_s25  ;;  %v700_v51 = vld [vmem:[#allocation2 + $0x10] sm:$0xff]  ;;  %v6395_v42 = vunpack.i.h.bf16 %v4729_v35  ;;  %v6394_v54 = vunpack.i.h.bf16 %v4750_v5 }
 0x124   :  { %332 = vst [vmem:[#allocation2 + $0x3c] sm:$0xf] %v330_v2  ;;  %939 = vrot.lane.b32.xlu1 %v918_v9, %s4511_s24  ;;  %722 = vrot.lane.b32.xlu0 %v700_v51, %s4516_s28  ;;  %v533_v18 = vunpack.c.l.bf16 %v700_v51  ;;  %v534_v19 = vunpack.c.h.bf16 %v700_v51  ;;  %v1258_v9 = vpack.c.bf16 %v1242_v39, %v1241_v27  ;;  %v4905_v51 = vsel %vm666_vm7, %v4233_v52, %v4237_v63 }
 0x125   :  { %v4925_v52 = vsel %vm882_vm4, %v4187_v32, %v6394_v54  ;;  %v4937_v10 = vsel %vm968_vm8, %v4202_v11, %v6395_v42  ;;  %v1648_v3 = vmul.f32 %v4905_v51, %v1190_v36  ;;  %v1197_v42 = vunpack.c.l.bf16 %v4797_v38 }
 0x126   :  { %v600_v0 = vmul.f32 %v4881_v6, %v533_v18  ;;  %v601_v26 = vmul.f32 %v4886_v58, %v534_v19  ;;  %v903_v27 = vmul.f32 %v4920_v14, %v533_v18  ;;  %v904_v39 = vmul.f32 %v4925_v52, %v534_v19 }
 0x128   :  { %v373_v45 = vpop.f32.mrf.mxu1  ;;  %v616_v46 = vpack.c.bf16 %v601_v26, %v600_v0  ;;  %v4910_v0 = vsel %vm666_vm7, %v4237_v63, %v6397_v40  ;;  %v4912_v26 = vpop.permute.xlu0 %4250  ;;  %v4932_v63 = vsel %vm968_vm8, %v4198_v28, %v4202_v11  ;;  %v919_v11 = vpack.c.bf16 %v904_v39, %v903_v27 }
 0x129   :  { %v377_v53 = vpack.c.bf16 %v373_v45, %v373_v45  ;;  %v1649_v32 = vmul.f32 %v4910_v0, %v1191_v37  ;;  %v1403_v45 = vmul.f32 %v4932_v63, %v1190_v36  ;;  %v4252_v21 = vunpack.i.l.bf16 %v4912_v26 }
 0x12a   :  { %v4898_v2 = vld [vmem:[#allocation2 + $0x14] sm:$0xff]  ;;  %v4947_v36 = vunpack.c.l.bf16 %v491_v43  ;;  %v6409_v27 = vunpack.i.h.bf16 %v4912_v26  ;;  %v1249_v39 = vmul.f32 %v4764_v16, %v1198_v8 }
 0x12b   :  { %1172 = vst [vmem:[#allocation3 + $0x110] sm:$0xff] %v4898_v2  ;;  %638 = vrot.lane.b32.xlu2 %v616_v46, %s4514_s27  ;;  %v1404_v46 = vmul.f32 %v4937_v10, %v1191_v37  ;;  %v1665_v40 = vpack.c.bf16 %v1649_v32, %v1648_v3  ;;  %v4949_v37 = vunpack.c.h.bf16 %v491_v43 }
 0x12c   :  { %379 = vst [vmem:[#allocation2 + $0x40] sm:$0xf] %v377_v53  ;;  %1279 = vrot.lane.b32.xlu1 %v1258_v9, %s4513_s26  ;;  %1524 = vrot.lane.b32.xlu0 %v4779_v29, %s4517_s29  ;;  %v4962_v38 = vsel %vm1044_vm5, %v4252_v21, %v6409_v27  ;;  %v607_v32 = vmul.f32 %v4812_v47, %v4947_v36 }
 0x12d   :  { %v1420_v49 = vpack.c.bf16 %v1404_v46, %v1403_v45  ;;  %v1066_v3 = vmul.f32 %v4962_v38, %v534_v19  ;;  %v608_v45 = vmul.f32 %v4817_v48, %v4949_v37  ;;  %v1655_v47 = vmul.f32 %v4769_v20, %v1197_v42 }
 0x12e   :  { %v420_v29 = vpop.f32.mrf.mxu2  ;;  %v1656_v48 = vmul.f32 %v4785_v31, %v1198_v8  ;;  %v911_v19 = vmul.f32 %v4848_v33, %v4949_v37 }
 0x12f   :  { %v424_v28 = vpack.c.bf16 %v420_v29, %v420_v29  ;;  %v474_v9 = vpop.f32.mrf.mxu3  ;;  %v6408_v29 = vunpack.i.h.bf16 %v4805_v44  ;;  %v620_v16 = vpack.c.bf16 %v608_v45, %v607_v32  ;;  %v1200_v32 = vunpack.c.h.bf16 %v4857_v17 }
 0x130   :  { %v480_v54 = vpack.c.bf16 %v474_v9, %v474_v9  ;;  %v4261_v46 = vpop.permute.xlu0 %4260  ;;  %v1411_v45 = vmul.f32 %v4795_v34, %v1198_v8  ;;  %v705_v8 = vld [vmem:[#allocation2 + $0x38] sm:$0xff] }
 0x131   :  { %426 = vst [vmem:[#allocation2 + $0x44] sm:$0xf] %v424_v28  ;;  %v4957_v28 = vsel %vm1044_vm5, %v6408_v29, %v4252_v21  ;;  %v4263_v27 = vunpack.i.h.bf16 %v4261_v46 }
 0x132   :  { %482 = vst [vmem:[#allocation2 + $0x20] sm:$0xf] %v480_v54  ;;  %v1248_v54 = vmul.f32 %v4756_v7, %v1197_v42  ;;  %v1065_v44 = vmul.f32 %v4957_v28, %v533_v18  ;;  %v910_v18 = vmul.f32 %v4843_v30, %v4947_v36  ;;  %v1410_v30 = vmul.f32 %v4776_v23, %v1197_v42  ;;  %v5018_v23 = vpop.permute.xlu1 %4225  ;;  %v5024_v42 = vpop.permute.xlu2 %4245 }
 0x133   :  { %v4951_v53 = vld [vmem:[#allocation2 + $0x3c] sm:$0xff]  ;;  %941 = vrot.lane.b32.xlu2 %v919_v11, %s4511_s24 }
 0x134   :  { %1176 = vst [vmem:[#allocation3 + $0x130] sm:$0xff] %v4951_v53  ;;  %1686 = vrot.lane.b32.xlu1 %v1665_v40, %s4509_s6  ;;  %1441 = vrot.lane.b32.xlu0 %v1420_v49, %s4510_s23  ;;  %v1262_v49 = vpack.c.bf16 %v1249_v39, %v1248_v54  ;;  %v1081_v7 = vpack.c.bf16 %v1066_v3, %v1065_v44  ;;  %v1199_v3 = vunpack.c.l.bf16 %v4857_v17 }
 0x135   :  { %v1669_v54 = vpack.c.bf16 %v1656_v48, %v1655_v47  ;;  %v923_v44 = vpack.c.bf16 %v911_v19, %v910_v18  ;;  %v1658_v48 = vmul.f32 %v4910_v0, %v1200_v32  ;;  %v4262_v18 = vunpack.i.l.bf16 %v4261_v46 }
 0x136   :  { %v1657_v47 = vmul.f32 %v4905_v51, %v1199_v3  ;;  %v1412_v46 = vmul.f32 %v4932_v63, %v1199_v3 }
 0x137   :  { %v477_v21 = vpop.f32.mrf.mxu3  ;;  %v5049_v51 = vsel %vm666_vm7, %v4262_v18, %v4263_v27 }
 0x138   :  { %v481_v9 = vpack.c.bf16 %v477_v21, %v477_v21  ;;  %v4271_v11 = vpop.permute.xlu0 %4270  ;;  %v1250_v21 = vmul.f32 %v4867_v12, %v1199_v3  ;;  %v1424_v12 = vpack.c.bf16 %v1411_v45, %v1410_v30  ;;  %v1413_v45 = vmul.f32 %v4937_v10, %v1200_v32  ;;  %v701_v3 = vld [vmem:[#allocation2 + $0x18] sm:$0xff] }
 0x139   :  { %v4975_v40 = vld [vmem:[#allocation2 + $0x1c] sm:$0xff]  ;;  %v4272_v29 = vunpack.i.l.bf16 %v4271_v11  ;;  %v4991_v20 = vunpack.i.h.bf16 %v4271_v11  ;;  %v1670_v11 = vpack.c.bf16 %v1658_v48, %v1657_v47  ;;  %v4172_v48 = vunpack.i.l.bf16 %v4705_v4 }
 0x13a   :  { %1173 = vst [vmem:[#allocation3 + $0x118] sm:$0xff] %v4975_v40  ;;  %v5002_v33 = vunpack.c.l.bf16 %v4975_v40  ;;  %v5033_v19 = vpop.permute.xlu1 %4240  ;;  %v5054_v0 = vpop.permute.xlu2 %644 }
 0x13b   :  { %483 = vst [vmem:[#allocation2 + $0x48] sm:$0xf] %v481_v9  ;;  %1287 = vrot.lane.b32.xlu2 %v1262_v49, %s4513_s26  ;;  %v4998_v31 = vsel %vm666_vm7, %v4263_v27, %v4272_v29  ;;  %v1251_v9 = vmul.f32 %v4872_v13, %v1200_v32  ;;  %v5009_v49 = vsel %vm666_vm7, %v4272_v29, %v4991_v20  ;;  %v5036_v29 = vunpack.c.l.bf16 %v4898_v2 }
 0x13c   :  { %1103 = vrot.lane.b32.xlu1 %v1081_v7, %s4512_s25  ;;  %646 = vrot.lane.b32.xlu0 %v620_v16, %s4514_s27  ;;  %v5016_v7 = vmul.f32 %v4998_v31, %v5002_v33 }
 0x13d   :  { %v1263_v13 = vpack.c.bf16 %v1251_v9, %v1250_v21  ;;  %v1425_v21 = vpack.c.bf16 %v1413_v45, %v1412_v46  ;;  %v1023_v9 = vunpack.c.l.bf16 %v705_v8  ;;  %v5085_v46 = vunpack.c.h.bf16 %v701_v3 }
 0x140   :  { %v5077_v32 = vpop.permute.xlu0 %634 }
 0x142   :  { %v4987_v39 = vld [vmem:[#allocation2 + $0x44] sm:$0xff]  ;;  %v5066_v63 = vpop.permute.xlu1 %4255 }
 0x143   :  { %1177 = vst [vmem:[#allocation3 + $0x138] sm:$0xff] %v4987_v39  ;;  %1694 = vrot.lane.b32.xlu2 %v1669_v54, %s4509_s6  ;;  %v5039_v54 = vunpack.c.h.bf16 %v4898_v2  ;;  %v707_v1 = vld [vmem:[#allocation2 + $0x48] sm:$0xf] }
 0x144   :  { %730 = vrot.lane.b32.xlu1 %v491_v43, %s4516_s28  ;;  %949 = vrot.lane.b32.xlu0 %v923_v44, %s4511_s24  ;;  %v5012_v43 = vunpack.c.h.bf16 %v4975_v40  ;;  %v6410_v44 = vunpack.i.h.bf16 %v4874_v15  ;;  %v1073_v15 = vmul.f32 %v4829_v22, %v4949_v37  ;;  %v5071_v22 = vpop.permute.xlu2 %947 }
 0x146   :  { %v5022_v34 = vmul.f32 %v5009_v49, %v5012_v43  ;;  %v5046_v30 = vsel %vm666_vm7, %v6410_v44, %v4262_v18  ;;  %v5083_v44 = vunpack.c.l.bf16 %v701_v3 }
 0x147   :  { %v1650_v27 = vmul.f32 %v5046_v30, %v5036_v29 }
 0x14b   :  { %732 = vrot.lane.b32.xlu2 %v705_v8, %s4516_s28 }
 0x14c   :  { %1449 = vrot.lane.b32.xlu1 %v1424_v12, %s4510_s23  ;;  %1289 = vrot.lane.b32.xlu0 %v1263_v13, %s4513_s26  ;;  %v1024_v12 = vunpack.c.h.bf16 %v705_v8  ;;  %v5080_v8 = vunpack.i.h.bf16 %v4705_v4 }
 0x14e   :  { %v1075_v10 = vmul.f32 %v4962_v38, %v1024_v12  ;;  %v610_v37 = vmul.f32 %v1024_v12, %v4886_v58  ;;  %v913_v4 = vmul.f32 %v1024_v12, %v4925_v52  ;;  %v6411_v38 = vunpack.i.h.bf16 %v4746_v50 }
 0x14f   :  { %v4192_v50 = vunpack.i.l.bf16 %v4726_v24  ;;  %v4227_v52 = vunpack.i.l.bf16 %v5018_v23 }
 0x150   :  { %v5098_v45 = vsel %vm579_vm3, %v6411_v38, %v4172_v48  ;;  %v4257_v38 = vunpack.i.l.bf16 %v5066_v63 }
 0x153   :  { %1534 = vrot.lane.b32.xlu2 %v4857_v17, %s4517_s29  ;;  %v1072_v17 = vmul.f32 %v4836_v25, %v4947_v36  ;;  %v1074_v25 = vmul.f32 %v4957_v28, %v1023_v9  ;;  %v609_v36 = vmul.f32 %v1023_v9, %v4881_v6  ;;  %v4266_v6 = vpop.permute.xlu1 %4265  ;;  %v912_v28 = vmul.f32 %v1023_v9, %v4920_v14 }
 0x154   :  { %1526 = vrot.lane.b32.xlu1 %v4898_v2, %s4517_s29  ;;  %1696 = vrot.lane.b32.xlu0 %v1670_v11, %s4509_s6  ;;  %v1651_v2 = vmul.f32 %v5049_v51, %v5039_v54  ;;  %v5110_v14 = vunpack.i.h.bf16 %v4726_v24 }
 0x155   :  { %v1085_v13 = vpack.c.bf16 %v1073_v15, %v1072_v17  ;;  %v1086_v18 = vpack.c.bf16 %v1075_v10, %v1074_v25  ;;  %v621_v11 = vpack.c.bf16 %v610_v37, %v609_v36  ;;  %v5102_v17 = vsel %vm579_vm3, %v4172_v48, %v5080_v8 }
 0x156   :  { %v1666_v47 = vpack.c.bf16 %v1651_v2, %v1650_v27  ;;  %v4228_v15 = vunpack.i.h.bf16 %v5018_v23  ;;  %v603_v27 = vmul.f32 %v5102_v17, %v5085_v46  ;;  %v5114_v2 = vpop.permute.xlu0 %937  ;;  %v5136_v10 = vsel %vm882_vm4, %v4192_v50, %v5110_v14 }
 0x158   :  { %v5119_v12 = vsel %vm968_vm8, %v4227_v52, %v4228_v15 }
 0x15b   :  { %1451 = vrot.lane.b32.xlu2 %v1425_v21, %s4510_s23  ;;  %v924_v21 = vpack.c.bf16 %v913_v4, %v912_v28  ;;  %v719_v36 = vpop.permute.xlu1 %718  ;;  %v4243_v28 = vunpack.i.h.bf16 %v5033_v19  ;;  %v5151_v4 = vunpack.i.h.bf16 %v5066_v63 }
 0x15c   :  { %1111 = vrot.lane.b32.xlu1 %v1085_v13, %s4512_s25  ;;  %1688 = vrot.lane.b32.xlu0 %v1666_v47, %s4509_s6  ;;  %v6412_v13 = vunpack.i.h.bf16 %v4729_v35  ;;  %v6413_v47 = vunpack.i.h.bf16 %v4750_v5  ;;  %v1406_v35 = vmul.f32 %v5039_v54, %v5119_v12  ;;  %v738_v48 = vrot.slane %v719_v36, 4 }
 0x15d   :  { %v5166_v63 = vsel %vm1130_vm6, %v4243_v28, %v4257_v38 }
 0x15e   :  { %v5127_v24 = vsel %vm968_vm8, %v6412_v13, %v4227_v52  ;;  %v5132_v25 = vsel %vm882_vm4, %v6413_v47, %v4192_v50  ;;  %v4242_v50 = vunpack.i.l.bf16 %v5033_v19  ;;  %v5174_v19 = vunpack.i.h.bf16 %v4266_v6 }
 0x15f   :  { %v905_v5 = vmul.f32 %v5132_v25, %v5083_v44 }
 0x160   :  { %v5163_v47 = vsel %vm1130_vm6, %v4242_v50, %v4243_v28 }
 0x161   :  { %v1244_v28 = vmul.f32 %v5039_v54, %v5163_v47 }
 0x163   :  { %1113 = vrot.lane.b32.xlu2 %v1086_v18, %s4512_s25 }
 0x164   :  { %648 = vrot.lane.b32.xlu1 %v621_v11, %s4514_s27  ;;  %1528 = vrot.lane.b32.xlu0 %v4975_v40, %s4517_s29  ;;  %v602_v40 = vmul.f32 %v5098_v45, %v5083_v44  ;;  %v906_v11 = vmul.f32 %v5136_v10, %v5085_v46 }
 0x165   :  { %v5091_v58 = vpop.permute.xlu2 %1522 }
 0x166   :  { %v617_v9 = vpack.c.bf16 %v603_v27, %v602_v40  ;;  %v5157_v27 = vpop.permute.xlu0 %728  ;;  %v920_v13 = vpack.c.bf16 %v906_v11, %v905_v5 }
 0x16b   :  { %951 = vrot.lane.b32.xlu2 %v924_v21, %s4511_s24  ;;  %v702_v21 = vld [vmem:[#allocation2 + $0x20] sm:$0xf] }
 0x16c   :  { %724 = vrot.lane.b32.xlu1 %v701_v3, %s4516_s28  ;;  %640 = vrot.lane.b32.xlu0 %v617_v9, %s4514_s27  ;;  %v1405_v3 = vmul.f32 %v5036_v29, %v5127_v24 }
 0x16d   :  { %v5138_v37 = vpop.permute.xlu2 %720 }
 0x16e   :  { %v6399_v18 = vrot.slane %v5138_v37, 4  ;;  %v1421_v9 = vpack.c.bf16 %v1406_v35, %v1405_v3  ;;  %v6414_v35 = vunpack.i.h.bf16 %v4850_v41 }
 0x170   :  { %v748_v40 = vsel %vm664_vm9, %v738_v48, %v6399_v18  ;;  %v5170_v48 = vsel %vm1130_vm6, %v4257_v38, %v5151_v4  ;;  %v5181_v5 = vsel %vm1130_vm6, %v6414_v35, %v4242_v50  ;;  %v1245_v38 = vmul.f32 %v5166_v63, %v5002_v33 }
 0x171   :  { %v750_v52 = vsel %vm749_vm10, %v719_v36, %v748_v40  ;;  %v4267_v36 = vunpack.i.l.bf16 %v4266_v6  ;;  %v1243_v11 = vmul.f32 %v5036_v29, %v5181_v5  ;;  %v1246_v40 = vmul.f32 %v5170_v48, %v5012_v43  ;;  %v5191_v6 = vld [vmem:[#allocation2 + $0x20] sm:$0xff]  }
 0x172   :  { %773 = vst [vmem:[#allocation3 + $0x40] sm:$0xff] %v750_v52  ;;  %v6415_v52 = vunpack.i.h.bf16 %v4912_v26  ;;  %v5210_v26 = vunpack.i.h.bf16 %v5024_v42 }
 0x173   :  { %726 = vrot.lane.b32.xlu2 %v702_v21, %s4516_s28  ;;  %v5200_v50 = vsel %vm1044_vm5, %v4267_v36, %v5174_v19  ;;  %v1259_v29 = vpack.c.bf16 %v1244_v28, %v1243_v11  ;;  %v5202_v21 = vpop.permute.xlu0 %1109  ;;  %v1260_v54 = vpack.c.bf16 %v1246_v40, %v1245_v38  ;;  %v4247_v28 = vunpack.i.l.bf16 %v5024_v42 }
 0x174   :  { %1443 = vrot.lane.b32.xlu1 %v1421_v9, %s4510_s23  ;;  %943 = vrot.lane.b32.xlu0 %v920_v13, %s4511_s24  ;;  %v5196_v41 = vsel %vm1044_vm5, %v6415_v52, %v4267_v36  ;;  %v537_v9 = vunpack.c.l.bf16 %v5191_v6  ;;  %v1100_v13 = vpop.permute.xlu1 %1099  ;;  %v1068_v11 = vmul.f32 %v5200_v50, %v5085_v46  ;;  %v1609_v46 = vunpack.c.h.bf16 %v4951_v53 }
 0x175   :  { %v5176_v3 = vpop.permute.xlu2 %1439  ;;  %v1067_v36 = vmul.f32 %v5196_v41, %v5083_v44  ;;  %v1119_v38 = vrot.slane %v1100_v13, 4  ;;  %v1608_v44 = vunpack.c.l.bf16 %v4951_v53  ;;  %v1390_v59 = vsel %vm968_vm8, %v4228_v15, %v4247_v28 }
 0x176   :  { %v604_v52 = vmul.f32 %v5080_v8, %v537_v9  ;;  %v1391_v9 = vsel %vm968_vm8, %v4247_v28, %v5210_v26  ;;  %v1407_v23 = vmul.f32 %v1390_v59, %v5002_v33 }
 0x177   :  { %v1082_v18 = vpack.c.bf16 %v1068_v11, %v1067_v36  ;;  %v1659_v36 = vmul.f32 %v5046_v30, %v1608_v44  ;;  %v1660_v11 = vmul.f32 %v5049_v51, %v1609_v46 }
 0x178   :  { %v618_v42 = vpack.c.bf16 %v604_v52, %v604_v52 }
 0x179   :  { %v1671_v52 = vpack.c.bf16 %v1660_v11, %v1659_v36 }
 0x17b   :  { %1536 = vrot.lane.b32.xlu2 %v4951_v53, %s4517_s29 }
 0x17c   :  { %1281 = vrot.lane.b32.xlu1 %v1259_v29, %s4513_s26  ;;  %1283 = vrot.lane.b32.xlu0 %v1260_v54, %s4513_s26  ;;  %v5221_v29 = vld [vmem:[#allocation2 + $0x48] sm:$0xff]  }
 0x17d   :  { %v5212_v35 = vpop.permute.xlu2 %1101  ;;  %v546_v57 = vunpack.c.l.bf16 %v5221_v29 }
 0x17e   :  { %v6400_v40 = vrot.slane %v5212_v35, 4 }
 0x180   :  { %v1129_v54 = vsel %vm664_vm9, %v1119_v38, %v6400_v40  ;;  %v706_v38 = vld [vmem:[#allocation2 + $0x40] sm:$0xff]  ;;  %v5253_v40 = vunpack.c.h.bf16 %v4987_v39 }
 0x181   :  { %v1131_v16 = vsel %vm1130_vm6, %v1100_v13, %v1129_v54 }
 0x182   :  { %1154 = vst [vmem:[#allocation3 + $0xc0] sm:$0xff] %v1131_v16  ;;  %v1408_v16 = vmul.f32 %v1391_v9, %v5012_v43  ;;  %v1414_v43 = vmul.f32 %v1608_v44, %v5127_v24 }
 0x183   :  { %1105 = vrot.lane.b32.xlu2 %v1082_v18, %s4512_s25  ;;  %v5237_v13 = vpop.permute.xlu0 %1277  ;;  %v613_v18 = vmul.f32 %v5080_v8, %v546_v57  ;;  %v1415_v57 = vmul.f32 %v1609_v46, %v5119_v12  ;;  %v1025_v12 = vunpack.c.l.bf16 %v706_v38 }
 0x184   :  { %642 = vrot.lane.b32.xlu1 %v618_v42, %s4514_s27  ;;  %734 = vrot.lane.b32.xlu0 %v706_v38, %s4516_s28  ;;  %v1422_v28 = vpack.c.bf16 %v1408_v16, %v1407_v23  ;;  %v5250_v42 = vunpack.c.l.bf16 %v4987_v39  ;;  %v1417_v23 = vmul.f32 %v1391_v9, %v5253_v40  ;;  %v654_v16 = vrot.slane %v5077_v32, 4 }
 0x185   :  { %v5240_v53 = vpop.permute.xlu2 %638  ;;  %v623_v54 = vpack.c.bf16 %v613_v18, %v613_v18  ;;  %v1026_v9 = vunpack.c.h.bf16 %v706_v38  ;;  %v1076_v38 = vmul.f32 %v5196_v41, %v1025_v12 }
 0x186   :  { %v5244_v15 = vpop.permute.xlu1 %1532  ;;  %v1416_v8 = vmul.f32 %v1390_v59, %v5250_v42  ;;  %v656_v36 = vrot.slane %v5240_v53, 4 }
 0x18b   :  { %1445 = vrot.lane.b32.xlu2 %v1422_v28, %s4510_s23  ;;  %v5262_v30 = vpop.permute.xlu0 %1684  ;;  %v1426_v28 = vpack.c.bf16 %v1415_v57, %v1414_v43  ;;  %v1252_v43 = vmul.f32 %v1608_v44, %v5181_v5  ;;  %v1253_v57 = vmul.f32 %v1609_v46, %v5163_v47  ;;  %v6416_v5 = vrot.slane %v5138_v37, 4 }
 0x18c   :  { %1698 = vrot.lane.b32.xlu1 %v1671_v52, %s4509_s6  ;;  %652 = vrot.lane.b32.xlu0 %v623_v54, %s4514_s27  ;;  %v1427_v54 = vpack.c.bf16 %v1417_v23, %v1416_v8  ;;  %v957_v8 = vrot.slane %v5114_v2, 4 }
 0x18d   :  { %v5258_v33 = vpop.permute.xlu2 %941 }
 0x18e   :  { %v637_v51 = vpop.permute.xlu1 %636  ;;  %v959_v23 = vrot.slane %v5258_v33, 4 }
 0x18f   :  { %v655_v11 = vrot.slane %v637_v51, 4 }
 0x191   :  { %v665_v18 = vsel %vm664_vm9, %v654_v16, %v655_v11  ;;  %v668_v24 = vsel %vm664_vm9, %v655_v11, %v656_v36 }
 0x192   :  { %v667_v52 = vsel %vm666_vm7, %v5077_v32, %v665_v18  ;;  %v669_v59 = vsel %vm666_vm7, %v637_v51, %v668_v24  ;;  %v1077_v51 = vmul.f32 %v5200_v50, %v1026_v9  ;;  %v1264_v50 = vpack.c.bf16 %v1253_v57, %v1252_v43 }
 0x193   :  { %690 = vst [vmem:[#allocation3] sm:$0xff] %v667_v52  ;;  %1453 = vrot.lane.b32.xlu2 %v1426_v28, %s4510_s23  ;;  %v1542_v43 = vrot.slane %v5091_v58, 4 }
 0x194   :  { %691 = vst [vmem:[#allocation3 + $0x8] sm:$0xff] %v669_v59  ;;  %736 = vrot.lane.b32.xlu1 %v707_v1, %s4516_s28  ;;  %1455 = vrot.lane.b32.xlu0 %v1427_v54, %s4510_s23  ;;  %v1087_v52 = vpack.c.bf16 %v1077_v51, %v1076_v38  ;;  %v612_v54 = vmul.f32 %v1026_v9, %v5102_v17  ;;  %v1297_v38 = vrot.slane %v5237_v13, 4 }
 0x195   :  { %v5278_v16 = vpop.permute.xlu2 %1287 }
 0x196   :  { %v940_v32 = vpop.permute.xlu1 %939  ;;  %v5282_v11 = vpop.permute.xlu0 %722 }
 0x197   :  { %v958_v1 = vrot.slane %v940_v32, 4  ;;  %v740_v18 = vrot.slane %v5282_v11, 4 }
 0x199   :  { %v967_v24 = vsel %vm664_vm9, %v957_v8, %v958_v1  ;;  %v970_v47 = vsel %vm664_vm9, %v958_v1, %v959_v23  ;;  %v751_v41 = vsel %vm664_vm9, %v6416_v5, %v740_v18  ;;  %v1196_v5 = vunpack.c.h.bf16 %v5191_v6 }
 0x19a   :  { %v969_v44 = vsel %vm968_vm8, %v5114_v2, %v967_v24  ;;  %v971_v46 = vsel %vm968_vm8, %v940_v32, %v970_v47  ;;  %v752_v28 = vsel %vm749_vm10, %v5138_v37, %v751_v41  ;;  %v611_v2 = vmul.f32 %v1025_v12, %v5098_v45 }
 0x19b   :  { %992 = vst [vmem:[#allocation3 + $0x80] sm:$0xff] %v969_v44  ;;  %1291 = vrot.lane.b32.xlu2 %v1264_v50, %s4513_s26  ;;  %v1254_v32 = vmul.f32 %v5250_v42, %v5166_v63  ;;  %v1511_v63 = vld [vmem:[#allocation2 + $0x4c] sm:$0xf]  ;;  %v914_v50 = vmul.f32 %v1025_v12, %v5132_v25  ;;  %v1247_v6 = vmul.f32 %v5151_v4, %v1196_v5 }
 0x19c   :  { %993 = vst [vmem:[#allocation3 + $0x88] sm:$0xff] %v971_v46  ;;  %1538 = vrot.lane.b32.xlu1 %v4987_v39, %s4517_s29  ;;  %1115 = vrot.lane.b32.xlu0 %v1087_v52, %s4512_s25  ;;  %v1255_v39 = vmul.f32 %v5253_v40, %v5170_v48  ;;  %v622_v1 = vpack.c.bf16 %v612_v54, %v611_v2  ;;  %v1459_v46 = vrot.slane %v5176_v3, 4  ;;  %v1506_v54 = vld [vmem:[#allocation2 + $0x24] sm:$0xf] }
 0x19d   :  { %774 = vst [vmem:[#allocation3 + $0x48] sm:$0xff] %v752_v28  ;;  %v5307_v59 = vpop.permute.xlu2 %1694  ;;  %v1704_v28 = vrot.slane %v5262_v30, 4 }
 0x19e   :  { %v5312_v37 = vpop.permute.xlu1 %1279  ;;  %v5314_v57 = vpop.permute.xlu0 %1524  ;;  %v1265_v47 = vpack.c.bf16 %v1255_v39, %v1254_v32 }
 0x19f   :  { %v1298_v51 = vrot.slane %v5312_v37, 4  ;;  %v1543_v45 = vrot.slane %v5314_v57, 4 }
 0x1a1   :  { %v1307_v17 = vsel %vm664_vm9, %v1297_v38, %v1298_v51  ;;  %v1552_v8 = vsel %vm664_vm9, %v1542_v43, %v1543_v45  ;;  %v1344_v43 = vld [vmem:[#allocation2 + $0x20] sm:$0xff]   ;;  %v1261_v38 = vpack.c.bf16 %v1247_v6, %v1247_v6 }
 0x1a2   :  { %v1309_v48 = vsel %vm1044_vm5, %v5237_v13, %v1307_v17  ;;  %v1554_v24 = vsel %vm1553_vm11, %v5091_v58, %v1552_v8  ;;  %v915_v13 = vmul.f32 %v1026_v9, %v5136_v10  ;;  %v1367_v9 = vunpack.c.h.bf16 %v5221_v29 }
 0x1a3   :  { %1332 = vst [vmem:[#allocation3 + $0x140] sm:$0xff] %v1309_v48  ;;  %650 = vrot.lane.b32.xlu2 %v622_v1, %s4514_s27  ;;  %v1358_v17 = vunpack.c.h.bf16 %v1344_v43  ;;  %v840_v8 = vunpack.c.l.bf16 %v1344_v43  ;;  %v5403_v43 = vld [vmem:[#allocation2 + $0x20] sm:$0xff]  }
 0x1a4   :  { %1577 = vst [vmem:[#allocation3 + $0x1c0] sm:$0xff] %v1554_v24  ;;  %1293 = vrot.lane.b32.xlu1 %v1265_v47, %s4513_s26  ;;  %1540 = vrot.lane.b32.xlu0 %v1511_v63, %s4517_s29  ;;  %v925_v12 = vpack.c.bf16 %v915_v13, %v914_v50  ;;  %v1418_v29 = vmul.f32 %v5210_v26, %v1367_v9  ;;  %v5369_v63 = vld [vmem:[#allocation2 + $0x48] sm:$0xff]   ;;  %v659_v13 = vrot.slane %v5054_v0, 4 }
 0x1a5   :  { %v5337_v41 = vpop.permute.xlu2 %732  ;;  %v1409_v5 = vmul.f32 %v5210_v26, %v1358_v17  ;;  %v1662_v50 = vmul.f32 %v5009_v49, %v5253_v40  ;;  %v6417_v49 = vrot.slane %v5212_v35, 4 }
 0x1a6   :  { %v5341_v44 = vpop.permute.xlu1 %1686  ;;  %v5343_v58 = vpop.permute.xlu0 %1441 }
 0x1a7   :  { %v1705_v52 = vrot.slane %v5341_v44, 4  ;;  %v1460_v2 = vrot.slane %v5343_v58, 4  ;;  %v1423_v9 = vpack.c.bf16 %v1409_v5, %v1409_v5  ;;  %v745_v5 = vrot.slane %v5337_v41, 4 }
 0x1a9   :  { %v1714_v25 = vsel %vm664_vm9, %v1704_v28, %v1705_v52  ;;  %v1469_v10 = vsel %vm664_vm9, %v1459_v46, %v1460_v2  ;;  %v1205_v46 = vunpack.c.h.bf16 %v5369_v63  ;;  %v907_v28 = vmul.f32 %v5110_v14, %v840_v8 }
 0x1aa   :  { %v1716_v32 = vsel %vm579_vm3, %v5262_v30, %v1714_v25  ;;  %v1471_v39 = vsel %vm882_vm4, %v5176_v3, %v1469_v10  ;;  %v1661_v30 = vmul.f32 %v4998_v31, %v5250_v42  ;;  %v1547_v3 = vrot.slane %v5244_v15, 4 }
 0x1ab   :  { %1739 = vst [vmem:[#allocation3 + $0x200] sm:$0xff] %v1716_v32  ;;  %1530 = vrot.lane.b32.xlu2 %v1506_v54, %s4517_s29  ;;  %v1428_v25 = vpack.c.bf16 %v1418_v29, %v1418_v29  ;;  %v1256_v32 = vmul.f32 %v5151_v4, %v1205_v46  ;;  %v921_v29 = vpack.c.bf16 %v907_v28, %v907_v28  ;;  %v1594_v4 = vld [vmem:[#allocation2 + $0x48] sm:$0xff]  }
 0x1ac   :  { %1494 = vst [vmem:[#allocation3 + $0x180] sm:$0xff] %v1471_v39  ;;  %953 = vrot.lane.b32.xlu1 %v925_v12, %s4511_s24  ;;  %1285 = vrot.lane.b32.xlu0 %v1261_v38, %s4513_s26  ;;  %v2614_v38 = vld [vmem:[#allocation1 + $0x1b] sm:$0xff]  ;;  %v1612_v46 = vunpack.c.h.bf16 %v1594_v4 }
 0x1ad   :  { %v5364_v1 = vpop.permute.xlu2 %1534 }
 0x1ae   :  { %v1548_v48 = vrot.slane %v5364_v1, 4  ;;  %v5373_v24 = vpop.permute.xlu1 %1103  ;;  %v5375_v47 = vpop.permute.xlu0 %646 }
 0x1af   :  { %v1121_v6 = vrot.slane %v5373_v24, 4  ;;  %v660_v31 = vrot.slane %v5375_v47, 4 }
 0x1b0   :  { %v1561_v42 = vsel %vm664_vm9, %v1547_v3, %v1548_v48  ;;  %v743_v3 = vrot.slane %v5157_v27, 4 }
 0x1b1   :  { %v1562_v26 = vsel %vm1553_vm11, %v5244_v15, %v1561_v42  ;;  %v1132_v40 = vsel %vm664_vm9, %v6417_v49, %v1121_v6  ;;  %v674_v54 = vsel %vm664_vm9, %v659_v13, %v660_v31  ;;  %v1672_v15 = vpack.c.bf16 %v1662_v50, %v1661_v30 }
 0x1b2   :  { %1581 = vst [vmem:[#allocation3 + $0x1e0] sm:$0xff] %v1562_v26  ;;  %v1133_v10 = vsel %vm1130_vm6, %v5212_v35, %v1132_v40  ;;  %v675_v12 = vsel %vm666_vm7, %v5054_v0, %v674_v54  ;;  %v2613_v35 = vld [vmem:[#allocation1 + $0x12] sm:$0xff]  ;;  %v962_v0 = vrot.slane %v5071_v22, 4  ;;  %v1018_v30 = vunpack.c.l.bf16 %v5403_v43 }
 0x1b3   :  { %1155 = vst [vmem:[#allocation3 + $0xc8] sm:$0xff] %v1133_v10  ;;  %1457 = vrot.lane.b32.xlu2 %v1428_v25, %s4510_s23  ;;  %v1266_v42 = vpack.c.bf16 %v1256_v32, %v1256_v32  ;;  %v2627_v26 = vshrl.u32 %v2613_v35, 16  ;;  %v2631_v49 = vshrl.u32 %v2614_v38, 16  ;;  %v3823_v25 = vld [vmem:[#allocation3 + $0x1c0] sm:$0xf] }
 0x1b4   :  { %694 = vst [vmem:[#allocation3 + $0x20] sm:$0xff] %v675_v12  ;;  %1447 = vrot.lane.b32.xlu1 %v1423_v9, %s4510_s23  ;;  %1700 = vrot.lane.b32.xlu0 %v1672_v15, %s4509_s6  ;;  %v1027_v9 = vunpack.c.l.bf16 %v5369_v63 }
 0x1b5   :  { %v5408_v39 = vpop.permute.xlu2 %1451  ;;  %v2632_v63 = vpack.i.b16 %v2631_v49, %v2631_v49 }
 0x1b6   :  { %v731_v17 = vpop.permute.xlu1 %730  ;;  %v5411_v8 = vpop.permute.xlu0 %949 }
 0x1b7   :  { %v744_v50 = vrot.slane %v731_v17, 4  ;;  %v963_v13 = vrot.slane %v5411_v8, 4 }
 0x1b9   :  { %v757_v40 = vsel %vm664_vm9, %v743_v3, %v744_v50  ;;  %v759_v28 = vsel %vm664_vm9, %v744_v50, %v745_v5  ;;  %v976_v54 = vsel %vm664_vm9, %v962_v0, %v963_v13  ;;  %v4089_v10 = vld [vmem:[#allocation3 + $0x1dc] sm:$0xf0]  ;;  %v3825_v12 = vld [vmem:[#allocation3 + $0x1e0] sm:$0xf0]  ;;  %v6418_v0 = vpack.c.bf16 %v5022_v34, %v5016_v7 }
 0x1ba   :  { %v758_v15 = vsel %vm749_vm10, %v5157_v27, %v757_v40  ;;  %v760_v32 = vsel %vm749_vm10, %v731_v17, %v759_v28  ;;  %v977_v35 = vsel %vm968_vm8, %v5071_v22, %v976_v54  ;;  %v3824_v38 = vor.u32 %v4089_v10, %v3823_v25  ;;  %v4085_v3 = vld [vmem:[#allocation3 + $0x1c4] sm:$0xf]  ;;  %v2611_v40 = vld [vmem:[#allocation1] sm:$0xff]  ;;  %v2612_v28 = vld [vmem:[#allocation1 + $0x9] sm:$0xff] }
 0x1bb   :  { %777 = vst [vmem:[#allocation3 + $0x60] sm:$0xff] %v758_v15  ;;  %1690 = vrot.lane.b32.xlu2 %v6418_v0, %s4509_s6  ;;  %v3828_v50 = vor.u32 %v4085_v3, %v3825_v12  ;;  %v2628_v27 = vpack.i.b16 %v2627_v26, %v2627_v26  ;;  %v1078_v17 = vmul.f32 %v5174_v19, %v1027_v9  ;;  %v849_v25 = vunpack.c.l.bf16 %v1594_v4 }
 0x1bc   :  { %778 = vst [vmem:[#allocation3 + $0x68] sm:$0xff] %v760_v32  ;;  %1295 = vrot.lane.b32.xlu1 %v1266_v42, %s4513_s26  ;;  %945 = vrot.lane.b32.xlu0 %v921_v29, %s4511_s24  ;;  %v1069_v34 = vmul.f32 %v5174_v19, %v1018_v30  ;;  %v1663_v42 = vmul.f32 %v4991_v20, %v1612_v46  ;;  %v1302_v29 = vrot.slane %v5278_v16, 4  ;;  %v1465_v26 = vrot.slane %v5408_v39, 4 }
 0x1bd   :  { %996 = vst [vmem:[#allocation3 + $0xa0] sm:$0xff] %v977_v35  ;;  %2195 = vmatpush.bf16.msra.mxu0 %v3824_v38  ;;  %2221 = vmatpush.bf16.msra.mxu2 %v3828_v50  ;;  %v5436_v22 = vpop.permute.xlu2 %1113  ;;  %v2630_v12 = vperm.slane %v2628_v27, 0  ;;  %v2634_v15 = vperm.slane %v2632_v63, 0  ;;  %v2619_v9 = vshrl.u32 %v2611_v40, 16  ;;  %v2623_v32 = vshrl.u32 %v2612_v28, 16 }
 0x1be   :  { %v1450_v54 = vpop.permute.xlu1 %1449  ;;  %v5439_v7 = vpop.permute.xlu0 %1289  ;;  %v1088_v30 = vpack.c.bf16 %v1078_v17, %v1078_v17  ;;  %v1603_v4 = vunpack.c.h.bf16 %v5403_v43  ;;  %v1083_v3 = vpack.c.bf16 %v1069_v34, %v1069_v34  ;;  %v1673_v0 = vpack.c.bf16 %v1663_v42, %v1663_v42 }
 0x1bf   :  { %v1464_v49 = vrot.slane %v1450_v54, 4  ;;  %v1303_v10 = vrot.slane %v5439_v7, 4  ;;  %v916_v50 = vmul.f32 %v5110_v14, %v849_v25  ;;  %v2662_v27 = vunpack.c.l.bf16 %v2630_v12 }
 0x1c0   :  { %v2663_v63 = vunpack.c.l.bf16 %v2634_v15  ;;  %v2620_v43 = vpack.i.b16 %v2619_v9, %v2619_v9  ;;  %v2624_v17 = vpack.i.b16 %v2623_v32, %v2623_v32  ;;  %v1709_v14 = vrot.slane %v5307_v59, 4 }
 0x1c1   :  { %v1478_v35 = vsel %vm664_vm9, %v1464_v49, %v1465_v26  ;;  %v1316_v19 = vsel %vm664_vm9, %v1302_v29, %v1303_v10  ;;  %v926_v29 = vpack.c.bf16 %v916_v50, %v916_v50 }
 0x1c2   :  { %v1479_v46 = vsel %vm882_vm4, %v1450_v54, %v1478_v35  ;;  %v1317_v38 = vsel %vm1044_vm5, %v5278_v16, %v1316_v19  ;;  %v1654_v16 = vmul.f32 %v4991_v20, %v1603_v4  ;;  %v5476_v20 = vpack.i.bf16 %v2663_v63, %v2662_v27  ;;  %v2615_v27 = vld [vmem:[#allocation1 + $0x24] sm:$0xff] }
 0x1c3   :  { %1498 = vst [vmem:[#allocation3 + $0x1a0] sm:$0xff] %v1479_v46  ;;  %1117 = vrot.lane.b32.xlu2 %v1088_v30, %s4512_s25  ;;  %v2622_v12 = vperm.slane %v2620_v43, 0  ;;  %v2626_v15 = vperm.slane %v2624_v17, 0  ;;  %v3791_v30 = vld [vmem:[#allocation3 + $0x180] sm:$0xf] }
 0x1c4   :  { %1336 = vst [vmem:[#allocation3 + $0x160] sm:$0xff] %v1317_v38  ;;  %1107 = vrot.lane.b32.xlu1 %v1083_v3, %s4512_s25  ;;  %1702 = vrot.lane.b32.xlu0 %v1673_v0, %s4509_s6  ;;  %v1668_v19 = vpack.c.bf16 %v1654_v16, %v1654_v16  ;;  %v2433_v3 = vpack.i.b16 %v4638_v55, %v4638_v55  ;;  %v1124_v55 = vrot.slane %v5202_v21, 4  ;;  %v3759_v17 = vld [vmem:[#allocation3 + $0x140] sm:$0xf]  ;;  %v2616_v16 = vld [vmem:[#allocation1 + $0x2d] sm:$0xff] }
 0x1c5   :  { %v5460_v40 = vpop.permute.xlu2 %951  ;;  %v2660_v63 = vunpack.c.l.bf16 %v2622_v12  ;;  %v2661_v43 = vunpack.c.l.bf16 %v2626_v15 }
 0x1c6   :  { %v6401_v28 = vrot.slane %v5460_v40, 4  ;;  %v5464_v54 = vpop.permute.xlu1 %1526  ;;  %v5466_v34 = vpop.permute.xlu0 %1696 }
 0x1c7   :  { %v1544_v42 = vrot.slane %v5464_v54, 4  ;;  %v6404_v25 = vrot.slane %v5466_v34, 4 }
 0x1c8   :  { %v978_v49 = vsel %vm664_vm9, %v963_v13, %v6401_v28  ;;  %v4077_v13 = vld [vmem:[#allocation3 + $0x184] sm:$0xf] }
 0x1c9   :  { %v979_v9 = vsel %vm968_vm8, %v5411_v8, %v978_v49  ;;  %v1555_v32 = vsel %vm664_vm9, %v1543_v45, %v1544_v42  ;;  %v1723_v35 = vsel %vm664_vm9, %v1709_v14, %v6404_v25  ;;  %v2436_v45 = vpack.i.b16 %v4640_v56, %v4640_v56 }
 0x1ca   :  { %997 = vst [vmem:[#allocation3 + $0xa8] sm:$0xff] %v979_v9  ;;  %v1556_v4 = vsel %vm1553_vm11, %v5314_v57, %v1555_v32  ;;  %v1724_v8 = vsel %vm579_vm3, %v5307_v59, %v1723_v35  ;;  %v4081_v46 = vld [vmem:[#allocation3 + $0x19c] sm:$0xf0]  ;;  %v3793_v38 = vld [vmem:[#allocation3 + $0x1a0] sm:$0xf0]  ;;  %v6403_v14 = vrot.slane %v5436_v22, 4 }
 0x1cb   :  { %1578 = vst [vmem:[#allocation3 + $0x1c8] sm:$0xff] %v1556_v4  ;;  %1692 = vrot.lane.b32.xlu2 %v1668_v19, %s4509_s6  ;;  %v3792_v0 = vor.u32 %v4081_v46, %v3791_v30  ;;  %v3796_v50 = vor.u32 %v4077_v13, %v3793_v38  ;;  %v4073_v59 = vld [vmem:[#allocation3 + $0x15c] sm:$0xf0]  ;;  %v3761_v57 = vld [vmem:[#allocation3 + $0x160] sm:$0xf0]  ;;  %v2435_v32 = vperm.slane %v2433_v3, 0  ;;  %v5507_v46 = vpack.i.bf16 %v2661_v43, %v2660_v63 }
 0x1cc   :  { %1743 = vst [vmem:[#allocation3 + $0x220] sm:$0xff] %v1724_v8  ;;  %955 = vrot.lane.b32.xlu1 %v926_v29, %s4511_s24  ;;  %4281 = vrot.lane.b32.xlu0 %v5476_v20, %s4514_s27  ;;  %v4069_v29 = vld [vmem:[#allocation3 + $0x144] sm:$0xf]  ;;  %v2438_v35 = vperm.slane %v2436_v45, 0  ;;  %v2635_v19 = vshrl.u32 %v2615_v27, 16  ;;  %v3760_v15 = vor.u32 %v4073_v59, %v3759_v17  ;;  %v2639_v38 = vshrl.u32 %v2616_v16, 16 }
 0x1cd   :  { %2196 = vmatpush.bf16.msra.mxu0 %v3792_v0  ;;  %2222 = vmatpush.bf16.msra.mxu2 %v3796_v50  ;;  %v5501_v56 = vpop.permute.xlu2 %726  ;;  %v3764_v13 = vor.u32 %v4069_v29, %v3761_v57  ;;  %v4065_v4 = vld [vmem:[#allocation3 + $0x11c] sm:$0xf0]  ;;  %v3729_v8 = vld [vmem:[#allocation3 + $0x120] sm:$0xf0]  ;;  %v5512_v0 = vld [vmem:[%s6387_s2] sm:$0xff]  ;;  %v2466_v28 = vunpack.c.l.bf16 %v2435_v32 }
 0x1ce   :  { %v1112_v49 = vpop.permute.xlu1 %1111  ;;  %v5504_v9 = vpop.permute.xlu0 %1688  ;;  %v1820_v27 = vld [vmem:[%s6388_s3] sm:$0xff]  ;;  %v3727_v59 = vld [vmem:[#allocation3 + $0x100] sm:$0xf]  ;;  %v1828_v57 = vunpack.c.h.b16 %v5512_v0  ;;  %v4061_v16 = vld [vmem:[#allocation3 + $0x104] sm:$0xf] }
 0x1cf   :  { %v1125_v30 = vrot.slane %v1112_v49, 4  ;;  %v6402_v12 = vrot.slane %v5504_v9, 4  ;;  %v3728_v17 = vor.u32 %v4065_v4, %v3727_v59  ;;  %v4093_v29 = vld [vmem:[#allocation3 + $0x204] sm:$0xf] }
 0x1d0   :  { %v5536_v4 = vpack.c.b16 %v1828_v57, %v1828_v57  ;;  %v4053_v57 = vld [vmem:[#allocation3 + $0xc4] sm:$0xf] }
 0x1d1   :  { %v1138_v50 = vsel %vm664_vm9, %v1124_v55, %v1125_v30  ;;  %v1140_v3 = vsel %vm664_vm9, %v1125_v30, %v6403_v14  ;;  %v1717_v45 = vsel %vm664_vm9, %v1705_v52, %v6402_v12  ;;  %2197 = vmatpush.bf16.msra.mxu0 %v3760_v15  ;;  %2223 = vmatpush.bf16.msra.mxu2 %v3764_v13  ;;  %v3855_v52 = vld [vmem:[#allocation3 + $0x200] sm:$0xf]  ;;  %v2467_v12 = vunpack.c.l.bf16 %v2438_v35 }
 0x1d2   :  { %v1139_v63 = vsel %vm1130_vm6, %v5202_v21, %v1138_v50  ;;  %v1141_v43 = vsel %vm1130_vm6, %v1112_v49, %v1140_v3  ;;  %v1718_v55 = vsel %vm579_vm3, %v5341_v44, %v1717_v45  ;;  %v3732_v30 = vor.u32 %v4061_v16, %v3729_v8 }
 0x1d3   :  { %1158 = vst [vmem:[#allocation3 + $0xe0] sm:$0xff] %v1139_v63  ;;  %v4097_v15 = vld [vmem:[#allocation3 + $0x21c] sm:$0xf0]  ;;  %v3857_v13 = vld [vmem:[#allocation3 + $0x220] sm:$0xf0]  ;;  %v2636_v14 = vpack.i.b16 %v2635_v19, %v2635_v19  ;;  %v2640_v49 = vpack.i.b16 %v2639_v38, %v2639_v38  ;;  %v5545_v38 = vpack.i.bf16 %v2467_v12, %v2466_v28  ;;  %4276 = vrot.lane.b32.xlu2 %v5507_v46, %s4514_s27 }
 0x1d4   :  { %1159 = vst [vmem:[#allocation3 + $0xe8] sm:$0xff] %v1141_v43  ;;  %1823 = vperm.xlu1 %4274, %v1820_v27   ;;  %v3856_v25 = vor.u32 %v4097_v15, %v3855_v52  ;;  %v3860_v21 = vor.u32 %v4093_v29, %v3857_v13  ;;  %4296 = vrot.lane.b32.xlu0 %v5507_v46, %s4512_s25  ;;  %v3695_v12 = vld [vmem:[#allocation3 + $0xc0] sm:$0xf] }
 0x1d5   :  { %1740 = vst [vmem:[#allocation3 + $0x208] sm:$0xff] %v1718_v55  ;;  %2198 = vmatpush.bf16.msra.mxu0 %v3728_v17  ;;  %2224 = vmatpush.bf16.msra.mxu2 %v3732_v30  ;;  %v5534_v44 = vpop.permute.xlu2 %1536  ;;  %v2638_v45 = vperm.slane %v2636_v14, 0  ;;  %v2642_v27 = vperm.slane %v2640_v49, 0  ;;  %v4049_v43 = vld [vmem:[#allocation3 + $0x9c] sm:$0xf0] }
 0x1d6   :  { %v1549_v8 = vrot.slane %v5534_v44, 4  ;;  %v5539_v32 = vpop.permute.xlu1 %648  ;;  %2215 = vmatpush.bf16.msra.mxu1 %v3856_v25  ;;  %2241 = vmatpush.bf16.msra.mxu3 %v3860_v21  ;;  %v5541_v35 = vpop.permute.xlu0 %1528  ;;  %v3665_v55 = vld [vmem:[#allocation3 + $0xa0] sm:$0xf0]  ;;  %v3663_v29 = vld [vmem:[#allocation3 + $0x80] sm:$0xf] }
 0x1d7   :  { %v661_v19 = vrot.slane %v5539_v32, 4  ;;  %v1545_v50 = vrot.slane %v5541_v35, 4  ;;  %v2664_v17 = vunpack.c.l.bf16 %v2638_v45  ;;  %v2665_v16 = vunpack.c.l.bf16 %v2642_v27  ;;  %v4045_v30 = vld [vmem:[#allocation3 + $0x84] sm:$0xf] }
 0x1d8   :  { %v1563_v3 = vsel %vm664_vm9, %v1548_v48, %v1549_v8  ;;  %v3664_v49 = vor.u32 %v4049_v43, %v3663_v29  ;;  %v742_v45 = vrot.slane %v5501_v56, 4 }
 0x1d9   :  { %v1564_v25 = vsel %vm1553_vm11, %v5364_v1, %v1563_v3  ;;  %v676_v59 = vsel %vm664_vm9, %v660_v31, %v661_v19  ;;  %v1557_v28 = vsel %vm664_vm9, %v1544_v42, %v1545_v50  ;;  %3886 = vmatmul.msk.bf16.vlgmr.msra.gmra.mxu3 %vm299_vm2, %v5536_v4  ;;  %3885 = vmatmul.msk.bf16.vlgmr.msra.gmra.mxu1 %vm299_vm2, %v5536_v4 }
 0x1da   :  { %1582 = vst [vmem:[#allocation3 + $0x1e8] sm:$0xff] %v1564_v25  ;;  %v677_v1 = vsel %vm666_vm7, %v5375_v47, %v676_v59  ;;  %v1558_v48 = vsel %vm1553_vm11, %v5464_v54, %v1557_v28  ;;  %v4057_v31 = vld [vmem:[#allocation3 + $0xdc] sm:$0xf0]  ;;  %v3697_v14 = vld [vmem:[#allocation3 + $0xe0] sm:$0xf0]  ;;  %v2445_v47 = vpack.i.b16 %v4648_v60, %v4648_v60  ;;  %v2448_v54 = vpack.i.b16 %v4650_v61, %v4650_v61 }
 0x1db   :  { %695 = vst [vmem:[#allocation3 + $0x28] sm:$0xff] %v677_v1  ;;  %v3696_v63 = vor.u32 %v4057_v31, %v3695_v12  ;;  %v3700_v42 = vor.u32 %v4053_v57, %v3697_v14  ;;  %v3668_v3 = vor.u32 %v4045_v30, %v3665_v55  ;;  %v4041_v25 = vld [vmem:[#allocation3 + $0x5c] sm:$0xf0]  ;;  %v5592_v59 = vpack.i.bf16 %v2665_v16, %v2664_v17  ;;  %v4037_v55 = vld [vmem:[#allocation3 + $0x44] sm:$0xf] }
 0x1dc   :  { %1579 = vst [vmem:[#allocation3 + $0x1d0] sm:$0xff] %v1558_v48  ;;  %4286 = vrot.lane.b32.xlu1 %v5545_v38, %s4511_s24  ;;  %4311 = vrot.lane.b32.xlu0 %v5476_v20, %s4510_s23  ;;  %v2447_v28 = vperm.slane %v2445_v47, 0  ;;  %v2450_v12 = vperm.slane %v2448_v54, 0  ;;  %v3633_v48 = vld [vmem:[#allocation3 + $0x60] sm:$0xf0]  ;;  %v1827_v47 = vunpack.c.l.b16 %v5512_v0 }
 0x1dd   :  { %2199 = vmatpush.bf16.msra.mxu0 %v3696_v63  ;;  %2225 = vmatpush.bf16.msra.mxu2 %v3700_v42  ;;  %v5580_v52 = vpop.permute.xlu2 %1105  ;;  %v3631_v63 = vld [vmem:[#allocation3 + $0x40] sm:$0xf]  ;;  %v3831_v42 = vld [vmem:[#allocation3 + $0x1c8] sm:$0xf]  ;;  %v3601_v16 = vld [vmem:[#allocation3 + $0x20] sm:$0xf0] }
 0x1de   :  { %v1122_v15 = vrot.slane %v5580_v52, 4  ;;  %v725_v13 = vpop.permute.xlu1 %724  ;;  %v5583_v21 = vpop.permute.xlu0 %640  ;;  %v3632_v43 = vor.u32 %v4041_v25, %v3631_v63  ;;  %v2471_v54 = vunpack.c.l.bf16 %v2450_v12  ;;  %v6420_v63 = vld [vmem:[#allocation16_spill] sm:$0xff] }
 0x1df   :  { %v741_v27 = vrot.slane %v725_v13, 4  ;;  %v657_v60 = vrot.slane %v5583_v21, 4 }
 0x1e0   :  { %v1134_v61 = vsel %vm664_vm9, %v1121_v6, %v1122_v15 }
 0x1e1   :  { %v1135_v57 = vsel %vm1130_vm6, %v5373_v24, %v1134_v61  ;;  %v753_v56 = vsel %vm664_vm9, %v740_v18, %v741_v27  ;;  %v755_v1 = vsel %vm664_vm9, %v741_v27, %v742_v45  ;;  %v670_v6 = vsel %vm664_vm9, %v656_v36, %v657_v60  ;;  %2200 = vmatpush.bf16.msra.mxu0 %v3664_v49  ;;  %v4090_v31 = vld [vmem:[#allocation3 + $0x1e4] sm:$0xf0]  ;;  %v3833_v30 = vld [vmem:[#allocation3 + $0x1e8] sm:$0xf0]  ;;  %v4029_v45 = vld [vmem:[#allocation3 + $0x4] sm:$0xf] }
 0x1e2   :  { %1156 = vst [vmem:[#allocation3 + $0xd0] sm:$0xff] %v1135_v57  ;;  %v754_v14 = vsel %vm749_vm10, %v5282_v11, %v753_v56  ;;  %v756_v24 = vsel %vm749_vm10, %v725_v13, %v755_v1  ;;  %v671_v18 = vsel %vm666_vm7, %v5240_v53, %v670_v6  ;;  %2226 = vmatpush.bf16.msra.mxu2 %v3668_v3  ;;  %v4033_v11 = vld [vmem:[#allocation3 + $0x1c] sm:$0xf0]  ;;  %v2470_v53 = vunpack.c.l.bf16 %v2447_v28  ;;  %v4086_v28 = vld [vmem:[#allocation3 + $0x1cc] sm:$0xf] }
 0x1e3   :  { %775 = vst [vmem:[#allocation3 + $0x50] sm:$0xff] %v754_v14  ;;  %v3832_v17 = vor.u32 %v4090_v31, %v3831_v42  ;;  %v3636_v36 = vor.u32 %v4037_v55, %v3633_v48  ;;  %v3599_v3 = vld [vmem:[#allocation3] sm:$0xf]  ;;  %v3604_v25 = vor.u32 %v4029_v45, %v3601_v16  ;;  %v3836_v12 = vor.u32 %v4086_v28, %v3833_v30 }
 0x1e4   :  { %776 = vst [vmem:[#allocation3 + $0x58] sm:$0xff] %v756_v24  ;;  %4301 = vrot.lane.b32.xlu1 %v5476_v20, %s4512_s25  ;;  %4326 = vrot.lane.b32.xlu0 %v5592_v59, %s4514_s27  ;;  %v3600_v0 = vor.u32 %v4033_v11, %v3599_v3  ;;  %v5621_v57 = vpack.c.b16 %v1827_v47, %v1827_v47 }
 0x1e5   :  { %692 = vst [vmem:[#allocation3 + $0x10] sm:$0xff] %v671_v18  ;;  %2201 = vmatpush.bf16.msra.mxu0 %v3632_v43  ;;  %2247 = vmatpush.bf16.msrb.mxu1 %v3832_v17  ;;  %v5615_v29 = vpop.permute.xlu2 %1445  ;;  %v5623_v56 = vpack.i.bf16 %v2471_v54, %v2470_v53  ;;  %v2451_v31 = vpack.i.b16 %v4652_v62, %v4652_v62  ;;  %v2618_v18 = vld [vmem:[#allocation1 + $0x3f] sm:$0xff] }
 0x1e6   :  { %2227 = vmatpush.bf16.msra.mxu2 %v3636_v36  ;;  %v1462_v13 = vrot.slane %v5615_v29, 4  ;;  %v1444_v20 = vpop.permute.xlu1 %1443  ;;  %v5618_v49 = vpop.permute.xlu0 %943  ;;  %v2439_v42 = vpack.i.b16 %v6420_v63, %v6420_v63  ;;  %v6421_v43 = vld [vmem:[#allocation17_spill] sm:$0xff] }
 0x1e7   :  { %v1461_v27 = vrot.slane %v1444_v20, 4  ;;  %v960_v61 = vrot.slane %v5618_v49, 4  ;;  %v2442_v55 = vpack.i.b16 %v6421_v43, %v6421_v43  ;;  %v2453_v16 = vperm.slane %v2451_v31, 0 }
 0x1e8   :  { %v2441_v54 = vperm.slane %v2439_v42, 0 }
 0x1e9   :  { %v1472_v1 = vsel %vm664_vm9, %v1460_v2, %v1461_v27  ;;  %v1474_v6 = vsel %vm664_vm9, %v1461_v27, %v1462_v13  ;;  %v972_v48 = vsel %vm664_vm9, %v959_v23, %v960_v61  ;;  %2202 = vmatpush.bf16.msra.mxu0 %v3600_v0  ;;  %v6419_v23 = vld [vmem:[#allocation18_spill] sm:$0xff]  ;;  %v2444_v30 = vperm.slane %v2442_v55, 0 }
 0x1ea   :  { %v1473_v14 = vsel %vm882_vm4, %v5343_v58, %v1472_v1  ;;  %v1475_v24 = vsel %vm882_vm4, %v1444_v20, %v1474_v6  ;;  %v973_v2 = vsel %vm968_vm8, %v5258_v33, %v972_v48  ;;  %2228 = vmatpush.bf16.msra.mxu2 %v3604_v25  ;;  %v2454_v62 = vpack.i.b16 %v6419_v23, %v6419_v23  ;;  %v2617_v33 = vld [vmem:[#allocation1 + $0x36] sm:$0xff] }
 0x1eb   :  { %1495 = vst [vmem:[#allocation3 + $0x188] sm:$0xff] %v1473_v14  ;;  %v2643_v45 = vshrl.u32 %v2617_v33, 16  ;;  %v2647_v27 = vshrl.u32 %v2618_v18, 16  ;;  %v2469_v6 = vunpack.c.l.bf16 %v2444_v30  ;;  %v2472_v14 = vunpack.c.l.bf16 %v2453_v16 }
 0x1ec   :  { %1496 = vst [vmem:[#allocation3 + $0x190] sm:$0xff] %v1475_v24  ;;  %4316 = vrot.lane.b32.xlu1 %v5545_v38, %s4513_s26  ;;  %4341 = vrot.lane.b32.xlu0 %v5623_v56, %s4511_s24  ;;  %v2456_v3 = vperm.slane %v2454_v62, 0 }
 0x1ed   :  { %2273 = vmatpush.bf16.msrb.mxu0 %v3836_v12  ;;  %994 = vst [vmem:[#allocation3 + $0x90] sm:$0xff] %v973_v2  ;;  %2229 = vmatmul.bf16.vlgmr.msra.gmra.mxu2 %v5621_v57  ;;  %v5650_v58 = vpop.permute.xlu2 %1453  ;;  %v2468_v12 = vunpack.c.l.bf16 %v2441_v54 }
 0x1ee   :  { %2203 = vmatmul.bf16.vlgmr.msra.gmra.mxu0 %v5621_v57  ;;  %v1466_v17 = vrot.slane %v5650_v58, 4  ;;  %v1282_v36 = vpop.permute.xlu1 %1281  ;;  %v5658_v11 = vpop.permute.xlu0 %1283  ;;  %v2473_v24 = vunpack.c.l.bf16 %v2456_v3 }
 0x1ef   :  { %v1299_v47 = vrot.slane %v1282_v36, 4  ;;  %v1300_v53 = vrot.slane %v5658_v11, 4  ;;  %v5683_v48 = vpack.i.bf16 %v2469_v6, %v2468_v12  ;;  %v6422_v6 = vrot.slane %v5466_v34, 4 }
 0x1f0   :  { %v1480_v20 = vsel %vm664_vm9, %v1465_v26, %v1466_v17 }
 0x1f1   :  { %v1481_v0 = vsel %vm882_vm4, %v5408_v39, %v1480_v20  ;;  %v1310_v25 = vsel %vm664_vm9, %v1298_v51, %v1299_v47  ;;  %v1312_v28 = vsel %vm664_vm9, %v1299_v47, %v1300_v53  ;;  %v2644_v51 = vpack.i.b16 %v2643_v45, %v2643_v45  ;;  %4291 = vrot.lane.b32.xlu2 %v5683_v48, %s4511_s24 }
 0x1f2   :  { %1499 = vst [vmem:[#allocation3 + $0x1a8] sm:$0xff] %v1481_v0  ;;  %v1311_v1 = vsel %vm1044_vm5, %v5312_v37, %v1310_v25  ;;  %v1313_v26 = vsel %vm1044_vm5, %v1282_v36, %v1312_v28  ;;  %v2648_v39 = vpack.i.b16 %v2647_v27, %v2647_v27  ;;  %v3799_v18 = vld [vmem:[#allocation3 + $0x188] sm:$0xf]  ;;  %v4078_v47 = vld [vmem:[#allocation3 + $0x18c] sm:$0xf] }
 0x1f3   :  { %1333 = vst [vmem:[#allocation3 + $0x148] sm:$0xff] %v1311_v1  ;;  %v2646_v63 = vperm.slane %v2644_v51, 0 }
 0x1f4   :  { %1334 = vst [vmem:[#allocation3 + $0x150] sm:$0xff] %v1313_v26  ;;  %4331 = vrot.lane.b32.xlu1 %v5545_v38, %s4509_s6  ;;  %4356 = vrot.lane.b32.xlu0 %v5623_v56, %s4513_s26  ;;  %v2650_v42 = vperm.slane %v2648_v39, 0 }
 0x1f5   :  { %v5685_v31 = vpop.permute.xlu2 %1291 }
 0x1f6   :  { %v1304_v37 = vrot.slane %v5685_v31, 4  ;;  %v643_v2 = vpop.permute.xlu1 %642  ;;  %v5688_v23 = vpop.permute.xlu0 %734  ;;  %v2667_v3 = vunpack.c.l.bf16 %v2650_v42  ;;  %v3735_v42 = vld [vmem:[#allocation3 + $0x108] sm:$0xf] }
 0x1f7   :  { %v658_v38 = vrot.slane %v643_v2, 4  ;;  %v746_v62 = vrot.slane %v5688_v23, 4 }
 0x1f8   :  { %v1318_v33 = vsel %vm664_vm9, %v1303_v10, %v1304_v37  ;;  %v5708_v10 = vpack.i.bf16 %v2473_v24, %v2472_v14 }
 0x1f9   :  { %v1319_v43 = vsel %vm1044_vm5, %v5439_v7, %v1318_v33  ;;  %v672_v55 = vsel %vm664_vm9, %v657_v60, %v658_v38  ;;  %v761_v36 = vsel %vm664_vm9, %v745_v5, %v746_v62  ;;  %v4082_v16 = vld [vmem:[#allocation3 + $0x1a4] sm:$0xf0]  ;;  %v3801_v54 = vld [vmem:[#allocation3 + $0x1a8] sm:$0xf0]  ;;  %v2666_v5 = vunpack.c.l.bf16 %v2646_v63  ;;  %4306 = vrot.lane.b32.xlu2 %v5507_v46, %s4510_s23 }
 0x1fa   :  { %1337 = vst [vmem:[#allocation3 + $0x168] sm:$0xff] %v1319_v43  ;;  %v673_v30 = vsel %vm666_vm7, %v5583_v21, %v672_v55  ;;  %v762_v7 = vsel %vm749_vm10, %v5337_v41, %v761_v36  ;;  %v3800_v20 = vor.u32 %v4082_v16, %v3799_v18  ;;  %v3804_v60 = vor.u32 %v4078_v47, %v3801_v54  ;;  %v3767_v1 = vld [vmem:[#allocation3 + $0x148] sm:$0xf]  ;;  %v4070_v14 = vld [vmem:[#allocation3 + $0x14c] sm:$0xf] }
 0x1fb   :  { %693 = vst [vmem:[#allocation3 + $0x18] sm:$0xff] %v673_v30  ;;  %v5726_v12 = vpack.i.bf16 %v2667_v3, %v2666_v5  ;;  %v3737_v18 = vld [vmem:[#allocation3 + $0x128] sm:$0xf0] }
 0x1fc   :  { %779 = vst [vmem:[#allocation3 + $0x70] sm:$0xff] %v762_v7  ;;  %4346 = vrot.lane.b32.xlu1 %v5592_v59, %s4512_s25  ;;  %2248 = vmatpush.bf16.msrb.mxu1 %v3800_v20  ;;  %v4058_v7 = vld [vmem:[#allocation3 + $0xe4] sm:$0xf0]  ;;  %v3705_v5 = vld [vmem:[#allocation3 + $0xe8] sm:$0xf0] }
 0x1fd   :  { %2274 = vmatpush.bf16.msrb.mxu0 %v3804_v60  ;;  %v651_v45 = vpop.permute.xlu2 %650  ;;  %4371 = vrot.lane.b32.xlu0 %v5708_v10, %s4511_s24  ;;  %v3703_v60 = vld [vmem:[#allocation3 + $0xc8] sm:$0xf] }
 0x1fe   :  { %v662_v27 = vrot.slane %v651_v45, 4  ;;  %v5718_v21 = vpop.permute.xlu1 %1698  ;;  %v653_v0 = vpop.permute.xlu0 %652 }
 0x1ff   :  { %v1711_v41 = vrot.slane %v5718_v21, 4  ;;  %v663_v25 = vrot.slane %v653_v0, 4  ;;  %v3863_v0 = vld [vmem:[#allocation3 + $0x208] sm:$0xf] }
 0x200   :  { %v678_v28 = vsel %vm664_vm9, %v661_v19, %v662_v27 }
 0x201   :  { %v679_v26 = vsel %vm666_vm7, %v5539_v32, %v678_v28  ;;  %v1725_v51 = vsel %vm664_vm9, %v6422_v6, %v1711_v41  ;;  %v680_v46 = vsel %vm664_vm9, %v662_v27, %v663_v25  ;;  %v4074_v39 = vld [vmem:[#allocation3 + $0x164] sm:$0xf0]  ;;  %v3769_v24 = vld [vmem:[#allocation3 + $0x168] sm:$0xf0]  ;;  %4321 = vrot.lane.b32.xlu2 %v5683_v48, %s4513_s26 }
 0x202   :  { %696 = vst [vmem:[#allocation3 + $0x30] sm:$0xff] %v679_v26  ;;  %v1726_v19 = vsel %vm579_vm3, %v5466_v34, %v1725_v51  ;;  %v681_v2 = vsel %vm666_vm7, %v651_v45, %v680_v46  ;;  %v3768_v38 = vor.u32 %v4074_v39, %v3767_v1  ;;  %v3772_v33 = vor.u32 %v4070_v14, %v3769_v24  ;;  %v4066_v32 = vld [vmem:[#allocation3 + $0x124] sm:$0xf0]  ;;  %v4062_v34 = vld [vmem:[#allocation3 + $0x10c] sm:$0xf] }
 0x203   :  { %1744 = vst [vmem:[#allocation3 + $0x228] sm:$0xff] %v1726_v19  ;;  %v3736_v16 = vor.u32 %v4066_v32, %v3735_v42  ;;  %v3740_v30 = vor.u32 %v4062_v34, %v3737_v18  ;;  %v4054_v25 = vld [vmem:[#allocation3 + $0xcc] sm:$0xf]  ;;  %v4050_v39 = vld [vmem:[#allocation3 + $0xa4] sm:$0xf0] }
 0x204   :  { %697 = vst [vmem:[#allocation3 + $0x38] sm:$0xff] %v681_v2  ;;  %4361 = vrot.lane.b32.xlu1 %v5726_v12, %s4514_s27  ;;  %2249 = vmatpush.bf16.msrb.mxu1 %v3768_v38  ;;  %v4094_v28 = vld [vmem:[#allocation3 + $0x20c] sm:$0xf]  ;;  %v3708_v51 = vor.u32 %v4054_v25, %v3705_v5  ;;  %v3671_v14 = vld [vmem:[#allocation3 + $0x88] sm:$0xf] }
 0x205   :  { %2275 = vmatpush.bf16.msrb.mxu0 %v3772_v33  ;;  %v1531_v63 = vpop.permute.xlu2 %1530  ;;  %v3672_v2 = vor.u32 %v4050_v39, %v3671_v14  ;;  %v4046_v38 = vld [vmem:[#allocation3 + $0x8c] sm:$0xf]  ;;  %4391 = vrot.lane.b32.xlu0 %v5708_v10, %s4509_s6 }
 0x206   :  { %v1546_v43 = vrot.slane %v1531_v63, 4  ;;  %v737_v55 = vpop.permute.xlu1 %736  ;;  %v1456_v36 = vpop.permute.xlu0 %1455  ;;  %v4042_v63 = vld [vmem:[#allocation3 + $0x64] sm:$0xf0]  ;;  %v4030_v25 = vld [vmem:[#allocation3 + $0xc] sm:$0xf] }
 0x207   :  { %v747_v47 = vrot.slane %v737_v55, 4  ;;  %v1467_v54 = vrot.slane %v1456_v36, 4 }
 0x208   :  { %v1559_v20 = vsel %vm664_vm9, %v1545_v50, %v1546_v43  ;;  %2250 = vmatpush.bf16.msrb.mxu1 %v3736_v16  ;;  %v3641_v43 = vld [vmem:[#allocation3 + $0x68] sm:$0xf0] }
 0x209   :  { %v1560_v3 = vsel %vm1553_vm11, %v5541_v35, %v1559_v20  ;;  %v763_v45 = vsel %vm664_vm9, %v746_v62, %v747_v47  ;;  %v1482_v27 = vsel %vm664_vm9, %v1466_v17, %v1467_v54  ;;  %2276 = vmatpush.bf16.msrb.mxu0 %v3740_v30  ;;  %v3704_v35 = vor.u32 %v4058_v7, %v3703_v60  ;;  %v3673_v17 = vld [vmem:[#allocation3 + $0xa8] sm:$0xf0]  ;;  %v3639_v47 = vld [vmem:[#allocation3 + $0x48] sm:$0xf] }
 0x20a   :  { %1580 = vst [vmem:[#allocation3 + $0x1d8] sm:$0xff] %v1560_v3  ;;  %v764_v50 = vsel %vm749_vm10, %v5688_v23, %v763_v45  ;;  %v1483_v1 = vsel %vm882_vm4, %v5650_v58, %v1482_v27  ;;  %v4098_v26 = vld [vmem:[#allocation3 + $0x224] sm:$0xf0]  ;;  %v3865_v6 = vld [vmem:[#allocation3 + $0x228] sm:$0xf0]  ;;  %4336 = vrot.lane.b32.xlu2 %v5683_v48, %s4509_s6  ;;  %v3676_v18 = vor.u32 %v4046_v38, %v3673_v17  ;;  %v6423_v48 = vrot.slane %v5436_v22, 4 }
 0x20b   :  { %780 = vst [vmem:[#allocation3 + $0x78] sm:$0xff] %v764_v50  ;;  %v3864_v62 = vor.u32 %v4098_v26, %v3863_v0  ;;  %v3868_v46 = vor.u32 %v4094_v28, %v3865_v6  ;;  %v3640_v30 = vor.u32 %v4042_v63, %v3639_v47  ;;  %v4034_v20 = vld [vmem:[#allocation3 + $0x24] sm:$0xf0]  ;;  %v3609_v60 = vld [vmem:[#allocation3 + $0x28] sm:$0xf0] }
 0x20c   :  { %1500 = vst [vmem:[#allocation3 + $0x1b0] sm:$0xff] %v1483_v1  ;;  %2251 = vmatpush.bf16.msrb.mxu1 %v3704_v35  ;;  %4376 = vrot.lane.b32.xlu1 %v5726_v12, %s4512_s25  ;;  %v3607_v3 = vld [vmem:[#allocation3 + $0x8] sm:$0xf]  ;;  %v3612_v50 = vor.u32 %v4030_v25, %v3609_v60  ;;  %v6424_v1 = vrot.slane %v5504_v9, 4 }
 0x20d   :  { %2267 = vmatpush.bf16.msrb.mxu3 %v3864_v62  ;;  %2277 = vmatpush.bf16.msrb.mxu0 %v3708_v51  ;;  %v1458_v23 = vpop.permute.xlu2 %1457  ;;  %v3608_v0 = vor.u32 %v4034_v20, %v3607_v3  ;;  %v3839_v62 = vld [vmem:[#allocation3 + $0x1d0] sm:$0xf]  ;;  %v4087_v51 = vld [vmem:[#allocation3 + $0x1d4] sm:$0xf] }
 0x20e   :  { %2293 = vmatpush.bf16.msrb.mxu2 %v3868_v46  ;;  %v1468_v58 = vrot.slane %v1458_v23, 4  ;;  %v1539_v24 = vpop.permute.xlu1 %1538  ;;  %v5760_v19 = vpop.permute.xlu0 %1115  ;;  %v4067_v3 = vld [vmem:[#allocation3 + $0x12c] sm:$0xf0] }
 0x20f   :  { %v1550_v33 = vrot.slane %v1539_v24, 4  ;;  %v1127_v32 = vrot.slane %v5760_v19, 4 }
 0x210   :  { %v1484_v42 = vsel %vm664_vm9, %v1467_v54, %v1468_v58  ;;  %2252 = vmatpush.bf16.msrb.mxu1 %v3672_v2  ;;  %3887 = vmatmul.msk.bf16.vlgmr.msrb.gmra.mxu3 %vm299_vm2, %v5536_v4 }
 0x211   :  { %v1485_v55 = vsel %vm882_vm4, %v1456_v36, %v1484_v42  ;;  %v1565_v16 = vsel %vm664_vm9, %v1549_v8, %v1550_v33  ;;  %v1142_v34 = vsel %vm664_vm9, %v6423_v48, %v1127_v32  ;;  %2278 = vmatpush.bf16.msrb.mxu0 %v3676_v18  ;;  %3888 = vmatmul.msk.bf16.vlgmr.msrb.gmra.mxu2 %vm299_vm2, %v5536_v4  ;;  %v4038_v8 = vld [vmem:[#allocation3 + $0x4c] sm:$0xf]  ;;  %v4079_v18 = vld [vmem:[#allocation3 + $0x194] sm:$0xf] }
 0x212   :  { %1501 = vst [vmem:[#allocation3 + $0x1b8] sm:$0xff] %v1485_v55  ;;  %v1566_v54 = vsel %vm1553_vm11, %v5534_v44, %v1565_v16  ;;  %v1143_v36 = vsel %vm1130_vm6, %v5436_v22, %v1142_v34  ;;  %v3644_v7 = vor.u32 %v4038_v8, %v3641_v43  ;;  %4351 = vrot.lane.b32.xlu2 %v5592_v59, %s4510_s23  ;;  %v6425_v34 = vrot.slane %v5460_v40, 4 }
 0x213   :  { %1583 = vst [vmem:[#allocation3 + $0x1f0] sm:$0xff] %v1566_v54  ;;  %v3809_v58 = vld [vmem:[#allocation3 + $0x1b0] sm:$0xf0] }
 0x214   :  { %1160 = vst [vmem:[#allocation3 + $0xf0] sm:$0xff] %v1143_v36  ;;  %2253 = vmatpush.bf16.msrb.mxu1 %v3640_v30  ;;  %v3812_v55 = vor.u32 %v4079_v18, %v3809_v58  ;;  %v3775_v36 = vld [vmem:[#allocation3 + $0x150] sm:$0xf]  ;;  %v4071_v30 = vld [vmem:[#allocation3 + $0x154] sm:$0xf]  ;;  %4381 = vrot.lane.b32.xlu1 %v5726_v12, %s4510_s23 }
 0x215   :  { %2279 = vmatpush.bf16.msrb.mxu0 %v3644_v7  ;;  %v5783_v5 = vpop.permute.xlu2 %1690  ;;  %v3679_v58 = vld [vmem:[#allocation3 + $0x90] sm:$0xf]  ;;  %v3649_v18 = vld [vmem:[#allocation3 + $0x70] sm:$0xf0]  ;;  %v3625_v12 = vld [vmem:[#allocation3 + $0x38] sm:$0xf0] }
 0x216   :  { %v1707_v45 = vrot.slane %v5783_v5, 4  ;;  %v5786_v27 = vpop.permute.xlu1 %1293  ;;  %v1541_v44 = vpop.permute.xlu0 %1540 }
 0x217   :  { %v1305_v22 = vrot.slane %v5786_v27, 4  ;;  %v1551_v28 = vrot.slane %v1541_v44, 4  ;;  %v3745_v44 = vld [vmem:[#allocation3 + $0x130] sm:$0xf0] }
 0x218   :  { %v1719_v35 = vsel %vm664_vm9, %v6424_v1, %v1707_v45  ;;  %2254 = vmatpush.bf16.msrb.mxu1 %v3608_v0 }
 0x219   :  { %v1720_v26 = vsel %vm579_vm3, %v5504_v9, %v1719_v35  ;;  %v1320_v59 = vsel %vm664_vm9, %v1304_v37, %v1305_v22  ;;  %v1567_v6 = vsel %vm664_vm9, %v1550_v33, %v1551_v28  ;;  %2280 = vmatpush.bf16.msrb.mxu0 %v3612_v50  ;;  %v4083_v37 = vld [vmem:[#allocation3 + $0x1ac] sm:$0xf0] }
 0x21a   :  { %1741 = vst [vmem:[#allocation3 + $0x210] sm:$0xff] %v1720_v26  ;;  %v1321_v46 = vsel %vm1044_vm5, %v5685_v31, %v1320_v59  ;;  %v1568_v39 = vsel %vm1553_vm11, %v1539_v24, %v1567_v6  ;;  %v4091_v17 = vld [vmem:[#allocation3 + $0x1ec] sm:$0xf0]  ;;  %v3841_v23 = vld [vmem:[#allocation3 + $0x1f0] sm:$0xf0]  ;;  %4366 = vrot.lane.b32.xlu2 %v5623_v56, %s4509_s6 }
 0x21b   :  { %1338 = vst [vmem:[#allocation3 + $0x170] sm:$0xff] %v1321_v46  ;;  %2255 = vmatmul.bf16.vlgmr.msrb.gmra.mxu1 %v5621_v57  ;;  %v3840_v9 = vor.u32 %v4091_v17, %v3839_v62  ;;  %v3844_v14 = vor.u32 %v4087_v51, %v3841_v23  ;;  %v3807_v24 = vld [vmem:[#allocation3 + $0x190] sm:$0xf]  ;;  %v3713_v62 = vld [vmem:[#allocation3 + $0xf0] sm:$0xf0] }
 0x21c   :  { %1584 = vst [vmem:[#allocation3 + $0x1f8] sm:$0xff] %v1568_v39  ;;  %2281 = vmatmul.bf16.vlgmr.msrb.gmra.mxu0 %v5621_v57  ;;  %v3808_v43 = vor.u32 %v4083_v37, %v3807_v24  ;;  %v3743_v50 = vld [vmem:[#allocation3 + $0x110] sm:$0xf]  ;;  %v4055_v17 = vld [vmem:[#allocation3 + $0xd4] sm:$0xf] }
 0x21d   :  { %2299 = vmatpush.bf16.msra.mxu3 %v3840_v9  ;;  %2325 = vmatpush.bf16.msra.mxu2 %v3844_v14  ;;  %v1118_v2 = vpop.permute.xlu2 %1117  ;;  %v3744_v35 = vor.u32 %v4067_v3, %v3743_v50  ;;  %v4059_v6 = vld [vmem:[#allocation3 + $0xec] sm:$0xf0]  ;;  %v3847_v3 = vld [vmem:[#allocation3 + $0x1d8] sm:$0xf] }
 0x21e   :  { %v1128_v38 = vrot.slane %v1118_v2, 4  ;;  %v5809_v33 = vpop.permute.xlu1 %953  ;;  %v1286_v31 = vpop.permute.xlu0 %1285  ;;  %v4047_v2 = vld [vmem:[#allocation3 + $0x94] sm:$0xf]  ;;  %v4043_v24 = vld [vmem:[#allocation3 + $0x6c] sm:$0xf0] }
 0x21f   :  { %v965_v63 = vrot.slane %v5809_v33, 4  ;;  %v1301_v42 = vrot.slane %v1286_v31, 4  ;;  %v3615_v50 = vld [vmem:[#allocation3 + $0x10] sm:$0xf] }
 0x220   :  { %v1144_v16 = vsel %vm664_vm9, %v1127_v32, %v1128_v38 }
 0x221   :  { %v1145_v48 = vsel %vm1130_vm6, %v5760_v19, %v1144_v16  ;;  %v980_v47 = vsel %vm664_vm9, %v6425_v34, %v965_v63  ;;  %v1314_v54 = vsel %vm664_vm9, %v1300_v53, %v1301_v42  ;;  %2300 = vmatpush.bf16.msra.mxu3 %v3808_v43  ;;  %2326 = vmatpush.bf16.msra.mxu2 %v3812_v55  ;;  %v3647_v55 = vld [vmem:[#allocation3 + $0x50] sm:$0xf]  ;;  %v4039_v16 = vld [vmem:[#allocation3 + $0x54] sm:$0xf] }
 0x222   :  { %1161 = vst [vmem:[#allocation3 + $0xf8] sm:$0xff] %v1145_v48  ;;  %v981_v32 = vsel %vm968_vm8, %v5460_v40, %v980_v47  ;;  %v1315_v19 = vsel %vm1044_vm5, %v5658_v11, %v1314_v54  ;;  %v4075_v8 = vld [vmem:[#allocation3 + $0x16c] sm:$0xf0]  ;;  %v3777_v7 = vld [vmem:[#allocation3 + $0x170] sm:$0xf0]  ;;  %4386 = vrot.lane.b32.xlu2 %v5708_v10, %s4513_s26 }
 0x223   :  { %998 = vst [vmem:[#allocation3 + $0xb0] sm:$0xff] %v981_v32  ;;  %v3776_v20 = vor.u32 %v4075_v8, %v3775_v36  ;;  %v3780_v60 = vor.u32 %v4071_v30, %v3777_v7  ;;  %v4063_v40 = vld [vmem:[#allocation3 + $0x114] sm:$0xf]  ;;  %v3871_v48 = vld [vmem:[#allocation3 + $0x210] sm:$0xf]  ;;  %v3652_v8 = vor.u32 %v4039_v16, %v3649_v18 }
 0x224   :  { %1335 = vst [vmem:[#allocation3 + $0x158] sm:$0xff] %v1315_v19  ;;  %v3748_v26 = vor.u32 %v4063_v40, %v3745_v44  ;;  %v4095_v54 = vld [vmem:[#allocation3 + $0x214] sm:$0xf]  ;;  %v4092_v36 = vld [vmem:[#allocation3 + $0x1f4] sm:$0xf0]  ;;  %v3648_v19 = vor.u32 %v4043_v24, %v3647_v55 }
 0x225   :  { %2301 = vmatpush.bf16.msra.mxu3 %v3776_v20  ;;  %2327 = vmatpush.bf16.msra.mxu2 %v3780_v60  ;;  %v1693_v53 = vpop.permute.xlu2 %1692  ;;  %v3849_v30 = vld [vmem:[#allocation3 + $0x1f8] sm:$0xf0]  ;;  %v4035_v32 = vld [vmem:[#allocation3 + $0x2c] sm:$0xf0]  ;;  %v4031_v40 = vld [vmem:[#allocation3 + $0x14] sm:$0xf] }
 0x226   :  { %v1708_v0 = vrot.slane %v1693_v53, 4  ;;  %v1448_v25 = vpop.permute.xlu1 %1447  ;;  %v5829_v28 = vpop.permute.xlu0 %1700  ;;  %v4088_v44 = vld [vmem:[#allocation3 + $0x1dc] sm:$0xf] }
 0x227   :  { %v1463_v11 = vrot.slane %v1448_v25, 4  ;;  %v1712_v1 = vrot.slane %v5829_v28, 4  ;;  %v3852_v53 = vor.u32 %v4088_v44, %v3849_v30 }
 0x228   :  { %v1721_v59 = vsel %vm664_vm9, %v1707_v45, %v1708_v0 }
 0x229   :  { %v1722_v51 = vsel %vm579_vm3, %v5783_v5, %v1721_v59  ;;  %v1476_v46 = vsel %vm664_vm9, %v1462_v13, %v1463_v11  ;;  %v1727_v56 = vsel %vm664_vm9, %v1711_v41, %v1712_v1  ;;  %2302 = vmatpush.bf16.msra.mxu3 %v3744_v35  ;;  %2328 = vmatpush.bf16.msra.mxu2 %v3748_v26  ;;  %v3711_v5 = vld [vmem:[#allocation3 + $0xd0] sm:$0xf] }
 0x22a   :  { %1742 = vst [vmem:[#allocation3 + $0x218] sm:$0xff] %v1722_v51  ;;  %v1477_v45 = vsel %vm882_vm4, %v5615_v29, %v1476_v46  ;;  %v1728_v39 = vsel %vm579_vm3, %v5718_v21, %v1727_v56  ;;  %v3712_v23 = vor.u32 %v4059_v6, %v3711_v5  ;;  %v3716_v13 = vor.u32 %v4055_v17, %v3713_v62  ;;  %v4051_v9 = vld [vmem:[#allocation3 + $0xac] sm:$0xf0]  ;;  %v3681_v14 = vld [vmem:[#allocation3 + $0xb0] sm:$0xf0] }
 0x22b   :  { %1497 = vst [vmem:[#allocation3 + $0x198] sm:$0xff] %v1477_v45  ;;  %v3680_v21 = vor.u32 %v4051_v9, %v3679_v58  ;;  %v3684_v31 = vor.u32 %v4047_v2, %v3681_v14  ;;  %v3616_v59 = vor.u32 %v4035_v32, %v3615_v50  ;;  %v4084_v62 = vld [vmem:[#allocation3 + $0x1b4] sm:$0xf0]  ;;  %v3817_v46 = vld [vmem:[#allocation3 + $0x1b8] sm:$0xf0] }
 0x22c   :  { %1745 = vst [vmem:[#allocation3 + $0x230] sm:$0xff] %v1728_v39  ;;  %v3751_v9 = vld [vmem:[#allocation3 + $0x118] sm:$0xf]  ;;  %v4064_v58 = vld [vmem:[#allocation3 + $0x11c] sm:$0xf] }
 0x22d   :  { %2303 = vmatpush.bf16.msra.mxu3 %v3712_v23  ;;  %2329 = vmatpush.bf16.msra.mxu2 %v3716_v13  ;;  %v3753_v2 = vld [vmem:[#allocation3 + $0x138] sm:$0xf0]  ;;  %v4036_v50 = vld [vmem:[#allocation3 + $0x34] sm:$0xf0] }
 0x22e   :  { %v1296_v41 = vpop.permute.xlu1 %1295  ;;  %v946_v37 = vpop.permute.xlu0 %945 }
 0x22f   :  { %v1306_v29 = vrot.slane %v1296_v41, 4  ;;  %v961_v38 = vrot.slane %v946_v37, 4  ;;  %v4068_v37 = vld [vmem:[#allocation3 + $0x134] sm:$0xf0] }
 0x231   :  { %v1322_v42 = vsel %vm664_vm9, %v1305_v22, %v1306_v29  ;;  %v974_v43 = vsel %vm664_vm9, %v960_v61, %v961_v38  ;;  %2304 = vmatpush.bf16.msra.mxu3 %v3680_v21  ;;  %2330 = vmatpush.bf16.msra.mxu2 %v3684_v31  ;;  %v3617_v22 = vld [vmem:[#allocation3 + $0x30] sm:$0xf0]  ;;  %v3752_v21 = vor.u32 %v4068_v37, %v3751_v9  ;;  %v3879_v24 = vld [vmem:[#allocation3 + $0x218] sm:$0xf] }
 0x232   :  { %v1323_v34 = vsel %vm1044_vm5, %v5786_v27, %v1322_v42  ;;  %v975_v47 = vsel %vm968_vm8, %v5618_v49, %v974_v43  ;;  %v3848_v27 = vor.u32 %v4092_v36, %v3847_v3  ;;  %v3815_v49 = vld [vmem:[#allocation3 + $0x198] sm:$0xf]  ;;  %v4080_v11 = vld [vmem:[#allocation3 + $0x19c] sm:$0xf]  ;;  %v3620_v6 = vor.u32 %v4031_v40, %v3617_v22 }
 0x233   :  { %1339 = vst [vmem:[#allocation3 + $0x178] sm:$0xff] %v1323_v34  ;;  %v4099_v61 = vld [vmem:[#allocation3 + $0x22c] sm:$0xf0]  ;;  %v3873_v7 = vld [vmem:[#allocation3 + $0x230] sm:$0xf0]  ;;  %v3816_v51 = vor.u32 %v4084_v62, %v3815_v49  ;;  %v3820_v39 = vor.u32 %v4080_v11, %v3817_v46  ;;  %v3756_v31 = vor.u32 %v4064_v58, %v3753_v2 }
 0x234   :  { %995 = vst [vmem:[#allocation3 + $0x98] sm:$0xff] %v975_v47  ;;  %v3872_v20 = vor.u32 %v4099_v61, %v3871_v48  ;;  %v3876_v60 = vor.u32 %v4095_v54, %v3873_v7  ;;  %v4096_v42 = vld [vmem:[#allocation3 + $0x21c] sm:$0xf]  ;;  %v4060_v54 = vld [vmem:[#allocation3 + $0xf4] sm:$0xf0] }
 0x235   :  { %2305 = vmatpush.bf16.msra.mxu3 %v3648_v19  ;;  %2331 = vmatpush.bf16.msra.mxu2 %v3652_v8  ;;  %v3721_v36 = vld [vmem:[#allocation3 + $0xf8] sm:$0xf0]  ;;  %v3623_v40 = vld [vmem:[#allocation3 + $0x18] sm:$0xf] }
 0x236   :  { %v1108_v0 = vpop.permute.xlu1 %1107  ;;  %2319 = vmatpush.bf16.msra.mxu1 %v3872_v20  ;;  %2345 = vmatpush.bf16.msra.mxu0 %v3876_v60  ;;  %v1703_v25 = vpop.permute.xlu0 %1702  ;;  %v4044_v60 = vld [vmem:[#allocation3 + $0x74] sm:$0xf0]  ;;  %v3657_v3 = vld [vmem:[#allocation3 + $0x78] sm:$0xf0] }
 0x237   :  { %v1123_v35 = vrot.slane %v1108_v0, 4  ;;  %v1713_v26 = vrot.slane %v1703_v25, 4  ;;  %v4032_v11 = vld [vmem:[#allocation3 + $0x1c] sm:$0xf] }
 0x239   :  { %v1136_v56 = vsel %vm664_vm9, %v1122_v15, %v1123_v35  ;;  %v1729_v45 = vsel %vm664_vm9, %v1712_v1, %v1713_v26  ;;  %2306 = vmatpush.bf16.msra.mxu3 %v3616_v59  ;;  %2332 = vmatpush.bf16.msra.mxu2 %v3620_v6  ;;  %v4072_v15 = vld [vmem:[#allocation3 + $0x15c] sm:$0xf]  ;;  %v3624_v35 = vor.u32 %v4036_v50, %v3623_v40 }
 0x23a   :  { %2351 = vmatpush.bf16.msrb.mxu1 %v3848_v27  ;;  %2377 = vmatpush.bf16.msrb.mxu0 %v3852_v53  ;;  %v1137_v5 = vsel %vm1130_vm6, %v5580_v52, %v1136_v56  ;;  %v1730_v17 = vsel %vm579_vm3, %v5829_v28, %v1729_v45  ;;  %v4076_v23 = vld [vmem:[#allocation3 + $0x174] sm:$0xf0]  ;;  %v3785_v13 = vld [vmem:[#allocation3 + $0x178] sm:$0xf0] }
 0x23b   :  { %3889 = vmatmul.msk.bf16.vlgmr.msra.gmra.mxu1 %vm299_vm2, %v5536_v4  ;;  %3890 = vmatmul.msk.bf16.vlgmr.msra.gmra.mxu0 %vm299_vm2, %v5536_v4  ;;  %1157 = vst [vmem:[#allocation3 + $0xd8] sm:$0xff] %v1137_v5  ;;  %v3783_v52 = vld [vmem:[#allocation3 + $0x158] sm:$0xf]  ;;  %v3788_v28 = vor.u32 %v4072_v15, %v3785_v13  ;;  %v4048_v8 = vld [vmem:[#allocation3 + $0x9c] sm:$0xf] }
 0x23c   :  { %1746 = vst [vmem:[#allocation3 + $0x238] sm:$0xff] %v1730_v17  ;;  %2307 = vmatmul.bf16.vlgmr.msra.gmra.mxu3 %v5621_v57  ;;  %2333 = vmatmul.bf16.vlgmr.msra.gmra.mxu2 %v5621_v57  ;;  %v3784_v1 = vor.u32 %v4076_v23, %v3783_v52  ;;  %v3655_v27 = vld [vmem:[#allocation3 + $0x58] sm:$0xf]  ;;  %v4040_v53 = vld [vmem:[#allocation3 + $0x5c] sm:$0xf] }
 0x23d   :  { %v3656_v0 = vor.u32 %v4044_v60, %v3655_v27  ;;  %v3660_v25 = vor.u32 %v4040_v53, %v3657_v3 }
 0x23e   :  { %2352 = vmatpush.bf16.msrb.mxu1 %v3816_v51  ;;  %2378 = vmatpush.bf16.msrb.mxu0 %v3820_v39  ;;  %v956_v14 = vpop.permute.xlu1 %955  ;;  %v5879_v41 = vpop.permute.xlu0 %4281 }
 0x23f   :  { %v966_v29 = vrot.slane %v956_v14, 4  ;;  %v4284_v26 = vunpack.i.h.bf16 %v5879_v41 }
 0x241   :  { %v982_v38 = vsel %vm664_vm9, %v965_v63, %v966_v29 }
 0x242   :  { %2353 = vmatpush.bf16.msrb.mxu1 %v3784_v1  ;;  %2379 = vmatpush.bf16.msrb.mxu0 %v3788_v28  ;;  %v983_v18 = vsel %vm968_vm8, %v5809_v33, %v982_v38  ;;  %v3719_v43 = vld [vmem:[#allocation3 + $0xd8] sm:$0xf]  ;;  %v4056_v55 = vld [vmem:[#allocation3 + $0xdc] sm:$0xf]  ;;  %v2962_v1 = vld [vmem:[#allocation4 + $0x24] sm:$0xf] }
 0x243   :  { %999 = vst [vmem:[#allocation3 + $0xb8] sm:$0xff] %v983_v18  ;;  %v4100_v16 = vld [vmem:[#allocation3 + $0x234] sm:$0xf0]  ;;  %v3881_v48 = vld [vmem:[#allocation3 + $0x238] sm:$0xf0]  ;;  %v3720_v30 = vor.u32 %v4060_v54, %v3719_v43  ;;  %v3724_v63 = vor.u32 %v4056_v55, %v3721_v36  ;;  %v2971_v37 = vunpack.c.l.bf16 %v2962_v1  ;;  %v5952_v55 = vpop.permute.xlu2 %4276 }
 0x244   :  { %v3880_v34 = vor.u32 %v4100_v16, %v3879_v24  ;;  %v3884_v47 = vor.u32 %v4096_v42, %v3881_v48  ;;  %v3687_v33 = vld [vmem:[#allocation3 + $0x98] sm:$0xf]  ;;  %v3099_v42 = vld [vmem:[#allocation4 + $0x24] sm:$0xf]  ;;  %v4279_v53 = vunpack.i.h.bf16 %v5952_v55 }
 0x245   :  { %v3108_v36 = vunpack.c.l.bf16 %v3099_v42  ;;  %v3058_v1 = vld [vmem:[#allocation4 + $0x24] sm:$0xf] }
 0x246   :  { %2354 = vmatpush.bf16.msrb.mxu1 %v3752_v21  ;;  %2380 = vmatpush.bf16.msrb.mxu0 %v3756_v31  ;;  %v5886_v32 = vpop.permute.xlu1 %1823  ;;  %v5888_v22 = vpop.permute.xlu0 %4296 }
 0x247   :  { %2371 = vmatpush.bf16.msrb.mxu3 %v3880_v34  ;;  %2397 = vmatpush.bf16.msrb.mxu2 %v3884_v47  ;;  %v4299_v62 = vunpack.i.h.bf16 %v5888_v22 }
 0x24a   :  { %2355 = vmatpush.bf16.msrb.mxu1 %v3720_v30  ;;  %2381 = vmatpush.bf16.msrb.mxu0 %v3724_v63  ;;  %v4052_v19 = vld [vmem:[#allocation3 + $0xb4] sm:$0xf0]  ;;  %v3689_v61 = vld [vmem:[#allocation3 + $0xb8] sm:$0xf0] }
 0x24b   :  { %v3688_v7 = vor.u32 %v4052_v19, %v3687_v33  ;;  %v3692_v20 = vor.u32 %v4048_v8, %v3689_v61 }
 0x24c   :  { %3891 = vmatmul.msk.bf16.vlgmr.msrb.gmra.mxu3 %vm299_vm2, %v5536_v4  ;;  %3892 = vmatmul.msk.bf16.vlgmr.msrb.gmra.mxu2 %vm299_vm2, %v5536_v4  ;;  %v3628_v4 = vor.u32 %v4032_v11, %v3625_v12 }
 0x24e   :  { %2356 = vmatpush.bf16.msrb.mxu1 %v3688_v7  ;;  %2382 = vmatpush.bf16.msrb.mxu0 %v3692_v20  ;;  %v5896_v44 = vpop.permute.xlu1 %4286  ;;  %v5898_v49 = vpop.permute.xlu0 %4311 }
 0x252   :  { %2357 = vmatpush.bf16.msrb.mxu1 %v3656_v0  ;;  %2383 = vmatpush.bf16.msrb.mxu0 %v3660_v25  ;;  %v4278_v0 = vunpack.i.l.bf16 %v5952_v55  ;;  %v5969_v25 = vpop.permute.xlu2 %4291 }
 0x254   :  { %v3125_v11 = vsel %vm666_vm7, %v4278_v0, %v4279_v53 }
 0x256   :  { %2358 = vmatpush.bf16.msrb.mxu1 %v3624_v35  ;;  %2384 = vmatpush.bf16.msrb.mxu0 %v3628_v4  ;;  %v5901_v59 = vpop.permute.xlu1 %4301  ;;  %v5903_v6 = vpop.permute.xlu0 %4326 }
 0x257   :  { %v4303_v51 = vunpack.i.l.bf16 %v5901_v59  ;;  %v4328_v46 = vunpack.i.l.bf16 %v5903_v6  ;;  %v2217_v56 = vpop.f32.mrf.mxu1  ;;  %v4304_v28 = vunpack.i.h.bf16 %v5901_v59  ;;  %v4329_v34 = vunpack.i.h.bf16 %v5903_v6 }
 0x259   :  { %2359 = vmatmul.bf16.vlgmr.msrb.gmra.mxu1 %v5621_v57  ;;  %2385 = vmatmul.bf16.vlgmr.msrb.gmra.mxu0 %v5621_v57  ;;  %v5917_v45 = vsel %vm1130_vm6, %v4299_v62, %v4303_v51  ;;  %v5924_v10 = vsel %vm666_vm7, %v4284_v26, %v4328_v46 }
 0x25c   :  { %v2243_v39 = vpop.f32.mrf.mxu3 }
 0x25e   :  { %v5926_v5 = vpop.permute.xlu1 %4316  ;;  %v5928_v17 = vpop.permute.xlu0 %4341 }
 0x25f   :  { %v2219_v57 = vpop.f32.mrf.mxu1  ;;  %v4319_v3 = vunpack.i.h.bf16 %v5926_v5  ;;  %v4318_v27 = vunpack.i.l.bf16 %v5926_v5 }
 0x260   :  { %v4288_v57 = vunpack.i.l.bf16 %v5896_v44 }
 0x261   :  { %v2788_v40 = vsel %vm1044_vm5, %v4318_v27, %v4319_v3 }
 0x264   :  { %v2245_v23 = vpop.f32.mrf.mxu3 }
 0x266   :  { %v5930_v13 = vpop.permute.xlu1 %4331  ;;  %v5932_v52 = vpop.permute.xlu0 %4356 }
 0x267   :  { %v4334_v23 = vunpack.i.h.bf16 %v5930_v13 }
 0x26b   :  { %v2204_v15 = vpop.f32.mrf.mxu0 }
 0x26c   :  { %v2205_v9 = vadd.f32 %v2204_v15, %v5886_v32  ;;  %v4333_v15 = vunpack.i.l.bf16 %v5930_v13 }
 0x26e   :  { %v5936_v14 = vpop.permute.xlu1 %4346  ;;  %v2218_v24 = vadd.f32 %v2217_v56, %v2205_v9 }
 0x26f   :  { %v4348_v58 = vunpack.i.l.bf16 %v5936_v14  ;;  %v5939_v2 = vpop.permute.xlu0 %4371 }
 0x270   :  { %v2230_v29 = vpop.f32.mrf.mxu2  ;;  %v4374_v38 = vunpack.i.h.bf16 %v5939_v2  ;;  %v2403_v47 = vmax.f32 %v2218_v24, 0.0  ;;  %v4298_v24 = vunpack.i.l.bf16 %v5888_v22 }
 0x271   :  { %v5947_v21 = vsel %vm1130_vm6, %v4304_v28, %v4348_v58  ;;  %v2231_v31 = vadd.f32 %v2230_v29, %v5886_v32 }
 0x272   :  { %v3012_v18 = vmul.f32 %v4374_v38, %v2971_v37 }
 0x273   :  { %v2206_v43 = vpop.f32.mrf.mxu0  ;;  %v2244_v16 = vadd.f32 %v2243_v39, %v2231_v31  ;;  %v4289_v39 = vunpack.i.h.bf16 %v5896_v44  ;;  %v2498_v44 = vsel %vm579_vm3, %v4333_v15, %v4334_v23 }
 0x274   :  { %v3017_v48 = vpack.c.bf16 %v3012_v18, %v3012_v18  ;;  %v5989_v43 = vpop.permute.xlu2 %4306 }
 0x275   :  { %v2404_v54 = vmax.f32 %v2244_v16, 0.0  ;;  %v2988_v42 = vsel %vm968_vm8, %v4288_v57, %v4289_v39 }
 0x276   :  { %v4362_v30 = vpop.permute.xlu1 %4361  ;;  %3031 = vrot.lane.b32.xlu2 %v3017_v48, %s4510_s23 }
 0x277   :  { %v2411_v63 = vpack.c.bf16 %v2404_v54, %v2403_v47  ;;  %v4364_v33 = vunpack.i.h.bf16 %v4362_v30  ;;  %v4363_v19 = vunpack.i.l.bf16 %v4362_v30  ;;  %v2892_v54 = vsel %vm1130_vm6, %v4298_v24, %v4299_v62 }
 0x278   :  { %v2232_v8 = vpop.f32.mrf.mxu2  ;;  %v4308_v30 = vunpack.i.l.bf16 %v5989_v43 }
 0x279   :  { %2415 = vst [vmem:[#allocation4 + $0x4] sm:$0xff] %v2411_v63  ;;  %v3149_v61 = vmul.f32 %v4364_v33, %v3108_v36  ;;  %v5959_v7 = vsel %vm666_vm7, %v4329_v34, %v4363_v19  ;;  %v5962_v20 = vsel %vm666_vm7, %v4363_v19, %v4364_v33  ;;  %3064 = vrot.lane.b32.xlu0 %v2411_v63, %s4517_s29  ;;  %v3100_v50 = vunpack.c.l.bf16 %v2411_v63 }
 0x27a   :  { %2858 = vst [vmem:[#allocation5 + $0x80] sm:$0xff] %v2411_v63  ;;  %v3101_v12 = vunpack.c.h.bf16 %v2411_v63  ;;  %v4309_v36 = vunpack.i.h.bf16 %v5989_v43 }
 0x27b   :  { %v3154_v60 = vpack.c.bf16 %v3149_v61, %v3149_v61  ;;  %v3141_v29 = vmul.f32 %v4278_v0, %v3100_v50  ;;  %v3004_v48 = vmul.f32 %v4288_v57, %v3100_v50  ;;  %v2908_v8 = vmul.f32 %v4298_v24, %v3100_v50 }
 0x27c   :  { %v3142_v31 = vmul.f32 %v3125_v11, %v3101_v12  ;;  %v3005_v47 = vmul.f32 %v3101_v12, %v2988_v42  ;;  %v2909_v61 = vmul.f32 %v3101_v12, %v2892_v54  ;;  %v4293_v24 = vunpack.i.l.bf16 %v5969_v25 }
 0x27d   :  { %3168 = vrot.lane.b32.xlu1 %v3154_v60, %s4509_s6  ;;  %v2692_v60 = vsel %vm882_vm4, %v4308_v30, %v4309_v36 }
 0x27e   :  { %v3150_v16 = vpack.c.bf16 %v3142_v31, %v3141_v29  ;;  %v3013_v19 = vpack.c.bf16 %v3005_v47, %v3004_v48  ;;  %v2917_v62 = vpack.c.bf16 %v2909_v61, %v2908_v8  ;;  %v4294_v31 = vunpack.i.h.bf16 %v5969_v25 }
 0x27f   :  { %v2989_v54 = vsel %vm968_vm8, %v4289_v39, %v4293_v24  ;;  %v4358_v25 = vunpack.i.l.bf16 %v5932_v52 }
 0x280   :  { %v2605_v35 = vld [vmem:[#allocation4] sm:$0xff]  ;;  %v2990_v43 = vsel %vm968_vm8, %v4293_v24, %v4294_v31 }
 0x281   :  { %v2651_v4 = vunpack.c.l.bf16 %v2605_v35  ;;  %v2652_v56 = vunpack.c.h.bf16 %v2605_v35  ;;  %2574 = vrot.lane.b32.xlu2 %v2605_v35, %s4516_s28 }
 0x283   :  { %v2804_v9 = vmul.f32 %v4318_v27, %v2651_v4  ;;  %v2805_v37 = vmul.f32 %v2788_v40, %v2652_v56  ;;  %v2514_v63 = vmul.f32 %v4333_v15, %v2651_v4  ;;  %v2515_v33 = vmul.f32 %v2652_v56, %v2498_v44 }
 0x284   :  { %v2708_v0 = vmul.f32 %v4308_v30, %v2651_v4  ;;  %v2709_v22 = vmul.f32 %v2692_v60, %v2652_v56  ;;  %v2894_v30 = vsel %vm1130_vm6, %v4303_v51, %v4304_v28  ;;  %v4314_v60 = vunpack.i.h.bf16 %v5898_v49 }
 0x285   :  { %3072 = vrot.lane.b32.xlu1 %v3058_v1, %s4517_s29  ;;  %v2813_v18 = vpack.c.bf16 %v2805_v37, %v2804_v9  ;;  %v2523_v27 = vpack.c.bf16 %v2515_v33, %v2514_v63 }
 0x286   :  { %v2717_v40 = vpack.c.bf16 %v2709_v22, %v2708_v0 }
 0x287   :  { %2823 = vrot.lane.b32.xlu0 %v2813_v18, %s4512_s25  ;;  %v6007_v18 = vpop.permute.xlu2 %4321 }
 0x288   :  { %v4324_v39 = vunpack.i.h.bf16 %v6007_v18  ;;  %v4323_v22 = vunpack.i.l.bf16 %v6007_v18 }
 0x289   :  { %3160 = vrot.lane.b32.xlu2 %v3150_v16, %s4509_s6 }
 0x28a   :  { %v2789_v55 = vsel %vm1044_vm5, %v4319_v3, %v4323_v22 }
 0x28d   :  { %3023 = vrot.lane.b32.xlu1 %v3013_v19, %s4510_s23  ;;  %v4283_v19 = vunpack.i.l.bf16 %v5879_v41 }
 0x28f   :  { %2533 = vrot.lane.b32.xlu0 %v2523_v27, %s4514_s27  ;;  %v4313_v27 = vunpack.i.l.bf16 %v5898_v49  ;;  %v3127_v59 = vsel %vm666_vm7, %v4283_v19, %v4284_v26  ;;  %v3126_v51 = vsel %vm666_vm7, %v4279_v53, %v4283_v19 }
 0x291   :  { %2927 = vrot.lane.b32.xlu2 %v2917_v62, %s4513_s26 }
 0x293   :  { %v2269_v11 = vpop.f32.mrf.mxu3 }
 0x294   :  { %v2295_v35 = vpop.f32.mrf.mxu2 }
 0x295   :  { %2727 = vrot.lane.b32.xlu1 %v2717_v40, %s4511_s24  ;;  %v2694_v40 = vsel %vm882_vm4, %v4313_v27, %v4314_v60 }
 0x298   :  { %v2256_v57 = vpop.f32.mrf.mxu1 }
 0x299   :  { %v2257_v50 = vadd.f32 %v2256_v57, %v5886_v32  ;;  %v2282_v12 = vpop.f32.mrf.mxu0 }
 0x29a   :  { %v2283_v15 = vadd.f32 %v2282_v12, %v5886_v32 }
 0x29b   :  { %v2270_v1 = vadd.f32 %v2269_v11, %v2257_v50  ;;  %v2271_v9 = vpop.f32.mrf.mxu3  ;;  %v2693_v11 = vsel %vm882_vm4, %v4309_v36, %v4313_v27  ;;  %v4343_v27 = vunpack.i.l.bf16 %v5928_v17 }
 0x29c   :  { %v2296_v4 = vadd.f32 %v2295_v35, %v2283_v15  ;;  %v2297_v56 = vpop.f32.mrf.mxu2  ;;  %v6039_v35 = vpop.permute.xlu2 %4336 }
 0x29d   :  { %v2405_v37 = vmax.f32 %v2270_v1, 0.0  ;;  %v4339_v53 = vunpack.i.h.bf16 %v6039_v35  ;;  %v4338_v36 = vunpack.i.l.bf16 %v6039_v35 }
 0x29e   :  { %v2406_v29 = vmax.f32 %v2296_v4, 0.0 }
 0x29f   :  { %v2499_v3 = vsel %vm579_vm3, %v4334_v23, %v4338_v36 }
 0x2a0   :  { %v2412_v42 = vpack.c.bf16 %v2406_v29, %v2405_v37  ;;  %v2258_v44 = vpop.f32.mrf.mxu1  ;;  %v2500_v37 = vsel %vm579_vm3, %v4338_v36, %v4339_v53 }
 0x2a1   :  { %v2284_v16 = vpop.f32.mrf.mxu0 }
 0x2a2   :  { %2416 = vst [vmem:[#allocation4 + $0xc] sm:$0xff] %v2412_v42  ;;  %3066 = vrot.lane.b32.xlu1 %v2412_v42, %s4517_s29  ;;  %v2965_v48 = vunpack.c.l.bf16 %v2412_v42  ;;  %v2966_v47 = vunpack.c.h.bf16 %v2412_v42 }
 0x2a3   :  { %2859 = vst [vmem:[#allocation5 + $0x88] sm:$0xff] %v2412_v42 }
 0x2a4   :  { %v3006_v63 = vmul.f32 %v2989_v54, %v2965_v48  ;;  %v3007_v33 = vmul.f32 %v2990_v43, %v2966_v47  ;;  %v2910_v8 = vmul.f32 %v2965_v48, %v5917_v45  ;;  %v2911_v61 = vmul.f32 %v2966_v47, %v2894_v30  ;;  %v6060_v23 = vpop.permute.xlu2 %4351 }
 0x2a5   :  { %v2790_v45 = vsel %vm1044_vm5, %v4323_v22, %v4324_v39  ;;  %v3143_v57 = vmul.f32 %v3126_v51, %v2965_v48  ;;  %v3144_v50 = vmul.f32 %v3127_v59, %v2966_v47 }
 0x2a6   :  { %v3014_v0 = vpack.c.bf16 %v3007_v33, %v3006_v63  ;;  %v2918_v62 = vpack.c.bf16 %v2911_v61, %v2910_v8  ;;  %v4344_v61 = vunpack.i.h.bf16 %v5928_v17 }
 0x2a7   :  { %v3151_v5 = vpack.c.bf16 %v3144_v50, %v3143_v57  ;;  %v4354_v57 = vunpack.i.h.bf16 %v6060_v23 }
 0x2a8   :  { %3025 = vrot.lane.b32.xlu2 %v3014_v0, %s4510_s23  ;;  %v4349_v0 = vunpack.i.h.bf16 %v5936_v14 }
 0x2a9   :  { %v2565_v28 = vld [vmem:[#allocation4 + $0x8] sm:$0xff] }
 0x2aa   :  { %2576 = vrot.lane.b32.xlu0 %v2565_v28, %s4516_s28  ;;  %v2765_v41 = vunpack.c.l.bf16 %v2565_v28  ;;  %v2766_v26 = vunpack.c.h.bf16 %v2565_v28  ;;  %v3129_v28 = vsel %vm666_vm7, %v4328_v46, %v4329_v34 }
 0x2ac   :  { %v2806_v12 = vmul.f32 %v2789_v55, %v2765_v41  ;;  %v2807_v15 = vmul.f32 %v2790_v45, %v2766_v26  ;;  %v2710_v1 = vmul.f32 %v2765_v41, %v2693_v11  ;;  %v2711_v9 = vmul.f32 %v2766_v26, %v2694_v40 }
 0x2ad   :  { %v2516_v29 = vmul.f32 %v2765_v41, %v2499_v3  ;;  %v2517_v24 = vmul.f32 %v2766_v26, %v2500_v37  ;;  %v2992_v40 = vsel %vm968_vm8, %v4343_v27, %v4344_v61  ;;  %v2896_v11 = vsel %vm1130_vm6, %v4348_v58, %v4349_v0  ;;  %v6082_v26 = vpop.permute.xlu2 %4366 }
 0x2ae   :  { %v2814_v4 = vpack.c.bf16 %v2807_v15, %v2806_v12  ;;  %v2718_v56 = vpack.c.bf16 %v2711_v9, %v2710_v1  ;;  %v2991_v41 = vsel %vm968_vm8, %v4294_v31, %v4343_v27  ;;  %v4359_v58 = vunpack.i.h.bf16 %v5932_v52 }
 0x2af   :  { %v2524_v42 = vpack.c.bf16 %v2517_v24, %v2516_v29  ;;  %v4353_v31 = vunpack.i.l.bf16 %v6060_v23  ;;  %v2791_v3 = vsel %vm1044_vm5, %v4324_v39, %v4358_v25 }
 0x2b0   :  { %2825 = vrot.lane.b32.xlu1 %v2814_v4, %s4512_s25  ;;  %2729 = vrot.lane.b32.xlu2 %v2718_v56, %s4511_s24 }
 0x2b1   :  { %v2695_v29 = vsel %vm882_vm4, %v4314_v60, %v4353_v31 }
 0x2b2   :  { %3162 = vrot.lane.b32.xlu0 %v3151_v5, %s4509_s6  ;;  %v2792_v5 = vsel %vm1044_vm5, %v4358_v25, %v4359_v58 }
 0x2b8   :  { %v2321_v44 = vpop.f32.mrf.mxu1  ;;  %v2347_v43 = vpop.f32.mrf.mxu0  ;;  %2535 = vrot.lane.b32.xlu1 %v2524_v42, %s4514_s27 }
 0x2ba   :  { %2929 = vrot.lane.b32.xlu0 %v2918_v62, %s4513_s26 }
 0x2bf   :  { %v2308_v16 = vpop.f32.mrf.mxu3  ;;  %v2334_v48 = vpop.f32.mrf.mxu2 }
 0x2c0   :  { %v2309_v47 = vadd.f32 %v2308_v16, %v5886_v32  ;;  %v2335_v54 = vadd.f32 %v2334_v48, %v5886_v32  ;;  %v2323_v13 = vpop.f32.mrf.mxu1  ;;  %v2349_v30 = vpop.f32.mrf.mxu0  ;;  %v4369_v16 = vunpack.i.h.bf16 %v6082_v26 }
 0x2c1   :  { %v6106_v48 = vpop.permute.xlu2 %4386 }
 0x2c2   :  { %v2322_v63 = vadd.f32 %v2321_v44, %v2309_v47  ;;  %v2348_v33 = vadd.f32 %v2347_v43, %v2335_v54  ;;  %v4368_v54 = vunpack.i.l.bf16 %v6082_v26  ;;  %v4388_v23 = vunpack.i.l.bf16 %v6106_v48 }
 0x2c4   :  { %v2407_v19 = vmax.f32 %v2322_v63, 0.0  ;;  %v2408_v8 = vmax.f32 %v2348_v33, 0.0  ;;  %v2502_v60 = vsel %vm579_vm3, %v4368_v54, %v4369_v16 }
 0x2c6   :  { %v2413_v22 = vpack.c.bf16 %v2408_v8, %v2407_v19  ;;  %v4377_v19 = vpop.permute.xlu1 %4376 }
 0x2c7   :  { %v2310_v62 = vpop.f32.mrf.mxu3  ;;  %v2336_v59 = vpop.f32.mrf.mxu2 }
 0x2c8   :  { %2417 = vst [vmem:[#allocation4 + $0x14] sm:$0xff] %v2413_v22  ;;  %3068 = vrot.lane.b32.xlu2 %v2413_v22, %s4517_s29  ;;  %v2967_v51 = vunpack.c.l.bf16 %v2413_v22  ;;  %v2968_v45 = vunpack.c.h.bf16 %v2413_v22 }
 0x2c9   :  { %2860 = vst [vmem:[#allocation5 + $0x90] sm:$0xff] %v2413_v22 }
 0x2ca   :  { %v3008_v6 = vmul.f32 %v2991_v41, %v2967_v51  ;;  %v3009_v55 = vmul.f32 %v2992_v40, %v2968_v45  ;;  %v3145_v46 = vmul.f32 %v5924_v10, %v2967_v51  ;;  %v3146_v34 = vmul.f32 %v3129_v28, %v2968_v45 }
 0x2cb   :  { %v2912_v50 = vmul.f32 %v2967_v51, %v5947_v21  ;;  %v2913_v12 = vmul.f32 %v2968_v45, %v2896_v11  ;;  %v2696_v10 = vsel %vm882_vm4, %v4353_v31, %v4354_v57  ;;  %v4373_v45 = vunpack.i.l.bf16 %v5939_v2 }
 0x2cc   :  { %v3015_v15 = vpack.c.bf16 %v3009_v55, %v3008_v6  ;;  %v3152_v1 = vpack.c.bf16 %v3146_v34, %v3145_v46  ;;  %v4379_v28 = vunpack.i.h.bf16 %v4377_v19  ;;  %v4378_v41 = vunpack.i.l.bf16 %v4377_v19 }
 0x2cd   :  { %v2919_v9 = vpack.c.bf16 %v2913_v12, %v2912_v50  ;;  %v2993_v35 = vsel %vm968_vm8, %v4344_v61, %v4373_v45  ;;  %v2866_v61 = vld [vmem:[#allocation4 + $0x24] sm:$0xf] }
 0x2ce   :  { %3027 = vrot.lane.b32.xlu1 %v3015_v15, %s4510_s23  ;;  %v2898_v12 = vsel %vm1130_vm6, %v4378_v41, %v4379_v28  ;;  %v4382_v15 = vpop.permute.xlu1 %4381  ;;  %v2897_v2 = vsel %vm1130_vm6, %v4349_v0, %v4378_v41 }
 0x2cf   :  { %v2566_v36 = vld [vmem:[#allocation4 + $0x10] sm:$0xff]  ;;  %v2373_v4 = vpop.f32.mrf.mxu3  ;;  %v2399_v56 = vpop.f32.mrf.mxu2 }
 0x2d0   :  { %2578 = vrot.lane.b32.xlu0 %v2566_v36, %s4516_s28  ;;  %3164 = vrot.lane.b32.xlu2 %v3152_v1, %s4509_s6  ;;  %v2655_v21 = vunpack.c.l.bf16 %v2566_v36  ;;  %v2656_v37 = vunpack.c.h.bf16 %v2566_v36  ;;  %v6121_v40 = vpop.permute.xlu2 %3031 }
 0x2d2   :  { %v2712_v24 = vmul.f32 %v2695_v29, %v2655_v21  ;;  %v2713_v42 = vmul.f32 %v2696_v10, %v2656_v37  ;;  %v2808_v44 = vmul.f32 %v2791_v3, %v2655_v21  ;;  %v2809_v43 = vmul.f32 %v2792_v5, %v2656_v37 }
 0x2d3   :  { %v2519_v51 = vmul.f32 %v2656_v37, %v2502_v60  ;;  %v4383_v10 = vunpack.i.l.bf16 %v4382_v15 }
 0x2d4   :  { %v2719_v47 = vpack.c.bf16 %v2713_v42, %v2712_v24  ;;  %v2815_v49 = vpack.c.bf16 %v2809_v43, %v2808_v44 }
 0x2d5   :  { %v2697_v0 = vsel %vm882_vm4, %v4354_v57, %v4383_v10 }
 0x2d6   :  { %v2360_v13 = vpop.f32.mrf.mxu1  ;;  %v2386_v30 = vpop.f32.mrf.mxu0  ;;  %2731 = vrot.lane.b32.xlu1 %v2719_v47, %s4511_s24 }
 0x2d7   :  { %v2361_v18 = vadd.f32 %v2360_v13, %v5886_v32  ;;  %v2387_v39 = vadd.f32 %v2386_v30, %v5886_v32  ;;  %v2375_v63 = vpop.f32.mrf.mxu3  ;;  %v2401_v33 = vpop.f32.mrf.mxu2  ;;  %v2501_v32 = vsel %vm579_vm3, %v4339_v53, %v4368_v54  ;;  %v2994_v53 = vsel %vm968_vm8, %v4373_v45, %v4374_v38 }
 0x2d8   :  { %2931 = vrot.lane.b32.xlu0 %v2919_v9, %s4513_s26  ;;  %2827 = vrot.lane.b32.xlu2 %v2815_v49, %s4512_s25  ;;  %v2518_v59 = vmul.f32 %v2655_v21, %v2501_v32  ;;  %v4384_v9 = vunpack.i.h.bf16 %v4382_v15  ;;  %v4389_v54 = vunpack.i.h.bf16 %v6106_v48  ;;  %v2793_v48 = vsel %vm1044_vm5, %v4359_v58, %v4388_v23 }
 0x2d9   :  { %v2374_v8 = vadd.f32 %v2373_v4, %v2361_v18  ;;  %v2400_v27 = vadd.f32 %v2399_v56, %v2387_v39  ;;  %v4392_v39 = vpop.permute.xlu0 %4391 }
 0x2da   :  { %v2525_v46 = vpack.c.bf16 %v2519_v51, %v2518_v59  ;;  %v2698_v5 = vsel %vm882_vm4, %v4383_v10, %v4384_v9  ;;  %v4394_v49 = vunpack.i.h.bf16 %v4392_v39  ;;  %v4393_v60 = vunpack.i.l.bf16 %v4392_v39 }
 0x2db   :  { %v2409_v22 = vmax.f32 %v2374_v8, 0.0  ;;  %v2410_v62 = vmax.f32 %v2400_v27, 0.0  ;;  %v6139_v3 = vpop.permute.xlu2 %2574  ;;  %v2794_v33 = vsel %vm1044_vm5, %v4388_v23, %v4389_v54 }
 0x2dc   :  { %v2503_v32 = vsel %vm579_vm3, %v4369_v16, %v4393_v60 }
 0x2dd   :  { %v2414_v11 = vpack.c.bf16 %v2410_v62, %v2409_v22  ;;  %v2504_v22 = vsel %vm579_vm3, %v4393_v60, %v4394_v49 }
 0x2de   :  { %v2362_v6 = vpop.f32.mrf.mxu1  ;;  %v2388_v55 = vpop.f32.mrf.mxu0 }
 0x2df   :  { %2418 = vst [vmem:[#allocation4 + $0x1c] sm:$0xff] %v2414_v11  ;;  %v2969_v34 = vunpack.c.l.bf16 %v2414_v11  ;;  %v2970_v50 = vunpack.c.h.bf16 %v2414_v11 }
 0x2e0   :  { %2861 = vst [vmem:[#allocation5 + $0x98] sm:$0xff] %v2414_v11  ;;  %3070 = vrot.lane.b32.xlu0 %v2414_v11, %s4517_s29  ;;  %2537 = vrot.lane.b32.xlu2 %v2525_v46, %s4514_s27 }
 0x2e1   :  { %v3010_v1 = vmul.f32 %v2993_v35, %v2969_v34  ;;  %v3011_v25 = vmul.f32 %v2994_v53, %v2970_v50  ;;  %v3147_v31 = vmul.f32 %v5959_v7, %v2969_v34  ;;  %v3148_v17 = vmul.f32 %v5962_v20, %v2970_v50 }
 0x2e2   :  { %v2914_v4 = vmul.f32 %v2969_v34, %v2897_v2  ;;  %v2915_v56 = vmul.f32 %v2970_v50, %v2898_v12  ;;  %v2875_v7 = vunpack.c.l.bf16 %v2866_v61 }
 0x2e3   :  { %v3016_v38 = vpack.c.bf16 %v3011_v25, %v3010_v1  ;;  %v3153_v36 = vpack.c.bf16 %v3148_v17, %v3147_v31  ;;  %v6152_v27 = vpop.permute.xlu2 %3160 }
 0x2e4   :  { %v2920_v24 = vpack.c.bf16 %v2915_v56, %v2914_v4  ;;  %v2916_v47 = vmul.f32 %v4379_v28, %v2875_v7  ;;  %v2584_v7 = vrot.slane %v6139_v3, 4 }
 0x2e5   :  { %3029 = vrot.lane.b32.xlu1 %v3016_v38, %s4510_s23 }
 0x2e6   :  { %v2608_v21 = vld [vmem:[#allocation4 + $0x18] sm:$0xff]  ;;  %v2609_v37 = vld [vmem:[#allocation4 + $0x20] sm:$0xf]  ;;  %v2921_v57 = vpack.c.bf16 %v2916_v47, %v2916_v47 }
 0x2e7   :  { %v2657_v20 = vunpack.c.l.bf16 %v2608_v21  ;;  %v2658_v29 = vunpack.c.h.bf16 %v2608_v21  ;;  %v2659_v14 = vunpack.c.l.bf16 %v2609_v37  ;;  %v2762_v42 = vld [vmem:[#allocation4 + $0x20] sm:$0xf] }
 0x2e8   :  { %3166 = vrot.lane.b32.xlu0 %v3153_v36, %s4509_s6  ;;  %2933 = vrot.lane.b32.xlu2 %v2920_v24, %s4513_s26  ;;  %v2771_v30 = vunpack.c.l.bf16 %v2762_v42  ;;  %v2423_v45 = vld [vmem:[#allocation4 + $0x20] sm:$0xf] }
 0x2e9   :  { %v2714_v44 = vmul.f32 %v2697_v0, %v2657_v20  ;;  %v2715_v43 = vmul.f32 %v2698_v5, %v2658_v29  ;;  %v2716_v18 = vmul.f32 %v4384_v9, %v2659_v14  ;;  %v2810_v59 = vmul.f32 %v2793_v48, %v2657_v20  ;;  %v2568_v34 = vld [vmem:[#allocation4 + $0x20] sm:$0xf] }
 0x2ea   :  { %v2812_v63 = vmul.f32 %v4389_v54, %v2771_v30  ;;  %v2811_v51 = vmul.f32 %v2794_v33, %v2658_v29  ;;  %v2520_v28 = vmul.f32 %v2657_v20, %v2503_v32  ;;  %v2521_v11 = vmul.f32 %v2658_v29, %v2504_v22 }
 0x2eb   :  { %v2720_v13 = vpack.c.bf16 %v2715_v43, %v2714_v44  ;;  %v2721_v19 = vpack.c.bf16 %v2716_v18, %v2716_v18  ;;  %v2465_v26 = vunpack.c.l.bf16 %v2423_v45  ;;  %v6168_v58 = vpop.permute.xlu2 %2927  ;;  %v3065_v50 = vpop.permute.xlu0 %3064  ;;  %v3170_v54 = vrot.slane %v6152_v27, 4 }
 0x2ec   :  { %v2817_v62 = vpack.c.bf16 %v2812_v63, %v2812_v63  ;;  %v2816_v16 = vpack.c.bf16 %v2811_v51, %v2810_v59  ;;  %v2526_v6 = vpack.c.bf16 %v2521_v11, %v2520_v28  ;;  %v3074_v4 = vrot.slane %v3065_v50, 4 }
 0x2ed   :  { %2733 = vrot.lane.b32.xlu1 %v2720_v13, %s4511_s24  ;;  %v2522_v52 = vmul.f32 %v4394_v49, %v2465_v26  ;;  %v2937_v59 = vrot.slane %v6168_v58, 4 }
 0x2ef   :  { %v6150_v8 = vpop.permute.xlu1 %3168  ;;  %v2527_v55 = vpack.c.bf16 %v2522_v52, %v2522_v52 }
 0x2f0   :  { %2935 = vrot.lane.b32.xlu0 %v2921_v57, %s4513_s26  ;;  %2735 = vrot.lane.b32.xlu2 %v2721_v19, %s4511_s24 }
 0x2f5   :  { %2831 = vrot.lane.b32.xlu1 %v2817_v62, %s4512_s25 }
 0x2f7   :  { %v6164_v41 = vpop.permute.xlu1 %3072 }
 0x2f8   :  { %2829 = vrot.lane.b32.xlu0 %v2816_v16, %s4512_s25  ;;  %2539 = vrot.lane.b32.xlu2 %v2526_v6, %s4514_s27 }
 0x2f9   :  { %v2824_v31 = vpop.permute.xlu0 %2823 }
 0x2fa   :  { %v2833_v42 = vrot.slane %v2824_v31, 4 }
 0x2fd   :  { %2580 = vrot.lane.b32.xlu1 %v2608_v21, %s4516_s28 }
 0x2ff   :  { %v3024_v46 = vpop.permute.xlu1 %3023 }
 0x300   :  { %2541 = vrot.lane.b32.xlu0 %v2527_v55, %s4514_s27  ;;  %2582 = vrot.lane.b32.xlu2 %v2568_v34, %s4516_s28  ;;  %v3033_v53 = vrot.slane %v3024_v46, 4 }
 0x301   :  { %v2534_v10 = vpop.permute.xlu0 %2533 }
 0x302   :  { %v6173_v35 = vpop.permute.xlu2 %3025  ;;  %v2543_v63 = vrot.slane %v2534_v10, 4 }
 0x303   :  { %v3034_v12 = vrot.slane %v6173_v35, 4 }
 0x305   :  { %v3038_v15 = vsel %vm664_vm9, %v3033_v53, %v3034_v12 }
 0x306   :  { %v3039_v1 = vsel %vm882_vm4, %v3024_v46, %v3038_v15 }
 0x307   :  { %3050 = vst [vmem:[#allocation5 + $0xc0] sm:$0xff] %v3039_v1  ;;  %v2728_v25 = vpop.permute.xlu1 %2727 }
 0x308   :  { %v2737_v17 = vrot.slane %v2728_v25, 4 }
 0x30a   :  { %v6180_v9 = vpop.permute.xlu2 %2729 }
 0x30b   :  { %v2738_v2 = vrot.slane %v6180_v9, 4 }
 0x30d   :  { %v2742_v38 = vsel %vm664_vm9, %v2737_v17, %v2738_v2 }
 0x30e   :  { %v2743_v61 = vsel %vm968_vm8, %v2728_v25, %v2742_v38  ;;  %v3991_v34 = vld [vmem:[#allocation5 + $0xc0] sm:$0xf]  ;;  %v4125_v1 = vld [vmem:[#allocation5 + $0xc4] sm:$0xf] }
 0x30f   :  { %2754 = vst [vmem:[#allocation5 + $0x40] sm:$0xff] %v2743_v61 }
 0x314   :  { %v3067_v36 = vpop.permute.xlu1 %3066 }
 0x315   :  { %v3075_v56 = vrot.slane %v3067_v36, 4 }
 0x317   :  { %v3079_v21 = vsel %vm664_vm9, %v3074_v4, %v3075_v56 }
 0x318   :  { %v3080_v37 = vsel %vm1553_vm11, %v3065_v50, %v3079_v21 }
 0x319   :  { %3091 = vst [vmem:[#allocation5 + $0xe0] sm:$0xff] %v3080_v37 }
 0x31c   :  { %v6189_v5 = vpop.permute.xlu0 %2576 }
 0x31d   :  { %v2585_v20 = vrot.slane %v6189_v5, 4 }
 0x31f   :  { %v2589_v29 = vsel %vm664_vm9, %v2584_v7, %v2585_v20 }
 0x320   :  { %v2590_v14 = vsel %vm749_vm10, %v6139_v3, %v2589_v29  ;;  %v4129_v26 = vld [vmem:[#allocation5 + $0xdc] sm:$0xf0]  ;;  %v3993_v55 = vld [vmem:[#allocation5 + $0xe0] sm:$0xf0] }
 0x321   :  { %2601 = vst [vmem:[#allocation5 + $0x20] sm:$0xff] %v2590_v14  ;;  %v3992_v15 = vor.u32 %v4129_v26, %v3991_v34  ;;  %v3996_v25 = vor.u32 %v4125_v1, %v3993_v55  ;;  %v6260_v26 = vld [vmem:[#allocation11] sm:$0xf] }
 0x322   :  { %v2826_v0 = vpop.permute.xlu1 %2825  ;;  %v6198_v24 = vpop.permute.xlu2 %3068 }
 0x323   :  { %v2834_v44 = vrot.slane %v2826_v0, 4  ;;  %v3076_v43 = vrot.slane %v6198_v24, 4 }
 0x324   :  { %v3163_v47 = vpop.permute.xlu0 %3162 }
 0x325   :  { %v2838_v13 = vsel %vm664_vm9, %v2833_v42, %v2834_v44  ;;  %v3171_v30 = vrot.slane %v3163_v47, 4  ;;  %v3081_v18 = vsel %vm664_vm9, %v3075_v56, %v3076_v43  ;;  %v4117_v56 = vld [vmem:[#allocation5 + $0x84] sm:$0xf] }
 0x326   :  { %v2839_v3 = vsel %vm1130_vm6, %v2824_v31, %v2838_v13  ;;  %v3082_v39 = vsel %vm1553_vm11, %v3067_v36, %v3081_v18  ;;  %v3959_v36 = vld [vmem:[#allocation5 + $0x80] sm:$0xf] }
 0x327   :  { %2850 = vst [vmem:[#allocation5 + $0x60] sm:$0xff] %v2839_v3  ;;  %v3175_v49 = vsel %vm664_vm9, %v3170_v54, %v3171_v30  ;;  %v3927_v13 = vld [vmem:[#allocation5 + $0x40] sm:$0xf] }
 0x328   :  { %v3176_v60 = vsel %vm579_vm3, %v6152_v27, %v3175_v49  ;;  %3092 = vst [vmem:[#allocation5 + $0xe8] sm:$0xff] %v3082_v39 }
 0x329   :  { %v3334_v23 = vunpack.c.l.b16 %v3176_v60  ;;  %v3335_v57 = vunpack.c.h.b16 %v3176_v60 }
 0x32a   :  { %v2536_v33 = vpop.permute.xlu1 %2535  ;;  %v6211_v19 = vpop.permute.xlu2 %3164 }
 0x32b   :  { %v2544_v32 = vrot.slane %v2536_v33, 4  ;;  %v3172_v22 = vrot.slane %v6211_v19, 4  ;;  %v3374_v48 = vpack.c.b16 %v3334_v23, %v3334_v23  ;;  %v3375_v62 = vpack.c.b16 %v3335_v57, %v3335_v57  ;;  %v4105_v23 = vld [vmem:[#allocation5 + $0x1c] sm:$0xf0]  ;;  %v3897_v57 = vld [vmem:[#allocation5 + $0x20] sm:$0xf0] }
 0x32c   :  { %v6215_v51 = vpop.permute.xlu0 %2929 }
 0x32d   :  { %v2548_v45 = vsel %vm664_vm9, %v2543_v63, %v2544_v32  ;;  %v2938_v27 = vrot.slane %v6215_v51, 4  ;;  %v3177_v28 = vsel %vm664_vm9, %v3171_v30, %v3172_v22  ;;  %v3420_v11 = vsel %vm664_vm9, %v3374_v48, 0 }
 0x32e   :  { %v2549_v16 = vsel %vm666_vm7, %v2534_v10, %v2548_v45  ;;  %v3178_v6 = vsel %vm579_vm3, %v3163_v47, %v3177_v28  ;;  %3446 = vmatpush.bf16.msra.mxu3 %v3420_v11  ;;  %v3423_v52 = vsel %vm664_vm9, %v3375_v62, 0  ;;  %v4113_v14 = vld [vmem:[#allocation5 + $0x5c] sm:$0xf0]  ;;  %v3929_v42 = vld [vmem:[#allocation5 + $0x60] sm:$0xf0] }
 0x32f   :  { %2560 = vst [vmem:[#allocation5] sm:$0xff] %v2549_v16  ;;  %v2942_v46 = vsel %vm664_vm9, %v2937_v59, %v2938_v27  ;;  %3459 = vmatpush.bf16.msra.mxu1 %v3423_v52  ;;  %v3336_v50 = vunpack.c.l.b16 %v3178_v6  ;;  %v3337_v54 = vunpack.c.h.b16 %v3178_v6  ;;  %v3928_v30 = vor.u32 %v4113_v14, %v3927_v13  ;;  %v4118_v14 = vld [vmem:[#allocation5 + $0x8c] sm:$0xf] }
 0x330   :  { %v2943_v53 = vsel %vm1044_vm5, %v6168_v58, %v2942_v46 }
 0x331   :  { %2954 = vst [vmem:[#allocation5 + $0xa0] sm:$0xff] %v2943_v53  ;;  %v3376_v31 = vpack.c.b16 %v3336_v50, %v3336_v50  ;;  %v3377_v60 = vpack.c.b16 %v3337_v54, %v3337_v54  ;;  %v4130_v50 = vld [vmem:[#allocation5 + $0xe4] sm:$0xf0] }
 0x332   :  { %v6231_v17 = vpop.permute.xlu2 %2827  ;;  %3447 = vmatpush.bf16.msra.mxu3 %v3992_v15 }
 0x333   :  { %v2835_v38 = vrot.slane %v6231_v17, 4  ;;  %3460 = vmatpush.bf16.msra.mxu1 %v3996_v25  ;;  %v3426_v61 = vsel %vm664_vm9, %v3376_v31, 0  ;;  %v4001_v25 = vld [vmem:[#allocation5 + $0xe8] sm:$0xf0] }
 0x334   :  { %3472 = vmatpush.bf16.msra.mxu2 %v3426_v61 }
 0x335   :  { %v2840_v10 = vsel %vm664_vm9, %v2834_v44, %v2835_v38  ;;  %v4109_v44 = vld [vmem:[#allocation5 + $0x44] sm:$0xf] }
 0x336   :  { %v2841_v58 = vsel %vm1130_vm6, %v2826_v0, %v2840_v10  ;;  %v3932_v18 = vor.u32 %v4109_v44, %v3929_v42  ;;  %v3895_v39 = vld [vmem:[#allocation5] sm:$0xf]  ;;  %v4101_v49 = vld [vmem:[#allocation5 + $0x4] sm:$0xf]  ;;  %v3037_v42 = vrot.slane %v6121_v40, 4 }
 0x337   :  { %2851 = vst [vmem:[#allocation5 + $0x68] sm:$0xff] %v2841_v58  ;;  %v3896_v48 = vor.u32 %v4105_v23, %v3895_v39  ;;  %v3900_v62 = vor.u32 %v4101_v49, %v3897_v57  ;;  %v3228_v49 = vld [vmem:[%s6390_s5] sm:$0xff]  ;;  %s4518_s5 = smov [#allocation12]  }
 0x338   :  { %v4121_v4 = vld [vmem:[#allocation5 + $0x9c] sm:$0xf0]  ;;  %v3961_v21 = vld [vmem:[#allocation5 + $0xa0] sm:$0xf0]  ;;  %3231 = vperm.xlu0 %4395, %v3228_v49   ;;  %s3568_s11 = sshll.u32 %s4518_s5, 4  ;;  %s3569_s11 = int_to_ptr.vmem [resolvable:$true] %s3568_s11 }
 0x339   :  { %v3960_v37 = vor.u32 %v4121_v4, %v3959_v36  ;;  %v3964_v7 = vor.u32 %v4117_v56, %v3961_v21  ;;  %v3078_v4 = vrot.slane %v6164_v41, 4 }
 0x33a   :  { %v6239_v29 = vpop.permute.xlu2 %2537 }
 0x33b   :  { %3448 = vmatpush.bf16.msra.mxu3 %v3960_v37  ;;  %3461 = vmatpush.bf16.msra.mxu1 %v3964_v7  ;;  %v2545_v47 = vrot.slane %v6239_v29, 4  ;;  %v3967_v7 = vld [vmem:[#allocation5 + $0x88] sm:$0xf] }
 0x33d   :  { %v2550_v0 = vsel %vm664_vm9, %v2544_v32, %v2545_v47 }
 0x33e   :  { %v2551_v3 = vsel %vm666_vm7, %v2536_v33, %v2550_v0  ;;  %v3429_v33 = vsel %vm664_vm9, %v3377_v60, 0 }
 0x33f   :  { %2561 = vst [vmem:[#allocation5 + $0x8] sm:$0xff] %v2551_v3  ;;  %3449 = vmatpush.bf16.msra.mxu3 %v3928_v30  ;;  %3462 = vmatpush.bf16.msra.mxu1 %v3932_v18 }
 0x340   :  { %v6246_v63 = vpop.permute.xlu1 %3027 }
 0x341   :  { %v3035_v59 = vrot.slane %v6246_v63, 4 }
 0x342   :  { %v6249_v45 = vpop.permute.xlu0 %2578  ;;  %v6258_v11 = vpop.permute.xlu2 %2933 }
 0x343   :  { %v2586_v32 = vrot.slane %v6249_v45, 4  ;;  %3450 = vmatpush.bf16.msra.mxu3 %v3896_v48  ;;  %3463 = vmatpush.bf16.msra.mxu1 %v3900_v62  ;;  %v3040_v28 = vsel %vm664_vm9, %v3034_v12, %v3035_v59  ;;  %v2940_v46 = vrot.slane %v6258_v11, 4  ;;  %v4114_v48 = vld [vmem:[#allocation5 + $0x64] sm:$0xf0]  ;;  %v3937_v62 = vld [vmem:[#allocation5 + $0x68] sm:$0xf0] }
 0x344   :  { %v3041_v16 = vsel %vm882_vm4, %v6173_v35, %v3040_v28 }
 0x345   :  { %v2591_v6 = vsel %vm664_vm9, %v2585_v20, %v2586_v32  ;;  %3051 = vst [vmem:[#allocation5 + $0xc8] sm:$0xff] %v3041_v16 }
 0x346   :  { %v2592_v52 = vsel %vm749_vm10, %v6189_v5, %v2591_v6  ;;  %4021 = vmatmul.msk.bf16.vlgmr.msra.gmra.mxu3 %vm3414_vm12, %v6260_v26  ;;  %4022 = vmatmul.msk.bf16.vlgmr.msra.gmra.mxu1 %vm3414_vm12, %v6260_v26 }
 0x347   :  { %3485 = vmatpush.bf16.msrb.mxu3 %v3429_v33  ;;  %2602 = vst [vmem:[#allocation5 + $0x28] sm:$0xff] %v2592_v52 }
 0x348   :  { %v6275_v12 = vpop.permute.xlu1 %2731 }
 0x349   :  { %v2739_v35 = vrot.slane %v6275_v12, 4 }
 0x34a   :  { %v2932_v55 = vpop.permute.xlu0 %2931  ;;  %v6284_v20 = vpop.permute.xlu2 %2735 }
 0x34b   :  { %v2939_v34 = vrot.slane %v2932_v55, 4  ;;  %v2744_v5 = vsel %vm664_vm9, %v2738_v2, %v2739_v35 }
 0x34c   :  { %v2745_v53 = vsel %vm968_vm8, %v6180_v9, %v2744_v5  ;;  %v3999_v15 = vld [vmem:[#allocation5 + $0xc8] sm:$0xf]  ;;  %v4126_v1 = vld [vmem:[#allocation5 + $0xcc] sm:$0xf] }
 0x34d   :  { %v2944_v31 = vsel %vm664_vm9, %v2938_v27, %v2939_v34  ;;  %v2946_v61 = vsel %vm664_vm9, %v2939_v34, %v2940_v46  ;;  %2755 = vst [vmem:[#allocation5 + $0x48] sm:$0xff] %v2745_v53  ;;  %v4000_v10 = vor.u32 %v4130_v50, %v3999_v15  ;;  %v4004_v2 = vor.u32 %v4126_v1, %v4001_v25  ;;  %v3903_v34 = vld [vmem:[#allocation5 + $0x8] sm:$0xf]  ;;  %v4102_v5 = vld [vmem:[#allocation5 + $0xc] sm:$0xf] }
 0x34e   :  { %v2945_v58 = vsel %vm1044_vm5, %v6215_v51, %v2944_v31  ;;  %v2947_v36 = vsel %vm1044_vm5, %v2932_v55, %v2946_v61  ;;  %v4106_v52 = vld [vmem:[#allocation5 + $0x24] sm:$0xf0]  ;;  %v3905_v55 = vld [vmem:[#allocation5 + $0x28] sm:$0xf0] }
 0x34f   :  { %2955 = vst [vmem:[#allocation5 + $0xa8] sm:$0xff] %v2945_v58  ;;  %3473 = vmatpush.bf16.msra.mxu2 %v4000_v10  ;;  %3486 = vmatpush.bf16.msrb.mxu3 %v4004_v2  ;;  %v3904_v15 = vor.u32 %v4106_v52, %v3903_v34  ;;  %v3908_v1 = vor.u32 %v4102_v5, %v3905_v55  ;;  %v3983_v55 = vld [vmem:[#allocation5 + $0x98] sm:$0xf]  ;;  %v4120_v5 = vld [vmem:[#allocation5 + $0x9c] sm:$0xf] }
 0x350   :  { %2956 = vst [vmem:[#allocation5 + $0xb0] sm:$0xff] %v2947_v36 }
 0x352   :  { %v3071_v9 = vpop.permute.xlu0 %3070  ;;  %v6298_v56 = vpop.permute.xlu2 %2539 }
 0x353   :  { %v3077_v27 = vrot.slane %v3071_v9, 4  ;;  %v2546_v21 = vrot.slane %v6298_v56, 4 }
 0x354   :  { %v4110_v39 = vld [vmem:[#allocation5 + $0x4c] sm:$0xf] }
 0x355   :  { %v3083_v37 = vsel %vm664_vm9, %v3076_v43, %v3077_v27  ;;  %v3085_v51 = vsel %vm664_vm9, %v3077_v27, %v3078_v4  ;;  %v2552_v13 = vsel %vm664_vm9, %v2545_v47, %v2546_v21  ;;  %v3940_v16 = vor.u32 %v4110_v39, %v3937_v62 }
 0x356   :  { %v3084_v54 = vsel %vm1553_vm11, %v6198_v24, %v3083_v37  ;;  %v3086_v41 = vsel %vm1553_vm11, %v3071_v9, %v3085_v51  ;;  %v4122_v44 = vld [vmem:[#allocation5 + $0xa4] sm:$0xf0]  ;;  %v3969_v0 = vld [vmem:[#allocation5 + $0xa8] sm:$0xf0]  ;;  %v2553_v30 = vsel %vm666_vm7, %v6239_v29, %v2552_v13  ;;  %v3174_v29 = vrot.slane %v6150_v8, 4 }
 0x357   :  { %v3030_v43 = vpop.permute.xlu1 %3029  ;;  %3093 = vst [vmem:[#allocation5 + $0xf0] sm:$0xff] %v3084_v54  ;;  %v3968_v18 = vor.u32 %v4122_v44, %v3967_v7  ;;  %v3972_v40 = vor.u32 %v4118_v14, %v3969_v0  ;;  %v3935_v24 = vld [vmem:[#allocation5 + $0x48] sm:$0xf] }
 0x358   :  { %v3036_v3 = vrot.slane %v3030_v43, 4  ;;  %3094 = vst [vmem:[#allocation5 + $0xf8] sm:$0xff] %v3086_v41  ;;  %v3936_v28 = vor.u32 %v4114_v48, %v3935_v24  ;;  %v4119_v48 = vld [vmem:[#allocation5 + $0x94] sm:$0xf] }
 0x359   :  { %2562 = vst [vmem:[#allocation5 + $0x10] sm:$0xff] %v2553_v30  ;;  %3474 = vmatpush.bf16.msra.mxu2 %v3968_v18  ;;  %3487 = vmatpush.bf16.msrb.mxu3 %v3972_v40 }
 0x35a   :  { %v3042_v47 = vsel %vm664_vm9, %v3035_v59, %v3036_v3  ;;  %v3044_v60 = vsel %vm664_vm9, %v3036_v3, %v3037_v42  ;;  %v3167_v33 = vpop.permute.xlu0 %3166  ;;  %v2741_v59 = vrot.slane %v6284_v20, 4 }
 0x35b   :  { %v3043_v23 = vsel %vm882_vm4, %v6246_v63, %v3042_v47  ;;  %v3045_v57 = vsel %vm882_vm4, %v3030_v43, %v3044_v60  ;;  %v3173_v6 = vrot.slane %v3167_v33, 4  ;;  %v4123_v47 = vld [vmem:[#allocation5 + $0xac] sm:$0xf0] }
 0x35c   :  { %3052 = vst [vmem:[#allocation5 + $0xd0] sm:$0xff] %v3043_v23  ;;  %v3975_v23 = vld [vmem:[#allocation5 + $0x90] sm:$0xf] }
 0x35d   :  { %3053 = vst [vmem:[#allocation5 + $0xd8] sm:$0xff] %v3045_v57  ;;  %3475 = vmatpush.bf16.msra.mxu2 %v3936_v28  ;;  %3488 = vmatpush.bf16.msrb.mxu3 %v3940_v16  ;;  %v3179_v8 = vsel %vm664_vm9, %v3172_v22, %v3173_v6  ;;  %v3181_v63 = vsel %vm664_vm9, %v3173_v6, %v3174_v29  ;;  %v3977_v29 = vld [vmem:[#allocation5 + $0xb0] sm:$0xf0]  ;;  %v2583_v16 = vpop.permute.xlu2 %2582 }
 0x35e   :  { %v3180_v50 = vsel %vm579_vm3, %v6211_v19, %v3179_v8  ;;  %v3182_v53 = vsel %vm579_vm3, %v3167_v33, %v3181_v63  ;;  %v4131_v0 = vld [vmem:[#allocation5 + $0xec] sm:$0xf0]  ;;  %v4009_v3 = vld [vmem:[#allocation5 + $0xf0] sm:$0xf0]  ;;  %v3976_v57 = vor.u32 %v4123_v47, %v3975_v23  ;;  %v3980_v28 = vor.u32 %v4119_v48, %v3977_v29 }
 0x35f   :  { %v2734_v25 = vpop.permute.xlu1 %2733  ;;  %v3338_v20 = vunpack.c.l.b16 %v3180_v50  ;;  %v3339_v61 = vunpack.c.h.b16 %v3180_v50  ;;  %v3340_v10 = vunpack.c.l.b16 %v3182_v53  ;;  %v3341_v2 = vunpack.c.h.b16 %v3182_v53  ;;  %v4132_v24 = vld [vmem:[#allocation5 + $0xf4] sm:$0xf0]  ;;  %v4017_v49 = vld [vmem:[#allocation5 + $0xf8] sm:$0xf0] }
 0x360   :  { %v2740_v31 = vrot.slane %v2734_v25, 4  ;;  %v2588_v53 = vrot.slane %v2583_v16, 4 }
 0x361   :  { %3476 = vmatpush.bf16.msra.mxu2 %v3904_v15  ;;  %3489 = vmatpush.bf16.msrb.mxu3 %v3908_v1  ;;  %v3378_v36 = vpack.c.b16 %v3338_v20, %v3338_v20  ;;  %v3379_v27 = vpack.c.b16 %v3339_v61, %v3339_v61  ;;  %v3380_v37 = vpack.c.b16 %v3340_v10, %v3340_v10 }
 0x362   :  { %v2746_v22 = vsel %vm664_vm9, %v2739_v35, %v2740_v31  ;;  %v2748_v58 = vsel %vm664_vm9, %v2740_v31, %v2741_v59  ;;  %v2936_v4 = vpop.permute.xlu0 %2935  ;;  %v3381_v42 = vpack.c.b16 %v3341_v2, %v3341_v2 }
 0x363   :  { %v2747_v19 = vsel %vm968_vm8, %v6275_v12, %v2746_v22  ;;  %v2749_v9 = vsel %vm968_vm8, %v2734_v25, %v2748_v58  ;;  %v4007_v51 = vld [vmem:[#allocation5 + $0xd0] sm:$0xf]  ;;  %v2941_v7 = vrot.slane %v2936_v4, 4  ;;  %v3432_v14 = vsel %vm664_vm9, %v3378_v36, 0  ;;  %v4127_v54 = vld [vmem:[#allocation5 + $0xd4] sm:$0xf] }
 0x364   :  { %2756 = vst [vmem:[#allocation5 + $0x50] sm:$0xff] %v2747_v19  ;;  %3498 = vmatpush.bf16.msra.mxu0 %v3432_v14  ;;  %v3435_v35 = vsel %vm664_vm9, %v3379_v27, 0  ;;  %v3438_v41 = vsel %vm664_vm9, %v3380_v37, 0  ;;  %4023 = vmatmul.msk.bf16.vlgmr.msra.gmra.mxu2 %vm3414_vm12, %v6260_v26  ;;  %v4015_v12 = vld [vmem:[#allocation5 + $0xd8] sm:$0xf]  ;;  %v3441_v44 = vsel %vm664_vm9, %v3381_v42, 0  ;;  %v4008_v40 = vor.u32 %v4131_v0, %v4007_v51 }
 0x365   :  { %2757 = vst [vmem:[#allocation5 + $0x58] sm:$0xff] %v2749_v9  ;;  %v2948_v13 = vsel %vm664_vm9, %v2940_v46, %v2941_v7  ;;  %3511 = vmatpush.bf16.msrb.mxu1 %v3435_v35  ;;  %3524 = vmatpush.bf16.msrb.mxu2 %v3438_v41  ;;  %v4128_v43 = vld [vmem:[#allocation5 + $0xdc] sm:$0xf]  ;;  %v4012_v39 = vor.u32 %v4127_v54, %v4009_v3  ;;  %v3911_v42 = vld [vmem:[#allocation5 + $0x10] sm:$0xf] }
 0x366   :  { %v2949_v30 = vsel %vm1044_vm5, %v6258_v11, %v2948_v13  ;;  %3537 = vmatpush.bf16.msra.mxu3 %v3441_v44  ;;  %v4016_v46 = vor.u32 %v4132_v24, %v4015_v12  ;;  %v4020_v60 = vor.u32 %v4128_v43, %v4017_v49  ;;  %v4103_v54 = vld [vmem:[#allocation5 + $0x14] sm:$0xf] }
 0x367   :  { %v2832_v18 = vpop.permute.xlu1 %2831  ;;  %2957 = vst [vmem:[#allocation5 + $0xb8] sm:$0xff] %v2949_v30  ;;  %4024 = vmatmul.msk.bf16.vlgmr.msrb.gmra.mxu3 %vm3414_vm12, %v6260_v26 }
 0x368   :  { %3499 = vmatpush.bf16.msra.mxu0 %v4008_v40  ;;  %v2837_v62 = vrot.slane %v2832_v18, 4 }
 0x369   :  { %3512 = vmatpush.bf16.msrb.mxu1 %v4012_v39  ;;  %3525 = vmatpush.bf16.msrb.mxu2 %v4016_v46 }
 0x36a   :  { %v2830_v11 = vpop.permute.xlu0 %2829  ;;  %3538 = vmatpush.bf16.msra.mxu3 %v4020_v60 }
 0x36b   :  { %v2836_v33 = vrot.slane %v2830_v11, 4  ;;  %v3943_v22 = vld [vmem:[#allocation5 + $0x50] sm:$0xf]  ;;  %v4111_v58 = vld [vmem:[#allocation5 + $0x54] sm:$0xf] }
 0x36c   :  { %3500 = vmatpush.bf16.msra.mxu0 %v3976_v57  ;;  %v4112_v4 = vld [vmem:[#allocation5 + $0x5c] sm:$0xf] }
 0x36d   :  { %v2842_v6 = vsel %vm664_vm9, %v2835_v38, %v2836_v33  ;;  %v2844_v52 = vsel %vm664_vm9, %v2836_v33, %v2837_v62  ;;  %3513 = vmatpush.bf16.msrb.mxu1 %v3980_v28 }
 0x36e   :  { %v2843_v59 = vsel %vm1130_vm6, %v6231_v17, %v2842_v6  ;;  %v2845_v8 = vsel %vm1130_vm6, %v2830_v11, %v2844_v52  ;;  %v4124_v34 = vld [vmem:[#allocation5 + $0xb4] sm:$0xf0]  ;;  %v3985_v50 = vld [vmem:[#allocation5 + $0xb8] sm:$0xf0] }
 0x36f   :  { %v2581_v63 = vpop.permute.xlu1 %2580  ;;  %2852 = vst [vmem:[#allocation5 + $0x70] sm:$0xff] %v2843_v59  ;;  %v3984_v1 = vor.u32 %v4124_v34, %v3983_v55  ;;  %v3988_v25 = vor.u32 %v4120_v5, %v3985_v50 }
 0x370   :  { %v2587_v15 = vrot.slane %v2581_v63, 4  ;;  %2853 = vst [vmem:[#allocation5 + $0x78] sm:$0xff] %v2845_v8 }
 0x371   :  { %3526 = vmatpush.bf16.msrb.mxu2 %v3984_v1  ;;  %3539 = vmatpush.bf16.msra.mxu3 %v3988_v25 }
 0x372   :  { %v2593_v38 = vsel %vm664_vm9, %v2586_v32, %v2587_v15  ;;  %v2595_v31 = vsel %vm664_vm9, %v2587_v15, %v2588_v53  ;;  %v2542_v61 = vpop.permute.xlu0 %2541  ;;  %v3951_v32 = vld [vmem:[#allocation5 + $0x58] sm:$0xf] }
 0x373   :  { %v2594_v17 = vsel %vm749_vm10, %v6249_v45, %v2593_v38  ;;  %v2596_v20 = vsel %vm749_vm10, %v2581_v63, %v2595_v31  ;;  %v2547_v10 = vrot.slane %v2542_v61, 4 }
 0x374   :  { %2603 = vst [vmem:[#allocation5 + $0x30] sm:$0xff] %v2594_v17 }
 0x375   :  { %2604 = vst [vmem:[#allocation5 + $0x38] sm:$0xff] %v2596_v20  ;;  %v2554_v2 = vsel %vm664_vm9, %v2546_v21, %v2547_v10 }
 0x376   :  { %v2555_v36 = vsel %vm666_vm7, %v6298_v56, %v2554_v2  ;;  %v4115_v19 = vld [vmem:[#allocation5 + $0x6c] sm:$0xf0]  ;;  %v3945_v9 = vld [vmem:[#allocation5 + $0x70] sm:$0xf0] }
 0x377   :  { %2563 = vst [vmem:[#allocation5 + $0x18] sm:$0xff] %v2555_v36  ;;  %v3944_v45 = vor.u32 %v4115_v19, %v3943_v22  ;;  %v3948_v27 = vor.u32 %v4111_v58, %v3945_v9  ;;  %v4116_v37 = vld [vmem:[#allocation5 + $0x74] sm:$0xf0]  ;;  %v3953_v51 = vld [vmem:[#allocation5 + $0x78] sm:$0xf0] }
 0x378   :  { %v3952_v7 = vor.u32 %v4116_v37, %v3951_v32  ;;  %v3956_v14 = vor.u32 %v4112_v4, %v3953_v51 }
 0x379   :  { %3501 = vmatpush.bf16.msra.mxu0 %v3944_v45  ;;  %3514 = vmatpush.bf16.msrb.mxu1 %v3948_v27 }
 0x37a   :  { %3527 = vmatpush.bf16.msrb.mxu2 %v3952_v7  ;;  %3540 = vmatpush.bf16.msra.mxu3 %v3956_v14 }
 0x37b   :  { %v4107_v21 = vld [vmem:[#allocation5 + $0x2c] sm:$0xf0]  ;;  %v3913_v35 = vld [vmem:[#allocation5 + $0x30] sm:$0xf0] }
 0x37c   :  { %v3912_v41 = vor.u32 %v4107_v21, %v3911_v42  ;;  %v3916_v56 = vor.u32 %v4103_v54, %v3913_v35  ;;  %v4108_v12 = vld [vmem:[#allocation5 + $0x34] sm:$0xf0]  ;;  %v3921_v0 = vld [vmem:[#allocation5 + $0x38] sm:$0xf0] }
 0x37e   :  { %3502 = vmatpush.bf16.msra.mxu0 %v3912_v41  ;;  %3515 = vmatpush.bf16.msrb.mxu1 %v3916_v56  ;;  %v3919_v13 = vld [vmem:[#allocation5 + $0x18] sm:$0xf]  ;;  %v4104_v44 = vld [vmem:[#allocation5 + $0x1c] sm:$0xf] }
 0x37f   :  { %v3920_v43 = vor.u32 %v4108_v12, %v3919_v13  ;;  %v3924_v30 = vor.u32 %v4104_v44, %v3921_v0 }
 0x381   :  { %4025 = vmatmul.msk.bf16.vlgmr.msra.gmra.mxu0 %vm3414_vm12, %v6260_v26  ;;  %4026 = vmatmul.msk.bf16.vlgmr.msrb.gmra.mxu1 %vm3414_vm12, %v6260_v26 }
 0x382   :  { %3528 = vmatpush.bf16.msrb.mxu2 %v3920_v43  ;;  %3541 = vmatpush.bf16.msra.mxu3 %v3924_v30 }
 0x385   :  { %4027 = vmatmul.msk.bf16.vlgmr.msrb.gmra.mxu2 %vm3414_vm12, %v6260_v26  ;;  %4028 = vmatmul.msk.bf16.vlgmr.msra.gmra.mxu3 %vm3414_vm12, %v6260_v26 }
 0x3aa   :  { %v3232_v24 = vpop.permute.xlu0 %3231 }
 0x3c3   :  { %v3465_v18 = vpop.f32.mrf.mxu1 }
 0x3c4   :  { %v3466_v46 = vadd.f32 %v3465_v18, %v3232_v24 }
 0x3c6   :  { %v3548_v47 = vmax.f32 %v3466_v46, 0.0 }
 0x3c8   :  { %3556 = vst [vmem:[#allocation12 + $0x8] sm:$0xff] %v3548_v47 }
 0x3c9   :  { %v3452_v40 = vpop.f32.mrf.mxu3 }
 0x3ca   :  { %v3453_v39 = vadd.f32 %v3452_v40, %v3232_v24 }
 0x3cb   :  { %v3467_v3 = vpop.f32.mrf.mxu1 }
 0x3cc   :  { %v3547_v49 = vmax.f32 %v3453_v39, 0.0 }
 0x3ce   :  { %3555 = vst [vmem:[#allocation12] sm:$0xff] %v3547_v49 }
 0x3d1   :  { %v3454_v60 = vpop.f32.mrf.mxu3 }
 0x3e7   :  { %v3478_v29 = vpop.f32.mrf.mxu2 }
 0x3e8   :  { %v3479_v23 = vadd.f32 %v3478_v29, %v3232_v24 }
 0x3ea   :  { %v3549_v11 = vmax.f32 %v3479_v23, 0.0  ;;  %v3491_v57 = vpop.f32.mrf.mxu3 }
 0x3eb   :  { %v3492_v48 = vadd.f32 %v3491_v57, %v3232_v24 }
 0x3ec   :  { %3557 = vst [vmem:[#allocation12 + $0x10] sm:$0xff] %v3549_v11 }
 0x3ed   :  { %v3550_v62 = vmax.f32 %v3492_v48, 0.0 }
 0x3ef   :  { %3558 = vst [vmem:[#allocation12 + $0x18] sm:$0xff] %v3550_v62  ;;  %v3480_v26 = vpop.f32.mrf.mxu2 }
 0x3f2   :  { %v3493_v33 = vpop.f32.mrf.mxu3 }
 0x3fe   :  { %v3504_v28 = vpop.f32.mrf.mxu0  ;;  %v3517_v16 = vpop.f32.mrf.mxu1 }
 0x3ff   :  { %v3505_v6 = vadd.f32 %v3504_v28, %v3232_v24  ;;  %v3518_v52 = vadd.f32 %v3517_v16, %v3232_v24 }
 0x401   :  { %v3551_v55 = vmax.f32 %v3505_v6, 0.0  ;;  %v3552_v59 = vmax.f32 %v3518_v52, 0.0 }
 0x403   :  { %3559 = vst [vmem:[#allocation12 + $0x20] sm:$0xff] %v3551_v55 }
 0x404   :  { %3560 = vst [vmem:[#allocation12 + $0x28] sm:$0xff] %v3552_v59 }
 0x406   :  { %v3506_v8 = vpop.f32.mrf.mxu0  ;;  %v3519_v63 = vpop.f32.mrf.mxu1 }
 0x408   :  { %v3530_v34 = vpop.f32.mrf.mxu2  ;;  %v3543_v5 = vpop.f32.mrf.mxu3 }
 0x409   :  { %v3531_v50 = vadd.f32 %v3530_v34, %v3232_v24  ;;  %v3544_v53 = vadd.f32 %v3543_v5, %v3232_v24 }
 0x40b   :  { %v3553_v15 = vmax.f32 %v3531_v50, 0.0  ;;  %v3554_v1 = vmax.f32 %v3544_v53, 0.0 }
 0x40d   :  { %3561 = vst [vmem:[#allocation12 + $0x30] sm:$0xff] %v3553_v15 }
 0x40e   :  { %3562 = vst [vmem:[#allocation12 + $0x38] sm:$0xff] %v3554_v1 }
 0x40f   :  { %3573 = dma.vmem_to_hbm [thread:$0]  %s3569_s11, 1024, %s3571_s14, [#allocation8]  }
 0x410   :  { %v3532_v25 = vpop.f32.mrf.mxu2  ;;  %v3545_v38 = vpop.f32.mrf.mxu3 }
 0x411   :  { %4496 = dma.done.wait [#allocation8], 1024  }
 0x412   :  { %4497 = vsyncadd [#allocation8], 4294966272 }
 0x413   :  { %3578 = vsyncpa [#allocation7], 1 }
 0x414   :  { %3579 = vsyncpa [#allocation10], 1 }
 0x415   :  { %3580 = vsyncpa [#allocation8], 1 }

</bundles_post_ra>
